<compile_context>
chip_gen: v7x
topology: tpu7x:2x2x1
jax: 0.10.0
libtpu: 0.0.40
codegen_flags: <defaults>
</compile_context>

<pallas_src>
import functools
import math

import numpy as np

import jax
import jax.numpy as jnp
from jax.experimental import pallas as pl
from jax.experimental.pallas import tpu as pltpu

NEG_SLOPE = 0.01               # torch.nn.LeakyReLU default negative_slope
COMPUTE_DTYPE = jnp.bfloat16   # MXU input dtype; accumulation stays fp32


# --------------------------- gather-matrix helper -----------------------------

def _tap_gather_matrices(h, w, ho, wo):
    """9 {0,1} matrices G_t of shape (ho*wo, h*w).

    G_t @ x_flat gathers, for every output position (ho_i, wo_i), the input
    pixel of tap t = kh*3 + kw of a 3x3 / stride-2 / pad-1 convolution.  Rows
    whose source pixel falls in the zero padding are all-zero (exact zero pad).
    Built with numpy from static shapes only (trace-time constants).
    """
    g = np.zeros((9, ho * wo, h * w), np.float32)
    for kh in range(3):
        sh = np.zeros((ho, h), np.float32)
        src_h = 2 * np.arange(ho) + kh - 1
        ok_h = (src_h >= 0) & (src_h < h)
        sh[np.arange(ho)[ok_h], src_h[ok_h]] = 1.0
        for kw in range(3):
            sw = np.zeros((wo, w), np.float32)
            src_w = 2 * np.arange(wo) + kw - 1
            ok_w = (src_w >= 0) & (src_w < w)
            sw[np.arange(wo)[ok_w], src_w[ok_w]] = 1.0
            g[kh * 3 + kw] = np.kron(sh, sw)   # rows: ho*Wo+wo, cols: h*W+w
    return g


# ------------------------------ fused Pallas kernel ---------------------------

def _fused_block_kernel(*refs, num_layers):
    """One sample per grid step; the whole block runs VMEM-resident.

    refs = [x, (g_taps, w_taps, bias) * num_layers, w_lin, b_lin, out]
      x       : (1, H*W, C_in)            bf16
      g_taps  : (9, Ho*Wo, H*W)           bf16  ({0,1} gather matrices)
      w_taps  : (9, C_in, C_out)          bf16  (conv weight per tap)
      bias    : (1, C_out)                f32
      w_lin   : (C, C)                    bf16  (EqualLinear scale pre-folded)
      b_lin   : (1, C)                    f32
      out     : (1, Hf*Wf, C)             f32
    """
    x_ref = refs[0]
    w_lin_ref = refs[1 + 3 * num_layers]
    b_lin_ref = refs[2 + 3 * num_layers]
    o_ref = refs[3 + 3 * num_layers]

    a = x_ref[0]                                   # (H*W, C_in) bf16
    for layer in range(num_layers):
        g_ref = refs[1 + 3 * layer]
        w_ref = refs[2 + 3 * layer]
        b_ref = refs[3 + 3 * layer]
        m_out = g_ref.shape[1]
        c_out = w_ref.shape[2]

        # fp32 accumulator, conv bias folded into the init (no extra VPU pass).
        y = jnp.broadcast_to(b_ref[...], (m_out, c_out))
        for t in range(9):                         # static unroll over 3x3 taps
            # Patch gather via 0/1 selection matmul -> exact in bf16.
            p = jnp.dot(g_ref[t], a, preferred_element_type=jnp.float32)
            p = p.astype(jnp.bfloat16)
            # Tap contribution, fp32 MXU accumulation.
            y = y + jnp.dot(p, w_ref[t], preferred_element_type=jnp.float32)
        y = jnp.where(y >= 0, y, NEG_SLOPE * y)    # LeakyReLU in fp32
        a = y.astype(jnp.bfloat16)                 # bf16 intermediate, stays in VMEM

    # EqualLinear (scale already folded into the weight at init).
    out = jnp.dot(a, w_lin_ref[...], preferred_element_type=jnp.float32)
    out = out + b_lin_ref[...]
    o_ref[...] = out.reshape(o_ref.shape)


# --------------------------- module init / apply ------------------------------

def gradual_style_block_init(key, in_c, out_c, spatial):
    """Deterministic synthetic params matching GradualStyleBlock.__init__ shapes."""
    num_pools = int(math.log2(spatial))
    keys = jax.random.split(key, num_pools + 1)
    convs = []
    cin = in_c
    for i in range(num_pools):
        fan_in = 9 * cin
        w = jax.random.normal(keys[i], (3, 3, cin, out_c), jnp.float32) / math.sqrt(fan_in)
        b = jnp.zeros((out_c,), jnp.float32)
        convs.append((w, b))
        cin = out_c
    # EqualLinear(out_c, out_c, lr_mul=1): weight ~ randn(out, in), bias zeros,
    # scale = 1/sqrt(in).  Fold the scale into the (transposed) weight here so
    # no runtime scalar reaches the kernel (fixes the captured-constant error).
    w_lin = jax.random.normal(keys[-1], (out_c, out_c), jnp.float32)   # (out, in)
    scale = 1.0 / math.sqrt(out_c)
    w_lin_t = (w_lin * scale).T                                        # (in, out)
    b_lin = jnp.zeros((out_c,), jnp.float32)
    return {"convs": convs, "linear": (w_lin_t, b_lin)}


def gradual_style_block_apply(params, x_nchw):
    n, c_in, h, w = x_nchw.shape
    num_layers = len(params["convs"])
    out_c = params["linear"][0].shape[1]

    # NCHW -> (N, H*W, C): tiny one-off layout change so channels sit on the
    # lane axis; everything downstream is a single fused kernel.
    x = jnp.transpose(x_nchw, (0, 2, 3, 1)).reshape(n, h * w, c_in)
    x = x.astype(COMPUTE_DTYPE)

    inputs = [x]
    in_specs = [pl.BlockSpec((1, h * w, c_in), lambda i: (i, 0, 0))]

    hh, ww = h, w
    for (w_conv, b_conv) in params["convs"]:
        cin, cout = w_conv.shape[2], w_conv.shape[3]
        ho, wo = (hh - 1) // 2 + 1, (ww - 1) // 2 + 1
        g = jnp.asarray(_tap_gather_matrices(hh, ww, ho, wo), COMPUTE_DTYPE)
        w_taps = w_conv.reshape(9, cin, cout).astype(COMPUTE_DTYPE)   # (kh,kw) major
        b2 = b_conv.reshape(1, cout).astype(jnp.float32)
        inputs += [g, w_taps, b2]
        in_specs += [
            pl.BlockSpec(g.shape, lambda i: (0, 0, 0)),       # broadcast to all steps
            pl.BlockSpec(w_taps.shape, lambda i: (0, 0, 0)),
            pl.BlockSpec(b2.shape, lambda i: (0, 0)),
        ]
        hh, ww = ho, wo

    w_lin, b_lin = params["linear"]
    w_lin = w_lin.astype(COMPUTE_DTYPE)
    b_lin2 = b_lin.reshape(1, out_c).astype(jnp.float32)
    inputs += [w_lin, b_lin2]
    in_specs += [pl.BlockSpec(w_lin.shape, lambda i: (0, 0)),
                 pl.BlockSpec(b_lin2.shape, lambda i: (0, 0))]

    mf = hh * ww   # 1 for power-of-two spatial (matches torch x.view(-1, out_c))

    out = pl.pallas_call(
        functools.partial(_fused_block_kernel, num_layers=num_layers),
        out_shape=jax.ShapeDtypeStruct((n, mf, out_c), jnp.float32),
        grid=(n,),                                   # >=2 blocks -> v7x megacore
        in_specs=in_specs,
        out_specs=pl.BlockSpec((1, mf, out_c), lambda i: (i, 0, 0)),
        compiler_params=pltpu.CompilerParams(
            dimension_semantics=("parallel",),
            vmem_limit_bytes=48 * 1024 * 1024,       # < v7x 64MiB physical ceiling
        ),
    )(*inputs)
    return out.reshape(n * mf, out_c)


# ------------------------------ pure-JAX reference ----------------------------

def _conv3x3_s2_lrelu_ref(x_nhwc, w_hwio, b):
    n, h, w, c = x_nhwc.shape
    ho, wo = (h - 1) // 2 + 1, (w - 1) // 2 + 1
    xp = jnp.pad(x_nhwc, ((0, 0), (1, 1), (1, 1), (0, 0)))
    cols = [xp[:, kh:kh + 2 * ho:2, kw:kw + 2 * wo:2, :]
            for kh in range(3) for kw in range(3)]
    patches = jnp.concatenate(cols, axis=-1).reshape(n * ho * wo, 9 * c)
    patches = patches.astype(COMPUTE_DTYPE)
    w_flat = w_hwio.reshape(9 * c, -1).astype(COMPUTE_DTYPE)
    y = jnp.dot(patches, w_flat, preferred_element_type=jnp.float32) + b
    y = jnp.where(y >= 0, y, NEG_SLOPE * y)
    return y.reshape(n, ho, wo, -1).astype(COMPUTE_DTYPE)


def gradual_style_block_reference(params, x_nchw):
    """Reference mirroring the kernel math (bf16 matmul inputs, fp32 accumulate)."""
    x = jnp.transpose(x_nchw, (0, 2, 3, 1)).astype(COMPUTE_DTYPE)
    for w_conv, b_conv in params["convs"]:
        x = _conv3x3_s2_lrelu_ref(x, w_conv, b_conv)
    x = x.reshape(-1, x.shape[-1])
    w_lin, b_lin = params["linear"]
    acc = jnp.dot(x, w_lin.astype(COMPUTE_DTYPE),
                  preferred_element_type=jnp.float32)
    return acc + b_lin


# ----------------------------------- main -------------------------------------

if __name__ == "__main__":
    batch, in_c, out_c, spatial = 2, 4, 32, 16
    key = jax.random.PRNGKey(0)
    k_x, k_p = jax.random.split(key)
    x = jax.random.normal(k_x, (batch, in_c, spatial, spatial), jnp.float32)
    params = gradual_style_block_init(k_p, in_c, out_c, spatial)

    out = jax.jit(gradual_style_block_apply)(params, x)
    out = jax.block_until_ready(out)

    ref = gradual_style_block_reference(params, x)
    assert out.shape == (batch, out_c), out.shape
    max_err = float(jnp.max(jnp.abs(out - ref)))
    assert jnp.allclose(out, ref, atol=5e-3, rtol=5e-3), max_err

    print("KERNEL_OK")
</pallas_src>

<mosaic_0001>
module attributes {stable_mosaic.version = 11 : i64} {
  func.func @_fused_block_kernel(%arg0: i32, %arg1: memref<1x256x4xbf16, #tpu.memory_space<vmem>>, %arg2: memref<9x64x256xbf16, #tpu.memory_space<vmem>>, %arg3: memref<9x4x32xbf16, #tpu.memory_space<vmem>>, %arg4: memref<1x32xf32, #tpu.memory_space<vmem>>, %arg5: memref<9x16x64xbf16, #tpu.memory_space<vmem>>, %arg6: memref<9x32x32xbf16, #tpu.memory_space<vmem>>, %arg7: memref<1x32xf32, #tpu.memory_space<vmem>>, %arg8: memref<9x4x16xbf16, #tpu.memory_space<vmem>>, %arg9: memref<9x32x32xbf16, #tpu.memory_space<vmem>>, %arg10: memref<1x32xf32, #tpu.memory_space<vmem>>, %arg11: memref<9x1x4xbf16, #tpu.memory_space<vmem>>, %arg12: memref<9x32x32xbf16, #tpu.memory_space<vmem>>, %arg13: memref<1x32xf32, #tpu.memory_space<vmem>>, %arg14: memref<32x32xbf16, #tpu.memory_space<vmem>>, %arg15: memref<1x32xf32, #tpu.memory_space<vmem>>, %arg16: memref<1x1x32xf32, #tpu.memory_space<vmem>>) attributes {dimension_semantics = [#tpu.dimension_semantics<parallel>], iteration_bounds = array<i64: 2>, scalar_prefetch = 0 : i64, scratch_operands = 0 : i64, tpu.core_type = #tpu.core_type<tc>, window_params = [{transform_indices = @transform_0, window_bounds = array<i64: 1, 256, 4>}, {pipeline_mode = #tpu.pipeline_mode<synchronous>, transform_indices = @transform_1, window_bounds = array<i64: 9, 64, 256>}, {pipeline_mode = #tpu.pipeline_mode<synchronous>, transform_indices = @transform_2, window_bounds = array<i64: 9, 4, 32>}, {pipeline_mode = #tpu.pipeline_mode<synchronous>, transform_indices = @transform_3, window_bounds = array<i64: 1, 32>}, {pipeline_mode = #tpu.pipeline_mode<synchronous>, transform_indices = @transform_4, window_bounds = array<i64: 9, 16, 64>}, {pipeline_mode = #tpu.pipeline_mode<synchronous>, transform_indices = @transform_5, window_bounds = array<i64: 9, 32, 32>}, {pipeline_mode = #tpu.pipeline_mode<synchronous>, transform_indices = @transform_6, window_bounds = array<i64: 1, 32>}, {pipeline_mode = #tpu.pipeline_mode<synchronous>, transform_indices = @transform_7, window_bounds = array<i64: 9, 4, 16>}, {pipeline_mode = #tpu.pipeline_mode<synchronous>, transform_indices = @transform_8, window_bounds = array<i64: 9, 32, 32>}, {pipeline_mode = #tpu.pipeline_mode<synchronous>, transform_indices = @transform_9, window_bounds = array<i64: 1, 32>}, {pipeline_mode = #tpu.pipeline_mode<synchronous>, transform_indices = @transform_10, window_bounds = array<i64: 9, 1, 4>}, {pipeline_mode = #tpu.pipeline_mode<synchronous>, transform_indices = @transform_11, window_bounds = array<i64: 9, 32, 32>}, {pipeline_mode = #tpu.pipeline_mode<synchronous>, transform_indices = @transform_12, window_bounds = array<i64: 1, 32>}, {pipeline_mode = #tpu.pipeline_mode<synchronous>, transform_indices = @transform_13, window_bounds = array<i64: 32, 32>}, {pipeline_mode = #tpu.pipeline_mode<synchronous>, transform_indices = @transform_14, window_bounds = array<i64: 1, 32>}, {transform_indices = @transform_15, window_bounds = array<i64: 1, 1, 32>}]} {
    %c0 = arith.constant 0 : index
    %c0_0 = arith.constant 0 : index
    %c0_1 = arith.constant 0 : index
    %0 = vector.load %arg1[%c0, %c0_0, %c0_1] : memref<1x256x4xbf16, #tpu.memory_space<vmem>>, vector<1x256x4xbf16>
    %1 = vector.shape_cast %0 : vector<1x256x4xbf16> to vector<256x4xbf16>
    %c0_2 = arith.constant 0 : index
    %c0_3 = arith.constant 0 : index
    %2 = vector.load %arg4[%c0_2, %c0_3] : memref<1x32xf32, #tpu.memory_space<vmem>>, vector<1x32xf32>
    %3 = vector.shape_cast %2 : vector<1x32xf32> to vector<1x32xf32>
    %4 = vector.broadcast %3 : vector<1x32xf32> to vector<64x32xf32>
    %c0_4 = arith.constant 0 : index
    %c0_5 = arith.constant 0 : index
    %c0_6 = arith.constant 0 : index
    %5 = vector.load %arg2[%c0_4, %c0_5, %c0_6] : memref<9x64x256xbf16, #tpu.memory_space<vmem>>, vector<1x64x256xbf16>
    %6 = vector.shape_cast %5 : vector<1x64x256xbf16> to vector<64x256xbf16>
    %cst = arith.constant dense<0.000000e+00> : vector<64x4xf32>
    %7 = tpu.matmul %6, %1, %cst {dimension_numbers = #tpu.dot_dimension_numbers<[1], [0], [0], [1], [0, 0, 1, 1], [], []>} : vector<64x256xbf16>, vector<256x4xbf16>, vector<64x4xf32> -> vector<64x4xf32>
    %8 = arith.truncf %7 : vector<64x4xf32> to vector<64x4xbf16>
    %c0_7 = arith.constant 0 : index
    %c0_8 = arith.constant 0 : index
    %c0_9 = arith.constant 0 : index
    %9 = vector.load %arg3[%c0_7, %c0_8, %c0_9] : memref<9x4x32xbf16, #tpu.memory_space<vmem>>, vector<1x4x32xbf16>
    %10 = vector.shape_cast %9 : vector<1x4x32xbf16> to vector<4x32xbf16>
    %cst_10 = arith.constant dense<0.000000e+00> : vector<64x32xf32>
    %11 = tpu.matmul %8, %10, %cst_10 {dimension_numbers = #tpu.dot_dimension_numbers<[1], [0], [0], [1], [0, 0, 1, 1], [], []>} : vector<64x4xbf16>, vector<4x32xbf16>, vector<64x32xf32> -> vector<64x32xf32>
    %12 = arith.addf %4, %11 : vector<64x32xf32>
    %c1 = arith.constant 1 : index
    %c0_11 = arith.constant 0 : index
    %c0_12 = arith.constant 0 : index
    %13 = vector.load %arg2[%c1, %c0_11, %c0_12] : memref<9x64x256xbf16, #tpu.memory_space<vmem>>, vector<1x64x256xbf16>
    %14 = vector.shape_cast %13 : vector<1x64x256xbf16> to vector<64x256xbf16>
    %cst_13 = arith.constant dense<0.000000e+00> : vector<64x4xf32>
    %15 = tpu.matmul %14, %1, %cst_13 {dimension_numbers = #tpu.dot_dimension_numbers<[1], [0], [0], [1], [0, 0, 1, 1], [], []>} : vector<64x256xbf16>, vector<256x4xbf16>, vector<64x4xf32> -> vector<64x4xf32>
    %16 = arith.truncf %15 : vector<64x4xf32> to vector<64x4xbf16>
    %c1_14 = arith.constant 1 : index
    %c0_15 = arith.constant 0 : index
    %c0_16 = arith.constant 0 : index
    %17 = vector.load %arg3[%c1_14, %c0_15, %c0_16] : memref<9x4x32xbf16, #tpu.memory_space<vmem>>, vector<1x4x32xbf16>
    %18 = vector.shape_cast %17 : vector<1x4x32xbf16> to vector<4x32xbf16>
    %cst_17 = arith.constant dense<0.000000e+00> : vector<64x32xf32>
    %19 = tpu.matmul %16, %18, %cst_17 {dimension_numbers = #tpu.dot_dimension_numbers<[1], [0], [0], [1], [0, 0, 1, 1], [], []>} : vector<64x4xbf16>, vector<4x32xbf16>, vector<64x32xf32> -> vector<64x32xf32>
    %20 = arith.addf %12, %19 : vector<64x32xf32>
    %c2 = arith.constant 2 : index
    %c0_18 = arith.constant 0 : index
    %c0_19 = arith.constant 0 : index
    %21 = vector.load %arg2[%c2, %c0_18, %c0_19] : memref<9x64x256xbf16, #tpu.memory_space<vmem>>, vector<1x64x256xbf16>
    %22 = vector.shape_cast %21 : vector<1x64x256xbf16> to vector<64x256xbf16>
    %cst_20 = arith.constant dense<0.000000e+00> : vector<64x4xf32>
    %23 = tpu.matmul %22, %1, %cst_20 {dimension_numbers = #tpu.dot_dimension_numbers<[1], [0], [0], [1], [0, 0, 1, 1], [], []>} : vector<64x256xbf16>, vector<256x4xbf16>, vector<64x4xf32> -> vector<64x4xf32>
    %24 = arith.truncf %23 : vector<64x4xf32> to vector<64x4xbf16>
    %c2_21 = arith.constant 2 : index
    %c0_22 = arith.constant 0 : index
    %c0_23 = arith.constant 0 : index
    %25 = vector.load %arg3[%c2_21, %c0_22, %c0_23] : memref<9x4x32xbf16, #tpu.memory_space<vmem>>, vector<1x4x32xbf16>
    %26 = vector.shape_cast %25 : vector<1x4x32xbf16> to vector<4x32xbf16>
    %cst_24 = arith.constant dense<0.000000e+00> : vector<64x32xf32>
    %27 = tpu.matmul %24, %26, %cst_24 {dimension_numbers = #tpu.dot_dimension_numbers<[1], [0], [0], [1], [0, 0, 1, 1], [], []>} : vector<64x4xbf16>, vector<4x32xbf16>, vector<64x32xf32> -> vector<64x32xf32>
    %28 = arith.addf %20, %27 : vector<64x32xf32>
    %c3 = arith.constant 3 : index
    %c0_25 = arith.constant 0 : index
    %c0_26 = arith.constant 0 : index
    %29 = vector.load %arg2[%c3, %c0_25, %c0_26] : memref<9x64x256xbf16, #tpu.memory_space<vmem>>, vector<1x64x256xbf16>
    %30 = vector.shape_cast %29 : vector<1x64x256xbf16> to vector<64x256xbf16>
    %cst_27 = arith.constant dense<0.000000e+00> : vector<64x4xf32>
    %31 = tpu.matmul %30, %1, %cst_27 {dimension_numbers = #tpu.dot_dimension_numbers<[1], [0], [0], [1], [0, 0, 1, 1], [], []>} : vector<64x256xbf16>, vector<256x4xbf16>, vector<64x4xf32> -> vector<64x4xf32>
    %32 = arith.truncf %31 : vector<64x4xf32> to vector<64x4xbf16>
    %c3_28 = arith.constant 3 : index
    %c0_29 = arith.constant 0 : index
    %c0_30 = arith.constant 0 : index
    %33 = vector.load %arg3[%c3_28, %c0_29, %c0_30] : memref<9x4x32xbf16, #tpu.memory_space<vmem>>, vector<1x4x32xbf16>
    %34 = vector.shape_cast %33 : vector<1x4x32xbf16> to vector<4x32xbf16>
    %cst_31 = arith.constant dense<0.000000e+00> : vector<64x32xf32>
    %35 = tpu.matmul %32, %34, %cst_31 {dimension_numbers = #tpu.dot_dimension_numbers<[1], [0], [0], [1], [0, 0, 1, 1], [], []>} : vector<64x4xbf16>, vector<4x32xbf16>, vector<64x32xf32> -> vector<64x32xf32>
    %36 = arith.addf %28, %35 : vector<64x32xf32>
    %c4 = arith.constant 4 : index
    %c0_32 = arith.constant 0 : index
    %c0_33 = arith.constant 0 : index
    %37 = vector.load %arg2[%c4, %c0_32, %c0_33] : memref<9x64x256xbf16, #tpu.memory_space<vmem>>, vector<1x64x256xbf16>
    %38 = vector.shape_cast %37 : vector<1x64x256xbf16> to vector<64x256xbf16>
    %cst_34 = arith.constant dense<0.000000e+00> : vector<64x4xf32>
    %39 = tpu.matmul %38, %1, %cst_34 {dimension_numbers = #tpu.dot_dimension_numbers<[1], [0], [0], [1], [0, 0, 1, 1], [], []>} : vector<64x256xbf16>, vector<256x4xbf16>, vector<64x4xf32> -> vector<64x4xf32>
    %40 = arith.truncf %39 : vector<64x4xf32> to vector<64x4xbf16>
    %c4_35 = arith.constant 4 : index
    %c0_36 = arith.constant 0 : index
    %c0_37 = arith.constant 0 : index
    %41 = vector.load %arg3[%c4_35, %c0_36, %c0_37] : memref<9x4x32xbf16, #tpu.memory_space<vmem>>, vector<1x4x32xbf16>
    %42 = vector.shape_cast %41 : vector<1x4x32xbf16> to vector<4x32xbf16>
    %cst_38 = arith.constant dense<0.000000e+00> : vector<64x32xf32>
    %43 = tpu.matmul %40, %42, %cst_38 {dimension_numbers = #tpu.dot_dimension_numbers<[1], [0], [0], [1], [0, 0, 1, 1], [], []>} : vector<64x4xbf16>, vector<4x32xbf16>, vector<64x32xf32> -> vector<64x32xf32>
    %44 = arith.addf %36, %43 : vector<64x32xf32>
    %c5 = arith.constant 5 : index
    %c0_39 = arith.constant 0 : index
    %c0_40 = arith.constant 0 : index
    %45 = vector.load %arg2[%c5, %c0_39, %c0_40] : memref<9x64x256xbf16, #tpu.memory_space<vmem>>, vector<1x64x256xbf16>
    %46 = vector.shape_cast %45 : vector<1x64x256xbf16> to vector<64x256xbf16>
    %cst_41 = arith.constant dense<0.000000e+00> : vector<64x4xf32>
    %47 = tpu.matmul %46, %1, %cst_41 {dimension_numbers = #tpu.dot_dimension_numbers<[1], [0], [0], [1], [0, 0, 1, 1], [], []>} : vector<64x256xbf16>, vector<256x4xbf16>, vector<64x4xf32> -> vector<64x4xf32>
    %48 = arith.truncf %47 : vector<64x4xf32> to vector<64x4xbf16>
    %c5_42 = arith.constant 5 : index
    %c0_43 = arith.constant 0 : index
    %c0_44 = arith.constant 0 : index
    %49 = vector.load %arg3[%c5_42, %c0_43, %c0_44] : memref<9x4x32xbf16, #tpu.memory_space<vmem>>, vector<1x4x32xbf16>
    %50 = vector.shape_cast %49 : vector<1x4x32xbf16> to vector<4x32xbf16>
    %cst_45 = arith.constant dense<0.000000e+00> : vector<64x32xf32>
    %51 = tpu.matmul %48, %50, %cst_45 {dimension_numbers = #tpu.dot_dimension_numbers<[1], [0], [0], [1], [0, 0, 1, 1], [], []>} : vector<64x4xbf16>, vector<4x32xbf16>, vector<64x32xf32> -> vector<64x32xf32>
    %52 = arith.addf %44, %51 : vector<64x32xf32>
    %c6 = arith.constant 6 : index
    %c0_46 = arith.constant 0 : index
    %c0_47 = arith.constant 0 : index
    %53 = vector.load %arg2[%c6, %c0_46, %c0_47] : memref<9x64x256xbf16, #tpu.memory_space<vmem>>, vector<1x64x256xbf16>
    %54 = vector.shape_cast %53 : vector<1x64x256xbf16> to vector<64x256xbf16>
    %cst_48 = arith.constant dense<0.000000e+00> : vector<64x4xf32>
    %55 = tpu.matmul %54, %1, %cst_48 {dimension_numbers = #tpu.dot_dimension_numbers<[1], [0], [0], [1], [0, 0, 1, 1], [], []>} : vector<64x256xbf16>, vector<256x4xbf16>, vector<64x4xf32> -> vector<64x4xf32>
    %56 = arith.truncf %55 : vector<64x4xf32> to vector<64x4xbf16>
    %c6_49 = arith.constant 6 : index
    %c0_50 = arith.constant 0 : index
    %c0_51 = arith.constant 0 : index
    %57 = vector.load %arg3[%c6_49, %c0_50, %c0_51] : memref<9x4x32xbf16, #tpu.memory_space<vmem>>, vector<1x4x32xbf16>
    %58 = vector.shape_cast %57 : vector<1x4x32xbf16> to vector<4x32xbf16>
    %cst_52 = arith.constant dense<0.000000e+00> : vector<64x32xf32>
    %59 = tpu.matmul %56, %58, %cst_52 {dimension_numbers = #tpu.dot_dimension_numbers<[1], [0], [0], [1], [0, 0, 1, 1], [], []>} : vector<64x4xbf16>, vector<4x32xbf16>, vector<64x32xf32> -> vector<64x32xf32>
    %60 = arith.addf %52, %59 : vector<64x32xf32>
    %c7 = arith.constant 7 : index
    %c0_53 = arith.constant 0 : index
    %c0_54 = arith.constant 0 : index
    %61 = vector.load %arg2[%c7, %c0_53, %c0_54] : memref<9x64x256xbf16, #tpu.memory_space<vmem>>, vector<1x64x256xbf16>
    %62 = vector.shape_cast %61 : vector<1x64x256xbf16> to vector<64x256xbf16>
    %cst_55 = arith.constant dense<0.000000e+00> : vector<64x4xf32>
    %63 = tpu.matmul %62, %1, %cst_55 {dimension_numbers = #tpu.dot_dimension_numbers<[1], [0], [0], [1], [0, 0, 1, 1], [], []>} : vector<64x256xbf16>, vector<256x4xbf16>, vector<64x4xf32> -> vector<64x4xf32>
    %64 = arith.truncf %63 : vector<64x4xf32> to vector<64x4xbf16>
    %c7_56 = arith.constant 7 : index
    %c0_57 = arith.constant 0 : index
    %c0_58 = arith.constant 0 : index
    %65 = vector.load %arg3[%c7_56, %c0_57, %c0_58] : memref<9x4x32xbf16, #tpu.memory_space<vmem>>, vector<1x4x32xbf16>
    %66 = vector.shape_cast %65 : vector<1x4x32xbf16> to vector<4x32xbf16>
    %cst_59 = arith.constant dense<0.000000e+00> : vector<64x32xf32>
    %67 = tpu.matmul %64, %66, %cst_59 {dimension_numbers = #tpu.dot_dimension_numbers<[1], [0], [0], [1], [0, 0, 1, 1], [], []>} : vector<64x4xbf16>, vector<4x32xbf16>, vector<64x32xf32> -> vector<64x32xf32>
    %68 = arith.addf %60, %67 : vector<64x32xf32>
    %c8 = arith.constant 8 : index
    %c0_60 = arith.constant 0 : index
    %c0_61 = arith.constant 0 : index
    %69 = vector.load %arg2[%c8, %c0_60, %c0_61] : memref<9x64x256xbf16, #tpu.memory_space<vmem>>, vector<1x64x256xbf16>
    %70 = vector.shape_cast %69 : vector<1x64x256xbf16> to vector<64x256xbf16>
    %cst_62 = arith.constant dense<0.000000e+00> : vector<64x4xf32>
    %71 = tpu.matmul %70, %1, %cst_62 {dimension_numbers = #tpu.dot_dimension_numbers<[1], [0], [0], [1], [0, 0, 1, 1], [], []>} : vector<64x256xbf16>, vector<256x4xbf16>, vector<64x4xf32> -> vector<64x4xf32>
    %72 = arith.truncf %71 : vector<64x4xf32> to vector<64x4xbf16>
    %c8_63 = arith.constant 8 : index
    %c0_64 = arith.constant 0 : index
    %c0_65 = arith.constant 0 : index
    %73 = vector.load %arg3[%c8_63, %c0_64, %c0_65] : memref<9x4x32xbf16, #tpu.memory_space<vmem>>, vector<1x4x32xbf16>
    %74 = vector.shape_cast %73 : vector<1x4x32xbf16> to vector<4x32xbf16>
    %cst_66 = arith.constant dense<0.000000e+00> : vector<64x32xf32>
    %75 = tpu.matmul %72, %74, %cst_66 {dimension_numbers = #tpu.dot_dimension_numbers<[1], [0], [0], [1], [0, 0, 1, 1], [], []>} : vector<64x4xbf16>, vector<4x32xbf16>, vector<64x32xf32> -> vector<64x32xf32>
    %76 = arith.addf %68, %75 : vector<64x32xf32>
    %cst_67 = arith.constant 0.000000e+00 : f32
    %77 = vector.broadcast %cst_67 : f32 to vector<64x32xf32>
    %78 = arith.cmpf oge, %76, %77 : vector<64x32xf32>
    %cst_68 = arith.constant 0.00999999977 : f32
    %79 = vector.broadcast %cst_68 : f32 to vector<64x32xf32>
    %80 = arith.mulf %79, %76 : vector<64x32xf32>
    %81 = arith.select %78, %76, %80 : vector<64x32xi1>, vector<64x32xf32>
    %82 = arith.truncf %81 : vector<64x32xf32> to vector<64x32xbf16>
    %c0_69 = arith.constant 0 : index
    %c0_70 = arith.constant 0 : index
    %83 = vector.load %arg7[%c0_69, %c0_70] : memref<1x32xf32, #tpu.memory_space<vmem>>, vector<1x32xf32>
    %84 = vector.shape_cast %83 : vector<1x32xf32> to vector<1x32xf32>
    %85 = vector.broadcast %84 : vector<1x32xf32> to vector<16x32xf32>
    %c0_71 = arith.constant 0 : index
    %c0_72 = arith.constant 0 : index
    %c0_73 = arith.constant 0 : index
    %86 = vector.load %arg5[%c0_71, %c0_72, %c0_73] : memref<9x16x64xbf16, #tpu.memory_space<vmem>>, vector<1x16x64xbf16>
    %87 = vector.shape_cast %86 : vector<1x16x64xbf16> to vector<16x64xbf16>
    %cst_74 = arith.constant dense<0.000000e+00> : vector<16x32xf32>
    %88 = tpu.matmul %87, %82, %cst_74 {dimension_numbers = #tpu.dot_dimension_numbers<[1], [0], [0], [1], [0, 0, 1, 1], [], []>} : vector<16x64xbf16>, vector<64x32xbf16>, vector<16x32xf32> -> vector<16x32xf32>
    %89 = arith.truncf %88 : vector<16x32xf32> to vector<16x32xbf16>
    %c0_75 = arith.constant 0 : index
    %c0_76 = arith.constant 0 : index
    %c0_77 = arith.constant 0 : index
    %90 = vector.load %arg6[%c0_75, %c0_76, %c0_77] : memref<9x32x32xbf16, #tpu.memory_space<vmem>>, vector<1x32x32xbf16>
    %91 = vector.shape_cast %90 : vector<1x32x32xbf16> to vector<32x32xbf16>
    %cst_78 = arith.constant dense<0.000000e+00> : vector<16x32xf32>
    %92 = tpu.matmul %89, %91, %cst_78 {dimension_numbers = #tpu.dot_dimension_numbers<[1], [0], [0], [1], [0, 0, 1, 1], [], []>} : vector<16x32xbf16>, vector<32x32xbf16>, vector<16x32xf32> -> vector<16x32xf32>
    %93 = arith.addf %85, %92 : vector<16x32xf32>
    %c1_79 = arith.constant 1 : index
    %c0_80 = arith.constant 0 : index
    %c0_81 = arith.constant 0 : index
    %94 = vector.load %arg5[%c1_79, %c0_80, %c0_81] : memref<9x16x64xbf16, #tpu.memory_space<vmem>>, vector<1x16x64xbf16>
    %95 = vector.shape_cast %94 : vector<1x16x64xbf16> to vector<16x64xbf16>
    %cst_82 = arith.constant dense<0.000000e+00> : vector<16x32xf32>
    %96 = tpu.matmul %95, %82, %cst_82 {dimension_numbers = #tpu.dot_dimension_numbers<[1], [0], [0], [1], [0, 0, 1, 1], [], []>} : vector<16x64xbf16>, vector<64x32xbf16>, vector<16x32xf32> -> vector<16x32xf32>
    %97 = arith.truncf %96 : vector<16x32xf32> to vector<16x32xbf16>
    %c1_83 = arith.constant 1 : index
    %c0_84 = arith.constant 0 : index
    %c0_85 = arith.constant 0 : index
    %98 = vector.load %arg6[%c1_83, %c0_84, %c0_85] : memref<9x32x32xbf16, #tpu.memory_space<vmem>>, vector<1x32x32xbf16>
    %99 = vector.shape_cast %98 : vector<1x32x32xbf16> to vector<32x32xbf16>
    %cst_86 = arith.constant dense<0.000000e+00> : vector<16x32xf32>
    %100 = tpu.matmul %97, %99, %cst_86 {dimension_numbers = #tpu.dot_dimension_numbers<[1], [0], [0], [1], [0, 0, 1, 1], [], []>} : vector<16x32xbf16>, vector<32x32xbf16>, vector<16x32xf32> -> vector<16x32xf32>
    %101 = arith.addf %93, %100 : vector<16x32xf32>
    %c2_87 = arith.constant 2 : index
    %c0_88 = arith.constant 0 : index
    %c0_89 = arith.constant 0 : index
    %102 = vector.load %arg5[%c2_87, %c0_88, %c0_89] : memref<9x16x64xbf16, #tpu.memory_space<vmem>>, vector<1x16x64xbf16>
    %103 = vector.shape_cast %102 : vector<1x16x64xbf16> to vector<16x64xbf16>
    %cst_90 = arith.constant dense<0.000000e+00> : vector<16x32xf32>
    %104 = tpu.matmul %103, %82, %cst_90 {dimension_numbers = #tpu.dot_dimension_numbers<[1], [0], [0], [1], [0, 0, 1, 1], [], []>} : vector<16x64xbf16>, vector<64x32xbf16>, vector<16x32xf32> -> vector<16x32xf32>
    %105 = arith.truncf %104 : vector<16x32xf32> to vector<16x32xbf16>
    %c2_91 = arith.constant 2 : index
    %c0_92 = arith.constant 0 : index
    %c0_93 = arith.constant 0 : index
    %106 = vector.load %arg6[%c2_91, %c0_92, %c0_93] : memref<9x32x32xbf16, #tpu.memory_space<vmem>>, vector<1x32x32xbf16>
    %107 = vector.shape_cast %106 : vector<1x32x32xbf16> to vector<32x32xbf16>
    %cst_94 = arith.constant dense<0.000000e+00> : vector<16x32xf32>
    %108 = tpu.matmul %105, %107, %cst_94 {dimension_numbers = #tpu.dot_dimension_numbers<[1], [0], [0], [1], [0, 0, 1, 1], [], []>} : vector<16x32xbf16>, vector<32x32xbf16>, vector<16x32xf32> -> vector<16x32xf32>
    %109 = arith.addf %101, %108 : vector<16x32xf32>
    %c3_95 = arith.constant 3 : index
    %c0_96 = arith.constant 0 : index
    %c0_97 = arith.constant 0 : index
    %110 = vector.load %arg5[%c3_95, %c0_96, %c0_97] : memref<9x16x64xbf16, #tpu.memory_space<vmem>>, vector<1x16x64xbf16>
    %111 = vector.shape_cast %110 : vector<1x16x64xbf16> to vector<16x64xbf16>
    %cst_98 = arith.constant dense<0.000000e+00> : vector<16x32xf32>
    %112 = tpu.matmul %111, %82, %cst_98 {dimension_numbers = #tpu.dot_dimension_numbers<[1], [0], [0], [1], [0, 0, 1, 1], [], []>} : vector<16x64xbf16>, vector<64x32xbf16>, vector<16x32xf32> -> vector<16x32xf32>
    %113 = arith.truncf %112 : vector<16x32xf32> to vector<16x32xbf16>
    %c3_99 = arith.constant 3 : index
    %c0_100 = arith.constant 0 : index
    %c0_101 = arith.constant 0 : index
    %114 = vector.load %arg6[%c3_99, %c0_100, %c0_101] : memref<9x32x32xbf16, #tpu.memory_space<vmem>>, vector<1x32x32xbf16>
    %115 = vector.shape_cast %114 : vector<1x32x32xbf16> to vector<32x32xbf16>
    %cst_102 = arith.constant dense<0.000000e+00> : vector<16x32xf32>
    %116 = tpu.matmul %113, %115, %cst_102 {dimension_numbers = #tpu.dot_dimension_numbers<[1], [0], [0], [1], [0, 0, 1, 1], [], []>} : vector<16x32xbf16>, vector<32x32xbf16>, vector<16x32xf32> -> vector<16x32xf32>
    %117 = arith.addf %109, %116 : vector<16x32xf32>
    %c4_103 = arith.constant 4 : index
    %c0_104 = arith.constant 0 : index
    %c0_105 = arith.constant 0 : index
    %118 = vector.load %arg5[%c4_103, %c0_104, %c0_105] : memref<9x16x64xbf16, #tpu.memory_space<vmem>>, vector<1x16x64xbf16>
    %119 = vector.shape_cast %118 : vector<1x16x64xbf16> to vector<16x64xbf16>
    %cst_106 = arith.constant dense<0.000000e+00> : vector<16x32xf32>
    %120 = tpu.matmul %119, %82, %cst_106 {dimension_numbers = #tpu.dot_dimension_numbers<[1], [0], [0], [1], [0, 0, 1, 1], [], []>} : vector<16x64xbf16>, vector<64x32xbf16>, vector<16x32xf32> -> vector<16x32xf32>
    %121 = arith.truncf %120 : vector<16x32xf32> to vector<16x32xbf16>
    %c4_107 = arith.constant 4 : index
    %c0_108 = arith.constant 0 : index
    %c0_109 = arith.constant 0 : index
    %122 = vector.load %arg6[%c4_107, %c0_108, %c0_109] : memref<9x32x32xbf16, #tpu.memory_space<vmem>>, vector<1x32x32xbf16>
    %123 = vector.shape_cast %122 : vector<1x32x32xbf16> to vector<32x32xbf16>
    %cst_110 = arith.constant dense<0.000000e+00> : vector<16x32xf32>
    %124 = tpu.matmul %121, %123, %cst_110 {dimension_numbers = #tpu.dot_dimension_numbers<[1], [0], [0], [1], [0, 0, 1, 1], [], []>} : vector<16x32xbf16>, vector<32x32xbf16>, vector<16x32xf32> -> vector<16x32xf32>
    %125 = arith.addf %117, %124 : vector<16x32xf32>
    %c5_111 = arith.constant 5 : index
    %c0_112 = arith.constant 0 : index
    %c0_113 = arith.constant 0 : index
    %126 = vector.load %arg5[%c5_111, %c0_112, %c0_113] : memref<9x16x64xbf16, #tpu.memory_space<vmem>>, vector<1x16x64xbf16>
    %127 = vector.shape_cast %126 : vector<1x16x64xbf16> to vector<16x64xbf16>
    %cst_114 = arith.constant dense<0.000000e+00> : vector<16x32xf32>
    %128 = tpu.matmul %127, %82, %cst_114 {dimension_numbers = #tpu.dot_dimension_numbers<[1], [0], [0], [1], [0, 0, 1, 1], [], []>} : vector<16x64xbf16>, vector<64x32xbf16>, vector<16x32xf32> -> vector<16x32xf32>
    %129 = arith.truncf %128 : vector<16x32xf32> to vector<16x32xbf16>
    %c5_115 = arith.constant 5 : index
    %c0_116 = arith.constant 0 : index
    %c0_117 = arith.constant 0 : index
    %130 = vector.load %arg6[%c5_115, %c0_116, %c0_117] : memref<9x32x32xbf16, #tpu.memory_space<vmem>>, vector<1x32x32xbf16>
    %131 = vector.shape_cast %130 : vector<1x32x32xbf16> to vector<32x32xbf16>
    %cst_118 = arith.constant dense<0.000000e+00> : vector<16x32xf32>
    %132 = tpu.matmul %129, %131, %cst_118 {dimension_numbers = #tpu.dot_dimension_numbers<[1], [0], [0], [1], [0, 0, 1, 1], [], []>} : vector<16x32xbf16>, vector<32x32xbf16>, vector<16x32xf32> -> vector<16x32xf32>
    %133 = arith.addf %125, %132 : vector<16x32xf32>
    %c6_119 = arith.constant 6 : index
    %c0_120 = arith.constant 0 : index
    %c0_121 = arith.constant 0 : index
    %134 = vector.load %arg5[%c6_119, %c0_120, %c0_121] : memref<9x16x64xbf16, #tpu.memory_space<vmem>>, vector<1x16x64xbf16>
    %135 = vector.shape_cast %134 : vector<1x16x64xbf16> to vector<16x64xbf16>
    %cst_122 = arith.constant dense<0.000000e+00> : vector<16x32xf32>
    %136 = tpu.matmul %135, %82, %cst_122 {dimension_numbers = #tpu.dot_dimension_numbers<[1], [0], [0], [1], [0, 0, 1, 1], [], []>} : vector<16x64xbf16>, vector<64x32xbf16>, vector<16x32xf32> -> vector<16x32xf32>
    %137 = arith.truncf %136 : vector<16x32xf32> to vector<16x32xbf16>
    %c6_123 = arith.constant 6 : index
    %c0_124 = arith.constant 0 : index
    %c0_125 = arith.constant 0 : index
    %138 = vector.load %arg6[%c6_123, %c0_124, %c0_125] : memref<9x32x32xbf16, #tpu.memory_space<vmem>>, vector<1x32x32xbf16>
    %139 = vector.shape_cast %138 : vector<1x32x32xbf16> to vector<32x32xbf16>
    %cst_126 = arith.constant dense<0.000000e+00> : vector<16x32xf32>
    %140 = tpu.matmul %137, %139, %cst_126 {dimension_numbers = #tpu.dot_dimension_numbers<[1], [0], [0], [1], [0, 0, 1, 1], [], []>} : vector<16x32xbf16>, vector<32x32xbf16>, vector<16x32xf32> -> vector<16x32xf32>
    %141 = arith.addf %133, %140 : vector<16x32xf32>
    %c7_127 = arith.constant 7 : index
    %c0_128 = arith.constant 0 : index
    %c0_129 = arith.constant 0 : index
    %142 = vector.load %arg5[%c7_127, %c0_128, %c0_129] : memref<9x16x64xbf16, #tpu.memory_space<vmem>>, vector<1x16x64xbf16>
    %143 = vector.shape_cast %142 : vector<1x16x64xbf16> to vector<16x64xbf16>
    %cst_130 = arith.constant dense<0.000000e+00> : vector<16x32xf32>
    %144 = tpu.matmul %143, %82, %cst_130 {dimension_numbers = #tpu.dot_dimension_numbers<[1], [0], [0], [1], [0, 0, 1, 1], [], []>} : vector<16x64xbf16>, vector<64x32xbf16>, vector<16x32xf32> -> vector<16x32xf32>
    %145 = arith.truncf %144 : vector<16x32xf32> to vector<16x32xbf16>
    %c7_131 = arith.constant 7 : index
    %c0_132 = arith.constant 0 : index
    %c0_133 = arith.constant 0 : index
    %146 = vector.load %arg6[%c7_131, %c0_132, %c0_133] : memref<9x32x32xbf16, #tpu.memory_space<vmem>>, vector<1x32x32xbf16>
    %147 = vector.shape_cast %146 : vector<1x32x32xbf16> to vector<32x32xbf16>
    %cst_134 = arith.constant dense<0.000000e+00> : vector<16x32xf32>
    %148 = tpu.matmul %145, %147, %cst_134 {dimension_numbers = #tpu.dot_dimension_numbers<[1], [0], [0], [1], [0, 0, 1, 1], [], []>} : vector<16x32xbf16>, vector<32x32xbf16>, vector<16x32xf32> -> vector<16x32xf32>
    %149 = arith.addf %141, %148 : vector<16x32xf32>
    %c8_135 = arith.constant 8 : index
    %c0_136 = arith.constant 0 : index
    %c0_137 = arith.constant 0 : index
    %150 = vector.load %arg5[%c8_135, %c0_136, %c0_137] : memref<9x16x64xbf16, #tpu.memory_space<vmem>>, vector<1x16x64xbf16>
    %151 = vector.shape_cast %150 : vector<1x16x64xbf16> to vector<16x64xbf16>
    %cst_138 = arith.constant dense<0.000000e+00> : vector<16x32xf32>
    %152 = tpu.matmul %151, %82, %cst_138 {dimension_numbers = #tpu.dot_dimension_numbers<[1], [0], [0], [1], [0, 0, 1, 1], [], []>} : vector<16x64xbf16>, vector<64x32xbf16>, vector<16x32xf32> -> vector<16x32xf32>
    %153 = arith.truncf %152 : vector<16x32xf32> to vector<16x32xbf16>
    %c8_139 = arith.constant 8 : index
    %c0_140 = arith.constant 0 : index
    %c0_141 = arith.constant 0 : index
    %154 = vector.load %arg6[%c8_139, %c0_140, %c0_141] : memref<9x32x32xbf16, #tpu.memory_space<vmem>>, vector<1x32x32xbf16>
    %155 = vector.shape_cast %154 : vector<1x32x32xbf16> to vector<32x32xbf16>
    %cst_142 = arith.constant dense<0.000000e+00> : vector<16x32xf32>
    %156 = tpu.matmul %153, %155, %cst_142 {dimension_numbers = #tpu.dot_dimension_numbers<[1], [0], [0], [1], [0, 0, 1, 1], [], []>} : vector<16x32xbf16>, vector<32x32xbf16>, vector<16x32xf32> -> vector<16x32xf32>
    %157 = arith.addf %149, %156 : vector<16x32xf32>
    %cst_143 = arith.constant 0.000000e+00 : f32
    %158 = vector.broadcast %cst_143 : f32 to vector<16x32xf32>
    %159 = arith.cmpf oge, %157, %158 : vector<16x32xf32>
    %cst_144 = arith.constant 0.00999999977 : f32
    %160 = vector.broadcast %cst_144 : f32 to vector<16x32xf32>
    %161 = arith.mulf %160, %157 : vector<16x32xf32>
    %162 = arith.select %159, %157, %161 : vector<16x32xi1>, vector<16x32xf32>
    %163 = arith.truncf %162 : vector<16x32xf32> to vector<16x32xbf16>
    %c0_145 = arith.constant 0 : index
    %c0_146 = arith.constant 0 : index
    %164 = vector.load %arg10[%c0_145, %c0_146] : memref<1x32xf32, #tpu.memory_space<vmem>>, vector<1x32xf32>
    %165 = vector.shape_cast %164 : vector<1x32xf32> to vector<1x32xf32>
    %166 = vector.broadcast %165 : vector<1x32xf32> to vector<4x32xf32>
    %c0_147 = arith.constant 0 : index
    %c0_148 = arith.constant 0 : index
    %c0_149 = arith.constant 0 : index
    %167 = vector.load %arg8[%c0_147, %c0_148, %c0_149] : memref<9x4x16xbf16, #tpu.memory_space<vmem>>, vector<1x4x16xbf16>
    %168 = vector.shape_cast %167 : vector<1x4x16xbf16> to vector<4x16xbf16>
    %cst_150 = arith.constant dense<0.000000e+00> : vector<4x32xf32>
    %169 = tpu.matmul %168, %163, %cst_150 {dimension_numbers = #tpu.dot_dimension_numbers<[1], [0], [0], [1], [0, 0, 1, 1], [], []>} : vector<4x16xbf16>, vector<16x32xbf16>, vector<4x32xf32> -> vector<4x32xf32>
    %170 = arith.truncf %169 : vector<4x32xf32> to vector<4x32xbf16>
    %c0_151 = arith.constant 0 : index
    %c0_152 = arith.constant 0 : index
    %c0_153 = arith.constant 0 : index
    %171 = vector.load %arg9[%c0_151, %c0_152, %c0_153] : memref<9x32x32xbf16, #tpu.memory_space<vmem>>, vector<1x32x32xbf16>
    %172 = vector.shape_cast %171 : vector<1x32x32xbf16> to vector<32x32xbf16>
    %cst_154 = arith.constant dense<0.000000e+00> : vector<4x32xf32>
    %173 = tpu.matmul %170, %172, %cst_154 {dimension_numbers = #tpu.dot_dimension_numbers<[1], [0], [0], [1], [0, 0, 1, 1], [], []>} : vector<4x32xbf16>, vector<32x32xbf16>, vector<4x32xf32> -> vector<4x32xf32>
    %174 = arith.addf %166, %173 : vector<4x32xf32>
    %c1_155 = arith.constant 1 : index
    %c0_156 = arith.constant 0 : index
    %c0_157 = arith.constant 0 : index
    %175 = vector.load %arg8[%c1_155, %c0_156, %c0_157] : memref<9x4x16xbf16, #tpu.memory_space<vmem>>, vector<1x4x16xbf16>
    %176 = vector.shape_cast %175 : vector<1x4x16xbf16> to vector<4x16xbf16>
    %cst_158 = arith.constant dense<0.000000e+00> : vector<4x32xf32>
    %177 = tpu.matmul %176, %163, %cst_158 {dimension_numbers = #tpu.dot_dimension_numbers<[1], [0], [0], [1], [0, 0, 1, 1], [], []>} : vector<4x16xbf16>, vector<16x32xbf16>, vector<4x32xf32> -> vector<4x32xf32>
    %178 = arith.truncf %177 : vector<4x32xf32> to vector<4x32xbf16>
    %c1_159 = arith.constant 1 : index
    %c0_160 = arith.constant 0 : index
    %c0_161 = arith.constant 0 : index
    %179 = vector.load %arg9[%c1_159, %c0_160, %c0_161] : memref<9x32x32xbf16, #tpu.memory_space<vmem>>, vector<1x32x32xbf16>
    %180 = vector.shape_cast %179 : vector<1x32x32xbf16> to vector<32x32xbf16>
    %cst_162 = arith.constant dense<0.000000e+00> : vector<4x32xf32>
    %181 = tpu.matmul %178, %180, %cst_162 {dimension_numbers = #tpu.dot_dimension_numbers<[1], [0], [0], [1], [0, 0, 1, 1], [], []>} : vector<4x32xbf16>, vector<32x32xbf16>, vector<4x32xf32> -> vector<4x32xf32>
    %182 = arith.addf %174, %181 : vector<4x32xf32>
    %c2_163 = arith.constant 2 : index
    %c0_164 = arith.constant 0 : index
    %c0_165 = arith.constant 0 : index
    %183 = vector.load %arg8[%c2_163, %c0_164, %c0_165] : memref<9x4x16xbf16, #tpu.memory_space<vmem>>, vector<1x4x16xbf16>
    %184 = vector.shape_cast %183 : vector<1x4x16xbf16> to vector<4x16xbf16>
    %cst_166 = arith.constant dense<0.000000e+00> : vector<4x32xf32>
    %185 = tpu.matmul %184, %163, %cst_166 {dimension_numbers = #tpu.dot_dimension_numbers<[1], [0], [0], [1], [0, 0, 1, 1], [], []>} : vector<4x16xbf16>, vector<16x32xbf16>, vector<4x32xf32> -> vector<4x32xf32>
    %186 = arith.truncf %185 : vector<4x32xf32> to vector<4x32xbf16>
    %c2_167 = arith.constant 2 : index
    %c0_168 = arith.constant 0 : index
    %c0_169 = arith.constant 0 : index
    %187 = vector.load %arg9[%c2_167, %c0_168, %c0_169] : memref<9x32x32xbf16, #tpu.memory_space<vmem>>, vector<1x32x32xbf16>
    %188 = vector.shape_cast %187 : vector<1x32x32xbf16> to vector<32x32xbf16>
    %cst_170 = arith.constant dense<0.000000e+00> : vector<4x32xf32>
    %189 = tpu.matmul %186, %188, %cst_170 {dimension_numbers = #tpu.dot_dimension_numbers<[1], [0], [0], [1], [0, 0, 1, 1], [], []>} : vector<4x32xbf16>, vector<32x32xbf16>, vector<4x32xf32> -> vector<4x32xf32>
    %190 = arith.addf %182, %189 : vector<4x32xf32>
    %c3_171 = arith.constant 3 : index
    %c0_172 = arith.constant 0 : index
    %c0_173 = arith.constant 0 : index
    %191 = vector.load %arg8[%c3_171, %c0_172, %c0_173] : memref<9x4x16xbf16, #tpu.memory_space<vmem>>, vector<1x4x16xbf16>
    %192 = vector.shape_cast %191 : vector<1x4x16xbf16> to vector<4x16xbf16>
    %cst_174 = arith.constant dense<0.000000e+00> : vector<4x32xf32>
    %193 = tpu.matmul %192, %163, %cst_174 {dimension_numbers = #tpu.dot_dimension_numbers<[1], [0], [0], [1], [0, 0, 1, 1], [], []>} : vector<4x16xbf16>, vector<16x32xbf16>, vector<4x32xf32> -> vector<4x32xf32>
    %194 = arith.truncf %193 : vector<4x32xf32> to vector<4x32xbf16>
    %c3_175 = arith.constant 3 : index
    %c0_176 = arith.constant 0 : index
    %c0_177 = arith.constant 0 : index
    %195 = vector.load %arg9[%c3_175, %c0_176, %c0_177] : memref<9x32x32xbf16, #tpu.memory_space<vmem>>, vector<1x32x32xbf16>
    %196 = vector.shape_cast %195 : vector<1x32x32xbf16> to vector<32x32xbf16>
    %cst_178 = arith.constant dense<0.000000e+00> : vector<4x32xf32>
    %197 = tpu.matmul %194, %196, %cst_178 {dimension_numbers = #tpu.dot_dimension_numbers<[1], [0], [0], [1], [0, 0, 1, 1], [], []>} : vector<4x32xbf16>, vector<32x32xbf16>, vector<4x32xf32> -> vector<4x32xf32>
    %198 = arith.addf %190, %197 : vector<4x32xf32>
    %c4_179 = arith.constant 4 : index
    %c0_180 = arith.constant 0 : index
    %c0_181 = arith.constant 0 : index
    %199 = vector.load %arg8[%c4_179, %c0_180, %c0_181] : memref<9x4x16xbf16, #tpu.memory_space<vmem>>, vector<1x4x16xbf16>
    %200 = vector.shape_cast %199 : vector<1x4x16xbf16> to vector<4x16xbf16>
    %cst_182 = arith.constant dense<0.000000e+00> : vector<4x32xf32>
    %201 = tpu.matmul %200, %163, %cst_182 {dimension_numbers = #tpu.dot_dimension_numbers<[1], [0], [0], [1], [0, 0, 1, 1], [], []>} : vector<4x16xbf16>, vector<16x32xbf16>, vector<4x32xf32> -> vector<4x32xf32>
    %202 = arith.truncf %201 : vector<4x32xf32> to vector<4x32xbf16>
    %c4_183 = arith.constant 4 : index
    %c0_184 = arith.constant 0 : index
    %c0_185 = arith.constant 0 : index
    %203 = vector.load %arg9[%c4_183, %c0_184, %c0_185] : memref<9x32x32xbf16, #tpu.memory_space<vmem>>, vector<1x32x32xbf16>
    %204 = vector.shape_cast %203 : vector<1x32x32xbf16> to vector<32x32xbf16>
    %cst_186 = arith.constant dense<0.000000e+00> : vector<4x32xf32>
    %205 = tpu.matmul %202, %204, %cst_186 {dimension_numbers = #tpu.dot_dimension_numbers<[1], [0], [0], [1], [0, 0, 1, 1], [], []>} : vector<4x32xbf16>, vector<32x32xbf16>, vector<4x32xf32> -> vector<4x32xf32>
    %206 = arith.addf %198, %205 : vector<4x32xf32>
    %c5_187 = arith.constant 5 : index
    %c0_188 = arith.constant 0 : index
    %c0_189 = arith.constant 0 : index
    %207 = vector.load %arg8[%c5_187, %c0_188, %c0_189] : memref<9x4x16xbf16, #tpu.memory_space<vmem>>, vector<1x4x16xbf16>
    %208 = vector.shape_cast %207 : vector<1x4x16xbf16> to vector<4x16xbf16>
    %cst_190 = arith.constant dense<0.000000e+00> : vector<4x32xf32>
    %209 = tpu.matmul %208, %163, %cst_190 {dimension_numbers = #tpu.dot_dimension_numbers<[1], [0], [0], [1], [0, 0, 1, 1], [], []>} : vector<4x16xbf16>, vector<16x32xbf16>, vector<4x32xf32> -> vector<4x32xf32>
    %210 = arith.truncf %209 : vector<4x32xf32> to vector<4x32xbf16>
    %c5_191 = arith.constant 5 : index
    %c0_192 = arith.constant 0 : index
    %c0_193 = arith.constant 0 : index
    %211 = vector.load %arg9[%c5_191, %c0_192, %c0_193] : memref<9x32x32xbf16, #tpu.memory_space<vmem>>, vector<1x32x32xbf16>
    %212 = vector.shape_cast %211 : vector<1x32x32xbf16> to vector<32x32xbf16>
    %cst_194 = arith.constant dense<0.000000e+00> : vector<4x32xf32>
    %213 = tpu.matmul %210, %212, %cst_194 {dimension_numbers = #tpu.dot_dimension_numbers<[1], [0], [0], [1], [0, 0, 1, 1], [], []>} : vector<4x32xbf16>, vector<32x32xbf16>, vector<4x32xf32> -> vector<4x32xf32>
    %214 = arith.addf %206, %213 : vector<4x32xf32>
    %c6_195 = arith.constant 6 : index
    %c0_196 = arith.constant 0 : index
    %c0_197 = arith.constant 0 : index
    %215 = vector.load %arg8[%c6_195, %c0_196, %c0_197] : memref<9x4x16xbf16, #tpu.memory_space<vmem>>, vector<1x4x16xbf16>
    %216 = vector.shape_cast %215 : vector<1x4x16xbf16> to vector<4x16xbf16>
    %cst_198 = arith.constant dense<0.000000e+00> : vector<4x32xf32>
    %217 = tpu.matmul %216, %163, %cst_198 {dimension_numbers = #tpu.dot_dimension_numbers<[1], [0], [0], [1], [0, 0, 1, 1], [], []>} : vector<4x16xbf16>, vector<16x32xbf16>, vector<4x32xf32> -> vector<4x32xf32>
    %218 = arith.truncf %217 : vector<4x32xf32> to vector<4x32xbf16>
    %c6_199 = arith.constant 6 : index
    %c0_200 = arith.constant 0 : index
    %c0_201 = arith.constant 0 : index
    %219 = vector.load %arg9[%c6_199, %c0_200, %c0_201] : memref<9x32x32xbf16, #tpu.memory_space<vmem>>, vector<1x32x32xbf16>
    %220 = vector.shape_cast %219 : vector<1x32x32xbf16> to vector<32x32xbf16>
    %cst_202 = arith.constant dense<0.000000e+00> : vector<4x32xf32>
    %221 = tpu.matmul %218, %220, %cst_202 {dimension_numbers = #tpu.dot_dimension_numbers<[1], [0], [0], [1], [0, 0, 1, 1], [], []>} : vector<4x32xbf16>, vector<32x32xbf16>, vector<4x32xf32> -> vector<4x32xf32>
    %222 = arith.addf %214, %221 : vector<4x32xf32>
    %c7_203 = arith.constant 7 : index
    %c0_204 = arith.constant 0 : index
    %c0_205 = arith.constant 0 : index
    %223 = vector.load %arg8[%c7_203, %c0_204, %c0_205] : memref<9x4x16xbf16, #tpu.memory_space<vmem>>, vector<1x4x16xbf16>
    %224 = vector.shape_cast %223 : vector<1x4x16xbf16> to vector<4x16xbf16>
    %cst_206 = arith.constant dense<0.000000e+00> : vector<4x32xf32>
    %225 = tpu.matmul %224, %163, %cst_206 {dimension_numbers = #tpu.dot_dimension_numbers<[1], [0], [0], [1], [0, 0, 1, 1], [], []>} : vector<4x16xbf16>, vector<16x32xbf16>, vector<4x32xf32> -> vector<4x32xf32>
    %226 = arith.truncf %225 : vector<4x32xf32> to vector<4x32xbf16>
    %c7_207 = arith.constant 7 : index
    %c0_208 = arith.constant 0 : index
    %c0_209 = arith.constant 0 : index
    %227 = vector.load %arg9[%c7_207, %c0_208, %c0_209] : memref<9x32x32xbf16, #tpu.memory_space<vmem>>, vector<1x32x32xbf16>
    %228 = vector.shape_cast %227 : vector<1x32x32xbf16> to vector<32x32xbf16>
    %cst_210 = arith.constant dense<0.000000e+00> : vector<4x32xf32>
    %229 = tpu.matmul %226, %228, %cst_210 {dimension_numbers = #tpu.dot_dimension_numbers<[1], [0], [0], [1], [0, 0, 1, 1], [], []>} : vector<4x32xbf16>, vector<32x32xbf16>, vector<4x32xf32> -> vector<4x32xf32>
    %230 = arith.addf %222, %229 : vector<4x32xf32>
    %c8_211 = arith.constant 8 : index
    %c0_212 = arith.constant 0 : index
    %c0_213 = arith.constant 0 : index
    %231 = vector.load %arg8[%c8_211, %c0_212, %c0_213] : memref<9x4x16xbf16, #tpu.memory_space<vmem>>, vector<1x4x16xbf16>
    %232 = vector.shape_cast %231 : vector<1x4x16xbf16> to vector<4x16xbf16>
    %cst_214 = arith.constant dense<0.000000e+00> : vector<4x32xf32>
    %233 = tpu.matmul %232, %163, %cst_214 {dimension_numbers = #tpu.dot_dimension_numbers<[1], [0], [0], [1], [0, 0, 1, 1], [], []>} : vector<4x16xbf16>, vector<16x32xbf16>, vector<4x32xf32> -> vector<4x32xf32>
    %234 = arith.truncf %233 : vector<4x32xf32> to vector<4x32xbf16>
    %c8_215 = arith.constant 8 : index
    %c0_216 = arith.constant 0 : index
    %c0_217 = arith.constant 0 : index
    %235 = vector.load %arg9[%c8_215, %c0_216, %c0_217] : memref<9x32x32xbf16, #tpu.memory_space<vmem>>, vector<1x32x32xbf16>
    %236 = vector.shape_cast %235 : vector<1x32x32xbf16> to vector<32x32xbf16>
    %cst_218 = arith.constant dense<0.000000e+00> : vector<4x32xf32>
    %237 = tpu.matmul %234, %236, %cst_218 {dimension_numbers = #tpu.dot_dimension_numbers<[1], [0], [0], [1], [0, 0, 1, 1], [], []>} : vector<4x32xbf16>, vector<32x32xbf16>, vector<4x32xf32> -> vector<4x32xf32>
    %238 = arith.addf %230, %237 : vector<4x32xf32>
    %cst_219 = arith.constant 0.000000e+00 : f32
    %239 = vector.broadcast %cst_219 : f32 to vector<4x32xf32>
    %240 = arith.cmpf oge, %238, %239 : vector<4x32xf32>
    %cst_220 = arith.constant 0.00999999977 : f32
    %241 = vector.broadcast %cst_220 : f32 to vector<4x32xf32>
    %242 = arith.mulf %241, %238 : vector<4x32xf32>
    %243 = arith.select %240, %238, %242 : vector<4x32xi1>, vector<4x32xf32>
    %244 = arith.truncf %243 : vector<4x32xf32> to vector<4x32xbf16>
    %c0_221 = arith.constant 0 : index
    %c0_222 = arith.constant 0 : index
    %245 = vector.load %arg13[%c0_221, %c0_222] : memref<1x32xf32, #tpu.memory_space<vmem>>, vector<1x32xf32>
    %c0_223 = arith.constant 0 : index
    %c0_224 = arith.constant 0 : index
    %c0_225 = arith.constant 0 : index
    %246 = vector.load %arg11[%c0_223, %c0_224, %c0_225] : memref<9x1x4xbf16, #tpu.memory_space<vmem>>, vector<1x1x4xbf16>
    %247 = vector.shape_cast %246 : vector<1x1x4xbf16> to vector<1x4xbf16>
    %cst_226 = arith.constant dense<0.000000e+00> : vector<1x32xf32>
    %248 = tpu.matmul %247, %244, %cst_226 {dimension_numbers = #tpu.dot_dimension_numbers<[1], [0], [0], [1], [0, 0, 1, 1], [], []>} : vector<1x4xbf16>, vector<4x32xbf16>, vector<1x32xf32> -> vector<1x32xf32>
    %249 = arith.truncf %248 : vector<1x32xf32> to vector<1x32xbf16>
    %c0_227 = arith.constant 0 : index
    %c0_228 = arith.constant 0 : index
    %c0_229 = arith.constant 0 : index
    %250 = vector.load %arg12[%c0_227, %c0_228, %c0_229] : memref<9x32x32xbf16, #tpu.memory_space<vmem>>, vector<1x32x32xbf16>
    %251 = vector.shape_cast %250 : vector<1x32x32xbf16> to vector<32x32xbf16>
    %cst_230 = arith.constant dense<0.000000e+00> : vector<1x32xf32>
    %252 = tpu.matmul %249, %251, %cst_230 {dimension_numbers = #tpu.dot_dimension_numbers<[1], [0], [0], [1], [0, 0, 1, 1], [], []>} : vector<1x32xbf16>, vector<32x32xbf16>, vector<1x32xf32> -> vector<1x32xf32>
    %253 = arith.addf %245, %252 : vector<1x32xf32>
    %c1_231 = arith.constant 1 : index
    %c0_232 = arith.constant 0 : index
    %c0_233 = arith.constant 0 : index
    %254 = vector.load %arg11[%c1_231, %c0_232, %c0_233] : memref<9x1x4xbf16, #tpu.memory_space<vmem>>, vector<1x1x4xbf16>
    %255 = vector.shape_cast %254 : vector<1x1x4xbf16> to vector<1x4xbf16>
    %cst_234 = arith.constant dense<0.000000e+00> : vector<1x32xf32>
    %256 = tpu.matmul %255, %244, %cst_234 {dimension_numbers = #tpu.dot_dimension_numbers<[1], [0], [0], [1], [0, 0, 1, 1], [], []>} : vector<1x4xbf16>, vector<4x32xbf16>, vector<1x32xf32> -> vector<1x32xf32>
    %257 = arith.truncf %256 : vector<1x32xf32> to vector<1x32xbf16>
    %c1_235 = arith.constant 1 : index
    %c0_236 = arith.constant 0 : index
    %c0_237 = arith.constant 0 : index
    %258 = vector.load %arg12[%c1_235, %c0_236, %c0_237] : memref<9x32x32xbf16, #tpu.memory_space<vmem>>, vector<1x32x32xbf16>
    %259 = vector.shape_cast %258 : vector<1x32x32xbf16> to vector<32x32xbf16>
    %cst_238 = arith.constant dense<0.000000e+00> : vector<1x32xf32>
    %260 = tpu.matmul %257, %259, %cst_238 {dimension_numbers = #tpu.dot_dimension_numbers<[1], [0], [0], [1], [0, 0, 1, 1], [], []>} : vector<1x32xbf16>, vector<32x32xbf16>, vector<1x32xf32> -> vector<1x32xf32>
    %261 = arith.addf %253, %260 : vector<1x32xf32>
    %c2_239 = arith.constant 2 : index
    %c0_240 = arith.constant 0 : index
    %c0_241 = arith.constant 0 : index
    %262 = vector.load %arg11[%c2_239, %c0_240, %c0_241] : memref<9x1x4xbf16, #tpu.memory_space<vmem>>, vector<1x1x4xbf16>
    %263 = vector.shape_cast %262 : vector<1x1x4xbf16> to vector<1x4xbf16>
    %cst_242 = arith.constant dense<0.000000e+00> : vector<1x32xf32>
    %264 = tpu.matmul %263, %244, %cst_242 {dimension_numbers = #tpu.dot_dimension_numbers<[1], [0], [0], [1], [0, 0, 1, 1], [], []>} : vector<1x4xbf16>, vector<4x32xbf16>, vector<1x32xf32> -> vector<1x32xf32>
    %265 = arith.truncf %264 : vector<1x32xf32> to vector<1x32xbf16>
    %c2_243 = arith.constant 2 : index
    %c0_244 = arith.constant 0 : index
    %c0_245 = arith.constant 0 : index
    %266 = vector.load %arg12[%c2_243, %c0_244, %c0_245] : memref<9x32x32xbf16, #tpu.memory_space<vmem>>, vector<1x32x32xbf16>
    %267 = vector.shape_cast %266 : vector<1x32x32xbf16> to vector<32x32xbf16>
    %cst_246 = arith.constant dense<0.000000e+00> : vector<1x32xf32>
    %268 = tpu.matmul %265, %267, %cst_246 {dimension_numbers = #tpu.dot_dimension_numbers<[1], [0], [0], [1], [0, 0, 1, 1], [], []>} : vector<1x32xbf16>, vector<32x32xbf16>, vector<1x32xf32> -> vector<1x32xf32>
    %269 = arith.addf %261, %268 : vector<1x32xf32>
    %c3_247 = arith.constant 3 : index
    %c0_248 = arith.constant 0 : index
    %c0_249 = arith.constant 0 : index
    %270 = vector.load %arg11[%c3_247, %c0_248, %c0_249] : memref<9x1x4xbf16, #tpu.memory_space<vmem>>, vector<1x1x4xbf16>
    %271 = vector.shape_cast %270 : vector<1x1x4xbf16> to vector<1x4xbf16>
    %cst_250 = arith.constant dense<0.000000e+00> : vector<1x32xf32>
    %272 = tpu.matmul %271, %244, %cst_250 {dimension_numbers = #tpu.dot_dimension_numbers<[1], [0], [0], [1], [0, 0, 1, 1], [], []>} : vector<1x4xbf16>, vector<4x32xbf16>, vector<1x32xf32> -> vector<1x32xf32>
    %273 = arith.truncf %272 : vector<1x32xf32> to vector<1x32xbf16>
    %c3_251 = arith.constant 3 : index
    %c0_252 = arith.constant 0 : index
    %c0_253 = arith.constant 0 : index
    %274 = vector.load %arg12[%c3_251, %c0_252, %c0_253] : memref<9x32x32xbf16, #tpu.memory_space<vmem>>, vector<1x32x32xbf16>
    %275 = vector.shape_cast %274 : vector<1x32x32xbf16> to vector<32x32xbf16>
    %cst_254 = arith.constant dense<0.000000e+00> : vector<1x32xf32>
    %276 = tpu.matmul %273, %275, %cst_254 {dimension_numbers = #tpu.dot_dimension_numbers<[1], [0], [0], [1], [0, 0, 1, 1], [], []>} : vector<1x32xbf16>, vector<32x32xbf16>, vector<1x32xf32> -> vector<1x32xf32>
    %277 = arith.addf %269, %276 : vector<1x32xf32>
    %c4_255 = arith.constant 4 : index
    %c0_256 = arith.constant 0 : index
    %c0_257 = arith.constant 0 : index
    %278 = vector.load %arg11[%c4_255, %c0_256, %c0_257] : memref<9x1x4xbf16, #tpu.memory_space<vmem>>, vector<1x1x4xbf16>
    %279 = vector.shape_cast %278 : vector<1x1x4xbf16> to vector<1x4xbf16>
    %cst_258 = arith.constant dense<0.000000e+00> : vector<1x32xf32>
    %280 = tpu.matmul %279, %244, %cst_258 {dimension_numbers = #tpu.dot_dimension_numbers<[1], [0], [0], [1], [0, 0, 1, 1], [], []>} : vector<1x4xbf16>, vector<4x32xbf16>, vector<1x32xf32> -> vector<1x32xf32>
    %281 = arith.truncf %280 : vector<1x32xf32> to vector<1x32xbf16>
    %c4_259 = arith.constant 4 : index
    %c0_260 = arith.constant 0 : index
    %c0_261 = arith.constant 0 : index
    %282 = vector.load %arg12[%c4_259, %c0_260, %c0_261] : memref<9x32x32xbf16, #tpu.memory_space<vmem>>, vector<1x32x32xbf16>
    %283 = vector.shape_cast %282 : vector<1x32x32xbf16> to vector<32x32xbf16>
    %cst_262 = arith.constant dense<0.000000e+00> : vector<1x32xf32>
    %284 = tpu.matmul %281, %283, %cst_262 {dimension_numbers = #tpu.dot_dimension_numbers<[1], [0], [0], [1], [0, 0, 1, 1], [], []>} : vector<1x32xbf16>, vector<32x32xbf16>, vector<1x32xf32> -> vector<1x32xf32>
    %285 = arith.addf %277, %284 : vector<1x32xf32>
    %c5_263 = arith.constant 5 : index
    %c0_264 = arith.constant 0 : index
    %c0_265 = arith.constant 0 : index
    %286 = vector.load %arg11[%c5_263, %c0_264, %c0_265] : memref<9x1x4xbf16, #tpu.memory_space<vmem>>, vector<1x1x4xbf16>
    %287 = vector.shape_cast %286 : vector<1x1x4xbf16> to vector<1x4xbf16>
    %cst_266 = arith.constant dense<0.000000e+00> : vector<1x32xf32>
    %288 = tpu.matmul %287, %244, %cst_266 {dimension_numbers = #tpu.dot_dimension_numbers<[1], [0], [0], [1], [0, 0, 1, 1], [], []>} : vector<1x4xbf16>, vector<4x32xbf16>, vector<1x32xf32> -> vector<1x32xf32>
    %289 = arith.truncf %288 : vector<1x32xf32> to vector<1x32xbf16>
    %c5_267 = arith.constant 5 : index
    %c0_268 = arith.constant 0 : index
    %c0_269 = arith.constant 0 : index
    %290 = vector.load %arg12[%c5_267, %c0_268, %c0_269] : memref<9x32x32xbf16, #tpu.memory_space<vmem>>, vector<1x32x32xbf16>
    %291 = vector.shape_cast %290 : vector<1x32x32xbf16> to vector<32x32xbf16>
    %cst_270 = arith.constant dense<0.000000e+00> : vector<1x32xf32>
    %292 = tpu.matmul %289, %291, %cst_270 {dimension_numbers = #tpu.dot_dimension_numbers<[1], [0], [0], [1], [0, 0, 1, 1], [], []>} : vector<1x32xbf16>, vector<32x32xbf16>, vector<1x32xf32> -> vector<1x32xf32>
    %293 = arith.addf %285, %292 : vector<1x32xf32>
    %c6_271 = arith.constant 6 : index
    %c0_272 = arith.constant 0 : index
    %c0_273 = arith.constant 0 : index
    %294 = vector.load %arg11[%c6_271, %c0_272, %c0_273] : memref<9x1x4xbf16, #tpu.memory_space<vmem>>, vector<1x1x4xbf16>
    %295 = vector.shape_cast %294 : vector<1x1x4xbf16> to vector<1x4xbf16>
    %cst_274 = arith.constant dense<0.000000e+00> : vector<1x32xf32>
    %296 = tpu.matmul %295, %244, %cst_274 {dimension_numbers = #tpu.dot_dimension_numbers<[1], [0], [0], [1], [0, 0, 1, 1], [], []>} : vector<1x4xbf16>, vector<4x32xbf16>, vector<1x32xf32> -> vector<1x32xf32>
    %297 = arith.truncf %296 : vector<1x32xf32> to vector<1x32xbf16>
    %c6_275 = arith.constant 6 : index
    %c0_276 = arith.constant 0 : index
    %c0_277 = arith.constant 0 : index
    %298 = vector.load %arg12[%c6_275, %c0_276, %c0_277] : memref<9x32x32xbf16, #tpu.memory_space<vmem>>, vector<1x32x32xbf16>
    %299 = vector.shape_cast %298 : vector<1x32x32xbf16> to vector<32x32xbf16>
    %cst_278 = arith.constant dense<0.000000e+00> : vector<1x32xf32>
    %300 = tpu.matmul %297, %299, %cst_278 {dimension_numbers = #tpu.dot_dimension_numbers<[1], [0], [0], [1], [0, 0, 1, 1], [], []>} : vector<1x32xbf16>, vector<32x32xbf16>, vector<1x32xf32> -> vector<1x32xf32>
    %301 = arith.addf %293, %300 : vector<1x32xf32>
    %c7_279 = arith.constant 7 : index
    %c0_280 = arith.constant 0 : index
    %c0_281 = arith.constant 0 : index
    %302 = vector.load %arg11[%c7_279, %c0_280, %c0_281] : memref<9x1x4xbf16, #tpu.memory_space<vmem>>, vector<1x1x4xbf16>
    %303 = vector.shape_cast %302 : vector<1x1x4xbf16> to vector<1x4xbf16>
    %cst_282 = arith.constant dense<0.000000e+00> : vector<1x32xf32>
    %304 = tpu.matmul %303, %244, %cst_282 {dimension_numbers = #tpu.dot_dimension_numbers<[1], [0], [0], [1], [0, 0, 1, 1], [], []>} : vector<1x4xbf16>, vector<4x32xbf16>, vector<1x32xf32> -> vector<1x32xf32>
    %305 = arith.truncf %304 : vector<1x32xf32> to vector<1x32xbf16>
    %c7_283 = arith.constant 7 : index
    %c0_284 = arith.constant 0 : index
    %c0_285 = arith.constant 0 : index
    %306 = vector.load %arg12[%c7_283, %c0_284, %c0_285] : memref<9x32x32xbf16, #tpu.memory_space<vmem>>, vector<1x32x32xbf16>
    %307 = vector.shape_cast %306 : vector<1x32x32xbf16> to vector<32x32xbf16>
    %cst_286 = arith.constant dense<0.000000e+00> : vector<1x32xf32>
    %308 = tpu.matmul %305, %307, %cst_286 {dimension_numbers = #tpu.dot_dimension_numbers<[1], [0], [0], [1], [0, 0, 1, 1], [], []>} : vector<1x32xbf16>, vector<32x32xbf16>, vector<1x32xf32> -> vector<1x32xf32>
    %309 = arith.addf %301, %308 : vector<1x32xf32>
    %c8_287 = arith.constant 8 : index
    %c0_288 = arith.constant 0 : index
    %c0_289 = arith.constant 0 : index
    %310 = vector.load %arg11[%c8_287, %c0_288, %c0_289] : memref<9x1x4xbf16, #tpu.memory_space<vmem>>, vector<1x1x4xbf16>
    %311 = vector.shape_cast %310 : vector<1x1x4xbf16> to vector<1x4xbf16>
    %cst_290 = arith.constant dense<0.000000e+00> : vector<1x32xf32>
    %312 = tpu.matmul %311, %244, %cst_290 {dimension_numbers = #tpu.dot_dimension_numbers<[1], [0], [0], [1], [0, 0, 1, 1], [], []>} : vector<1x4xbf16>, vector<4x32xbf16>, vector<1x32xf32> -> vector<1x32xf32>
    %313 = arith.truncf %312 : vector<1x32xf32> to vector<1x32xbf16>
    %c8_291 = arith.constant 8 : index
    %c0_292 = arith.constant 0 : index
    %c0_293 = arith.constant 0 : index
    %314 = vector.load %arg12[%c8_291, %c0_292, %c0_293] : memref<9x32x32xbf16, #tpu.memory_space<vmem>>, vector<1x32x32xbf16>
    %315 = vector.shape_cast %314 : vector<1x32x32xbf16> to vector<32x32xbf16>
    %cst_294 = arith.constant dense<0.000000e+00> : vector<1x32xf32>
    %316 = tpu.matmul %313, %315, %cst_294 {dimension_numbers = #tpu.dot_dimension_numbers<[1], [0], [0], [1], [0, 0, 1, 1], [], []>} : vector<1x32xbf16>, vector<32x32xbf16>, vector<1x32xf32> -> vector<1x32xf32>
    %317 = arith.addf %309, %316 : vector<1x32xf32>
    %cst_295 = arith.constant 0.000000e+00 : f32
    %318 = vector.broadcast %cst_295 : f32 to vector<1x32xf32>
    %319 = arith.cmpf oge, %317, %318 : vector<1x32xf32>
    %cst_296 = arith.constant 0.00999999977 : f32
    %320 = vector.broadcast %cst_296 : f32 to vector<1x32xf32>
    %321 = arith.mulf %320, %317 : vector<1x32xf32>
    %322 = arith.select %319, %317, %321 : vector<1x32xi1>, vector<1x32xf32>
    %323 = arith.truncf %322 : vector<1x32xf32> to vector<1x32xbf16>
    %c0_297 = arith.constant 0 : index
    %c0_298 = arith.constant 0 : index
    %324 = vector.load %arg14[%c0_297, %c0_298] : memref<32x32xbf16, #tpu.memory_space<vmem>>, vector<32x32xbf16>
    %cst_299 = arith.constant dense<0.000000e+00> : vector<1x32xf32>
    %325 = tpu.matmul %323, %324, %cst_299 {dimension_numbers = #tpu.dot_dimension_numbers<[1], [0], [0], [1], [0, 0, 1, 1], [], []>} : vector<1x32xbf16>, vector<32x32xbf16>, vector<1x32xf32> -> vector<1x32xf32>
    %c0_300 = arith.constant 0 : index
    %c0_301 = arith.constant 0 : index
    %326 = vector.load %arg15[%c0_300, %c0_301] : memref<1x32xf32, #tpu.memory_space<vmem>>, vector<1x32xf32>
    %327 = arith.addf %325, %326 : vector<1x32xf32>
    %328 = vector.shape_cast %327 : vector<1x32xf32> to vector<1x1x32xf32>
    %c0_302 = arith.constant 0 : index
    %c0_303 = arith.constant 0 : index
    %c0_304 = arith.constant 0 : index
    %329 = vector.load %arg16[%c0_302, %c0_303, %c0_304] : memref<1x1x32xf32, #tpu.memory_space<vmem>>, vector<1x1x32xf32>
    tpu.vector_store %arg16[%c0_302, %c0_303, %c0_304], %328 {strides = array<i32>} : memref<1x1x32xf32, #tpu.memory_space<vmem>>, vector<1x1x32xf32>,
    return
  }
  func.func @transform_0(%arg0: i32) -> (i32, i32, i32) {
    %c0_i32 = arith.constant 0 : i32
    %c0_i32_0 = arith.constant 0 : i32
    %c0_i32_1 = arith.constant 0 : i32
    return %arg0, %c0_i32, %c0_i32_0 : i32, i32, i32
  }
  func.func @transform_1(%arg0: i32) -> (i32, i32, i32) {
    %c0_i32 = arith.constant 0 : i32
    %c0_i32_0 = arith.constant 0 : i32
    %c0_i32_1 = arith.constant 0 : i32
    %c0_i32_2 = arith.constant 0 : i32
    return %c0_i32, %c0_i32_0, %c0_i32_1 : i32, i32, i32
  }
  func.func @transform_2(%arg0: i32) -> (i32, i32, i32) {
    %c0_i32 = arith.constant 0 : i32
    %c0_i32_0 = arith.constant 0 : i32
    %c0_i32_1 = arith.constant 0 : i32
    %c0_i32_2 = arith.constant 0 : i32
    return %c0_i32, %c0_i32_0, %c0_i32_1 : i32, i32, i32
  }
  func.func @transform_3(%arg0: i32) -> (i32, i32) {
    %c0_i32 = arith.constant 0 : i32
    %c0_i32_0 = arith.constant 0 : i32
    %c0_i32_1 = arith.constant 0 : i32
    return %c0_i32, %c0_i32_0 : i32, i32
  }
  func.func @transform_4(%arg0: i32) -> (i32, i32, i32) {
    %c0_i32 = arith.constant 0 : i32
    %c0_i32_0 = arith.constant 0 : i32
    %c0_i32_1 = arith.constant 0 : i32
    %c0_i32_2 = arith.constant 0 : i32
    return %c0_i32, %c0_i32_0, %c0_i32_1 : i32, i32, i32
  }
  func.func @transform_5(%arg0: i32) -> (i32, i32, i32) {
    %c0_i32 = arith.constant 0 : i32
    %c0_i32_0 = arith.constant 0 : i32
    %c0_i32_1 = arith.constant 0 : i32
    %c0_i32_2 = arith.constant 0 : i32
    return %c0_i32, %c0_i32_0, %c0_i32_1 : i32, i32, i32
  }
  func.func @transform_6(%arg0: i32) -> (i32, i32) {
    %c0_i32 = arith.constant 0 : i32
    %c0_i32_0 = arith.constant 0 : i32
    %c0_i32_1 = arith.constant 0 : i32
    return %c0_i32, %c0_i32_0 : i32, i32
  }
  func.func @transform_7(%arg0: i32) -> (i32, i32, i32) {
    %c0_i32 = arith.constant 0 : i32
    %c0_i32_0 = arith.constant 0 : i32
    %c0_i32_1 = arith.constant 0 : i32
    %c0_i32_2 = arith.constant 0 : i32
    return %c0_i32, %c0_i32_0, %c0_i32_1 : i32, i32, i32
  }
  func.func @transform_8(%arg0: i32) -> (i32, i32, i32) {
    %c0_i32 = arith.constant 0 : i32
    %c0_i32_0 = arith.constant 0 : i32
    %c0_i32_1 = arith.constant 0 : i32
    %c0_i32_2 = arith.constant 0 : i32
    return %c0_i32, %c0_i32_0, %c0_i32_1 : i32, i32, i32
  }
  func.func @transform_9(%arg0: i32) -> (i32, i32) {
    %c0_i32 = arith.constant 0 : i32
    %c0_i32_0 = arith.constant 0 : i32
    %c0_i32_1 = arith.constant 0 : i32
    return %c0_i32, %c0_i32_0 : i32, i32
  }
  func.func @transform_10(%arg0: i32) -> (i32, i32, i32) {
    %c0_i32 = arith.constant 0 : i32
    %c0_i32_0 = arith.constant 0 : i32
    %c0_i32_1 = arith.constant 0 : i32
    %c0_i32_2 = arith.constant 0 : i32
    return %c0_i32, %c0_i32_0, %c0_i32_1 : i32, i32, i32
  }
  func.func @transform_11(%arg0: i32) -> (i32, i32, i32) {
    %c0_i32 = arith.constant 0 : i32
    %c0_i32_0 = arith.constant 0 : i32
    %c0_i32_1 = arith.constant 0 : i32
    %c0_i32_2 = arith.constant 0 : i32
    return %c0_i32, %c0_i32_0, %c0_i32_1 : i32, i32, i32
  }
  func.func @transform_12(%arg0: i32) -> (i32, i32) {
    %c0_i32 = arith.constant 0 : i32
    %c0_i32_0 = arith.constant 0 : i32
    %c0_i32_1 = arith.constant 0 : i32
    return %c0_i32, %c0_i32_0 : i32, i32
  }
  func.func @transform_13(%arg0: i32) -> (i32, i32) {
    %c0_i32 = arith.constant 0 : i32
    %c0_i32_0 = arith.constant 0 : i32
    %c0_i32_1 = arith.constant 0 : i32
    return %c0_i32, %c0_i32_0 : i32, i32
  }
  func.func @transform_14(%arg0: i32) -> (i32, i32) {
    %c0_i32 = arith.constant 0 : i32
    %c0_i32_0 = arith.constant 0 : i32
    %c0_i32_1 = arith.constant 0 : i32
    return %c0_i32, %c0_i32_0 : i32, i32
  }
  func.func @transform_15(%arg0: i32) -> (i32, i32, i32) {
    %c0_i32 = arith.constant 0 : i32
    %c0_i32_0 = arith.constant 0 : i32
    %c0_i32_1 = arith.constant 0 : i32
    return %arg0, %c0_i32, %c0_i32_0 : i32, i32, i32
  }
}

</mosaic_0001>

<bundles_post_ra>
// kernel: gradual_style_block_apply.1
= control target key start
LH: loop header
LB: loop body
LE: loop exit
PB: predicated region body
PF: predicated region fallthrough
CT: control target
= control target key end

     0   :  { %s9217_s0 = inlined_call_operand.vmem [shape: bf16[2,256,4], index: 0, kind: input, shape index: {}]   ;;  %s9218_s1 = inlined_call_operand.vmem [shape: bf16[9,64,256], index: 1, kind: input, shape index: {}]   ;;  %s9219_s2 = inlined_call_operand.vmem [shape: bf16[9,4,32], index: 2, kind: input, shape index: {}]   ;;  %s9220_s3 = inlined_call_operand.vmem [shape: f32[1,32], index: 3, kind: input, shape index: {}]   ;;  %s9221_s4 = inlined_call_operand.vmem [shape: bf16[9,16,64], index: 4, kind: input, shape index: {}]   ;;  %s9222_s5 = inlined_call_operand.vmem [shape: bf16[9,32,32], index: 5, kind: input, shape index: {}]   ;;  %s9223_s6 = inlined_call_operand.vmem [shape: f32[1,32], index: 6, kind: input, shape index: {}]   ;;  %s9224_s7 = inlined_call_operand.vmem [shape: bf16[9,4,16], index: 7, kind: input, shape index: {}]   ;;  %s9225_s8 = inlined_call_operand.vmem [shape: bf16[9,32,32], index: 8, kind: input, shape index: {}]   ;;  %s9226_s9 = inlined_call_operand.vmem [shape: f32[1,32], index: 9, kind: input, shape index: {}]   ;;  %s9227_s10 = inlined_call_operand.vmem [shape: bf16[9,1,4], index: 10, kind: input, shape index: {}]   ;;  %s9228_s11 = inlined_call_operand.vmem [shape: bf16[9,32,32], index: 11, kind: input, shape index: {}]   ;;  %s9229_s12 = inlined_call_operand.vmem [shape: f32[1,32], index: 12, kind: input, shape index: {}]   ;;  %s9230_s13 = inlined_call_operand.vmem [shape: bf16[32,32], index: 13, kind: input, shape index: {}]   ;;  %s9231_s14 = inlined_call_operand.vmem [shape: f32[1,32], index: 14, kind: input, shape index: {}]   ;;  %s9232_s15 = inlined_call_operand.hbm [shape: f32[2,1,32], index: 15, kind: output, shape index: {}]  }
   0x1   :  { %9237 = sst [smem:[#allocation9_spill]] %s9217_s0 }
   0x2   :  { %20 = vsyncpa [#allocation3], 0 }
   0x3   :  { %22 = vsyncpa [#allocation3 + $0x1], 0  ;;  %s7789_s18 = smov 0   ;;  %s7791_s19 = smov 0  }
   0x4   :  { %s7793_s20 = smov 0   ;;  %s7795_s21 = smov 0  }
   0x5 LB: > { %9238 = sst [smem:[#allocation5_spill]] %s7700_s20  ;;  %s7810_s22 = sadd.s32 4294967295, %s7704_s21   ;;  %s7704_s21 = sphi %s7795_s21, %s9250_s21   ;;  %s7700_s20 = sphi %s7793_s20, %s9252_s20   ;;  %s7696_s19 = sphi %s7791_s19, %s9254_s19   ;;  %s7692_s18 = sphi %s7789_s18, %s9253_s18  }
   0x6   : > { %s5658_s23 = sadd.s32 4294967294, %s7704_s21   ;;  %s7814_s24 = sadd.s32 1, %s7704_s21  }
   0x7   : > { %9239 = sst [smem:[#allocation6_spill]] %s7814_s24  ;;  %s355_s25 = sadd.s32 1, %s7700_s20 }
   0x8   : > { %s352_s26 = ssub.s32 %s7704_s21, %s7814_s24  ;;  %p365_p0 = scmp.ne.s32.totalorder %s7700_s20, %s7696_s19 }
   0x9   : > { %p353_p1 = scmp.eq.s32.totalorder %s352_s26, 0  ;;  %p366_p2 = scmp.eq.s32.totalorder %s7810_s22, 1 }
   0xa   : > { %p371_p3 = scmp.ne.s32.totalorder %s7696_s19, %s7692_s18  ;;  %p372_p4 = scmp.eq.s32.totalorder %s5658_s23, 1 }
   0xb   : > { %s7825_s27 = scalar_select %p353_p1, %s7700_s20, %s355_s25  }
   0xc   : > { %p7827_p5 = por %p366_p2, %p365_p0  ;;  %p7831_p6 = por %p372_p4, %p371_p3 }
   0xd   : > { %9240 = sst [smem:[#allocation7_spill]] %s7825_s27  ;;  %p5661_p7 = scmp.ge.s32.totalorder %s7704_s21, 1 }
   0xe   : > { %s9242_s29 = scalar_select %p7831_p6, 1, 0 }
   0xf   : > { %p440_p8 = scmp.lt.s32.totalorder %s7704_s21, 3 }
  0x10   : > { %9243 = sst [smem:[#allocation8_spill]] %s9242_s29 }
  0x11   : > { %p441_p9 = pnand %p5661_p7, %p440_p8 }
  0x12   : > { %p487_p10 = scmp.lt.s32.totalorder (!%p441_p9), %s7810_s22, 1  ;;  %v7455_v0 = vld [vmem:[%s9218_s1 + $0x4] ss:$8 sps:$4 sm:$0xff] (!%p441_p9)   ;;  %s9244_s0 = sld [smem:[#allocation9_spill]] (!%p441_p9)  ;;  %v7453_v17 = vld [vmem:[%s9218_s1] ss:$8 sps:$4 sm:$0xff] (!%p441_p9)  }
  0x13   : > { %444 = sbr.rel (%p441_p9) target bundleno = 3423 (0xd5f), region = 80  ;;  %708 = vmatprep.mubr.bf16.mxu0 (!%p441_p9), %v7455_v0  ;;  %v7456_v18 = vld [vmem:[%s9218_s1 + $0x14] ss:$8 sps:$4 sm:$0xff] (!%p441_p9)   ;;  %v7458_v19 = vld [vmem:[%s9218_s1 + $0x10] ss:$8 sps:$4 sm:$0xff] (!%p441_p9)   ;;  %vm759_vm0 = vcmask (!%p441_p9), 1041408  }
  0x14   : > { %v7459_v20 = vld [vmem:[%s9218_s1 + $0x24] ss:$8 sps:$4 sm:$0xff] (!%p441_p9)   ;;  %v7461_v21 = vld [vmem:[%s9218_s1 + $0x20] ss:$8 sps:$4 sm:$0xff] (!%p441_p9)   ;;  %v7462_v22 = vld [vmem:[%s9218_s1 + $0x34] ss:$8 sps:$4 sm:$0xff] (!%p441_p9)  }
  0x15   : > { %v7464_v23 = vld [vmem:[%s9218_s1 + $0x30] ss:$8 sps:$4 sm:$0xff] (!%p441_p9)   ;;  %v745_v24 = vld [vmem:[%s9219_s2] sm:$0x3] (!%p441_p9)  ;;  %v7467_v27 = vld [vmem:[%s9218_s1 + $0x84] ss:$8 sps:$4 sm:$0xff] (!%p441_p9)  }
  0x16   : > { %7387 = vmatprep.subr.msk.bf16.mxu1 (!%p441_p9), %vm759_vm0, %v745_v24  ;;  %v761_v25 = vsel (!%p441_p9), %vm759_vm0, %v745_v24, 0  ;;  %v7465_v26 = vld [vmem:[%s9218_s1 + $0x80] ss:$8 sps:$4 sm:$0xff] (!%p441_p9)   ;;  %v7468_v28 = vld [vmem:[%s9218_s1 + $0x94] ss:$8 sps:$4 sm:$0xff] (!%p441_p9)   ;;  %vm746_vm1 = vcmask (!%p441_p9), 31744  }
  0x17   : > { %6686 = vmatpush3.bf16.msra.mxu1 (!%p441_p9), %v761_v25  ;;  %v7470_v29 = vld [vmem:[%s9218_s1 + $0x90] ss:$8 sps:$4 sm:$0xff] (!%p441_p9)   ;;  %v7474_v30 = vld [vmem:[%s9218_s1 + $0xa4] ss:$8 sps:$4 sm:$0xff] (!%p441_p9)   ;;  %v7476_v31 = vld [vmem:[%s9218_s1 + $0xa0] ss:$8 sps:$4 sm:$0xff] (!%p441_p9)  }
  0x18   : > { %v7480_v32 = vld [vmem:[%s9218_s1 + $0xb4] ss:$8 sps:$4 sm:$0xff] (!%p441_p9)   ;;  %v7482_v33 = vld [vmem:[%s9218_s1 + $0xb0] ss:$8 sps:$4 sm:$0xff] (!%p441_p9)   ;;  %v7488_v34 = vld [vmem:[%s9218_s1 + $0xc4] ss:$8 sps:$4 sm:$0xff] (!%p441_p9)  }
  0x19   : > { %v7486_v35 = vld [vmem:[%s9218_s1 + $0xc0] ss:$8 sps:$4 sm:$0xff] (!%p441_p9)   ;;  %v7492_v36 = vld [vmem:[%s9218_s1 + $0xd4] ss:$8 sps:$4 sm:$0xff] (!%p441_p9)   ;;  %v7494_v37 = vld [vmem:[%s9218_s1 + $0xd0] ss:$8 sps:$4 sm:$0xff] (!%p441_p9)  }
  0x1a   : > { %s488_s17 = scalar_select %p487_p10, %s7810_s22, 1  ;;  %v7495_v38 = vld [vmem:[%s9218_s1 + $0xe4] ss:$8 sps:$4 sm:$0xff]   ;;  %v7497_v39 = vld [vmem:[%s9218_s1 + $0xe0] ss:$8 sps:$4 sm:$0xff]   ;;  %vm7707_vm2 = vmmov 0  }
  0x1b   : > { %v7498_v40 = vld [vmem:[%s9218_s1 + $0xf4] ss:$8 sps:$4 sm:$0xff]   ;;  %v7500_v41 = vld [vmem:[%s9218_s1 + $0xf0] ss:$8 sps:$4 sm:$0xff]   ;;  %v7503_v42 = vld [vmem:[%s9218_s1 + $0x104] ss:$8 sps:$4 sm:$0xff]  }
  0x1c   : > { %s6114_s23 = sshll.u32 %s488_s17, 7  ;;  %v7501_v43 = vld [vmem:[%s9218_s1 + $0x100] ss:$8 sps:$4 sm:$0xff]   ;;  %v7504_v44 = vld [vmem:[%s9218_s1 + $0x114] ss:$8 sps:$4 sm:$0xff]   ;;  %vm2542_vm11 = vcmask 523264  }
  0x1d   : > { %s7845_s27 = scalar_lea.vmem %s9244_s0, %s6114_s23  ;;  %v7506_v45 = vld [vmem:[%s9218_s1 + $0x110] ss:$8 sps:$4 sm:$0xff]   ;;  %v7507_v46 = vld [vmem:[%s9218_s1 + $0x124] ss:$8 sps:$4 sm:$0xff]   ;;  %v7509_v47 = vld [vmem:[%s9218_s1 + $0x120] ss:$8 sps:$4 sm:$0xff]  }
  0x1e   : > { %v7848_v1 = vld [vmem:[%s7845_s27 + $0x40] sm:$0xff]   ;;  %v7855_v3 = vld [vmem:[%s7845_s27 + $0x48] sm:$0xff]   ;;  %v7863_v5 = vld [vmem:[%s7845_s27 + $0x50] sm:$0xff]   ;;  %vm2604_vm12 = vcmask 261120   ;;  %vm3594_vm15 = vcmask 130048   ;;  %s485_s26 = sand.u32 1, %s7696_s19  }
  0x1f   : > { %v7851_v2 = vld [vmem:[%s7845_s27] sm:$0xff]   ;;  %6115 = vmatprep.subr.bf16.mxu0 %v7848_v1  ;;  %v7859_v4 = vld [vmem:[%s7845_s27 + $0x8] sm:$0xff]   ;;  %v7867_v6 = vld [vmem:[%s7845_s27 + $0x10] sm:$0xff]   ;;  %6160 = vmatprep.subr.bf16.mxu1 %v7848_v1  ;;  %s6111_s16 = sshll.u32 %s7810_s22, 4  ;;  %s486_s0 = scalar_lea.vmem [#allocation2], %s485_s26 }
  0x20   : > { %6116 = vmatpush3.bf16.msra.mxu0 %v7851_v2  ;;  %v7871_v7 = vld [vmem:[%s7845_s27 + $0x58] sm:$0xff]   ;;  %v7879_v9 = vld [vmem:[%s7845_s27 + $0x60] sm:$0xff]   ;;  %v7886_v11 = vld [vmem:[%s7845_s27 + $0x68] sm:$0xff]   ;;  %s5603_s20 = sshll.u32 %s486_s0, 4  ;;  %s9175_s24 = scalar_lea.hbm %s9232_s15, %s6111_s16  ;;  %s9177_s20 = int_to_ptr.vmem [resolvable:$true] %s5603_s20 }
  0x21   : > { %6117 = vmatprep.subr.bf16.mxu0 %v7855_v3  ;;  %v7875_v8 = vld [vmem:[%s7845_s27 + $0x18] sm:$0xff]   ;;  %v7882_v10 = vld [vmem:[%s7845_s27 + $0x20] sm:$0xff]   ;;  %v7890_v12 = vld [vmem:[%s7845_s27 + $0x28] sm:$0xff]   ;;  %s5591_s22 = scalar_lea.sflag [#allocation3], %s485_s26  ;;  %s7642_s29 = scalar_lea.vmem %s9177_s20, 16 }
  0x22   : > { %v7893_v13 = vld [vmem:[%s7845_s27 + $0x70] sm:$0xff]   ;;  %v7901_v15 = vld [vmem:[%s7845_s27 + $0x78] sm:$0xff]   ;;  %p7643_p11 = scmp.ne.s32.totalorder %s9177_s20, %s7642_s29  ;;  %s7708_s25 = smov [#allocation2]  }
  0x23   : > { %v7898_v14 = vld [vmem:[%s7845_s27 + $0x30] sm:$0xff]   ;;  %v7906_v16 = vld [vmem:[%s7845_s27 + $0x38] sm:$0xff]  }
  0x24   : > { %6118 = vmatpush3.bf16.msra.mxu0 %v7859_v4  ;;  %v7510_v48 = vld [vmem:[%s9218_s1 + $0x134] ss:$8 sps:$4 sm:$0xff]   ;;  %v7512_v49 = vld [vmem:[%s9218_s1 + $0x130] ss:$8 sps:$4 sm:$0xff]   ;;  %p7644_p12 = pnand %p7643_p11, %p7827_p5 }
  0x25   : > { %6119 = vmatprep.subr.bf16.mxu0 %v7863_v5 }
  0x26   : > { %p7645_p13 = pneg %p7644_p12 }
  0x28   : > { %6120 = vmatpush3.bf16.msra.mxu0 %v7867_v6 }
  0x29   : > { %6121 = vmatprep.subr.bf16.mxu0 %v7871_v7 }
  0x2c   : > { %6122 = vmatpush3.bf16.msra.mxu0 %v7875_v8 }
  0x2d   : > { %6123 = vmatprep.subr.bf16.mxu0 %v7879_v9 }
  0x30   : > { %6124 = vmatpush3.bf16.msra.mxu0 %v7882_v10 }
  0x31   : > { %6125 = vmatprep.subr.bf16.mxu0 %v7886_v11 }
  0x34   : > { %6126 = vmatpush3.bf16.msra.mxu0 %v7890_v12 }
  0x35   : > { %6127 = vmatprep.subr.bf16.mxu0 %v7893_v13 }
  0x38   : > { %6128 = vmatpush3.bf16.msra.mxu0 %v7898_v14 }
  0x39   : > { %6129 = vmatprep.subr.bf16.mxu0 %v7901_v15 }
  0x3c   : > { %6130 = vmatpush3.bf16.msra.mxu0 %v7906_v16 }
  0x3d   : > { %6205 = vmatprep.subr.bf16.mxu0 %v7848_v1 }
  0x3f   : > { %709 = vmatmul.mubr.bf16.vlgmr.msra.gmra.mrb[0].mxu0 %v7453_v17 }
  0x40   : > { %716 = vmatprep.mubr.bf16.mxu0 %v7456_v18  ;;  %6206 = vmatpush3.bf16.msra.mxu0 %v7851_v2 }
  0x41   : > { %6207 = vmatprep.subr.bf16.mxu0 %v7855_v3 }
  0x44   : > { %6208 = vmatpush3.bf16.msra.mxu0 %v7859_v4 }
  0x45   : > { %6209 = vmatprep.subr.bf16.mxu0 %v7863_v5 }
  0x47   : > { %717 = vmatmul.mubr.bf16.gmra.mrb[4].mxu0 %v7458_v19 }
  0x48   : > { %724 = vmatprep.mubr.bf16.mxu0 %v7459_v20  ;;  %6210 = vmatpush3.bf16.msra.mxu0 %v7867_v6 }
  0x49   : > { %6211 = vmatprep.subr.bf16.mxu0 %v7871_v7 }
  0x4c   : > { %6212 = vmatpush3.bf16.msra.mxu0 %v7875_v8 }
  0x4d   : > { %6213 = vmatprep.subr.bf16.mxu0 %v7879_v9 }
  0x4f   : > { %725 = vmatmul.mubr.bf16.gmra.mrb[8].mxu0 %v7461_v21 }
  0x50   : > { %732 = vmatprep.mubr.bf16.mxu0 %v7462_v22  ;;  %6214 = vmatpush3.bf16.msra.mxu0 %v7882_v10 }
  0x51   : > { %6215 = vmatprep.subr.bf16.mxu0 %v7886_v11 }
  0x54   : > { %6216 = vmatpush3.bf16.msra.mxu0 %v7890_v12 }
  0x55   : > { %6217 = vmatprep.subr.bf16.mxu0 %v7893_v13 }
  0x57   : > { %733 = vmatmul.mubr.bf16.gmra.mrb[12].mxu0 %v7464_v23 }
  0x58   : > { %6218 = vmatpush3.bf16.msra.mxu0 %v7898_v14  ;;  %1125 = vmatprep.mubr.bf16.mxu0 %v7467_v27  ;;  %v7491_v27 = vld [vmem:[%s9218_s1 + $0x70] ss:$8 sps:$4 sm:$0xff]  }
  0x59   : > { %6219 = vmatprep.subr.bf16.mxu0 %v7901_v15 }
  0x5c   : > { %6220 = vmatpush3.bf16.msra.mxu0 %v7906_v16 }
  0x5d   : > { %6250 = vmatprep.subr.bf16.mxu0 %v7848_v1 }
  0x5f   : > { %1126 = vmatmul.mubr.bf16.vlgmr.msra.gmra.mrb[16].mxu0 %v7465_v26 }
  0x60   : > { %6251 = vmatpush3.bf16.msra.mxu0 %v7851_v2  ;;  %1133 = vmatprep.mubr.bf16.mxu0 %v7468_v28 }
  0x61   : > { %6252 = vmatprep.subr.bf16.mxu0 %v7855_v3 }
  0x64   : > { %6253 = vmatpush3.bf16.msra.mxu0 %v7859_v4 }
  0x65   : > { %6254 = vmatprep.subr.bf16.mxu0 %v7863_v5 }
  0x67   : > { %1134 = vmatmul.mubr.bf16.gmra.mrb[20].mxu0 %v7470_v29 }
  0x68   : > { %6255 = vmatpush3.bf16.msra.mxu0 %v7867_v6  ;;  %1141 = vmatprep.mubr.bf16.mxu0 %v7474_v30 }
  0x69   : > { %6256 = vmatprep.subr.bf16.mxu0 %v7871_v7 }
  0x6c   : > { %6257 = vmatpush3.bf16.msra.mxu0 %v7875_v8 }
  0x6d   : > { %6258 = vmatprep.subr.bf16.mxu0 %v7879_v9 }
  0x6f   : > { %1142 = vmatmul.mubr.bf16.gmra.mrb[24].mxu0 %v7476_v31 }
  0x70   : > { %6259 = vmatpush3.bf16.msra.mxu0 %v7882_v10  ;;  %1149 = vmatprep.mubr.bf16.mxu0 %v7480_v32 }
  0x71   : > { %6260 = vmatprep.subr.bf16.mxu0 %v7886_v11 }
  0x74   : > { %6261 = vmatpush3.bf16.msra.mxu0 %v7890_v12 }
  0x75   : > { %6262 = vmatprep.subr.bf16.mxu0 %v7893_v13 }
  0x77   : > { %1150 = vmatmul.mubr.bf16.gmra.mrb[28].mxu0 %v7482_v33 }
  0x78   : > { %6263 = vmatpush3.bf16.msra.mxu0 %v7898_v14  ;;  %1333 = vmatprep.mubr.bf16.mxu0 %v7488_v34 }
  0x79   : > { %6264 = vmatprep.subr.bf16.mxu0 %v7901_v15 }
  0x7c   : > { %6265 = vmatpush3.bf16.msra.mxu0 %v7906_v16 }
  0x7d   : > { %6295 = vmatprep.subr.bf16.mxu0 %v7848_v1 }
  0x7f   : > { %1334 = vmatmul.mubr.bf16.vlgmr.msra.gmra.mrb[32].mxu0 %v7486_v35 }
  0x80   : > { %6296 = vmatpush3.bf16.msra.mxu0 %v7851_v2  ;;  %1341 = vmatprep.mubr.bf16.mxu0 %v7492_v36 }
  0x81   : > { %6297 = vmatprep.subr.bf16.mxu0 %v7855_v3 }
  0x84   : > { %6298 = vmatpush3.bf16.msra.mxu0 %v7859_v4 }
  0x85   : > { %6299 = vmatprep.subr.bf16.mxu0 %v7863_v5 }
  0x87   : > { %1342 = vmatmul.mubr.bf16.gmra.mrb[36].mxu0 %v7494_v37 }
  0x88   : > { %6300 = vmatpush3.bf16.msra.mxu0 %v7867_v6  ;;  %1349 = vmatprep.mubr.bf16.mxu0 %v7495_v38 }
  0x89   : > { %6301 = vmatprep.subr.bf16.mxu0 %v7871_v7 }
  0x8c   : > { %6302 = vmatpush3.bf16.msra.mxu0 %v7875_v8 }
  0x8d   : > { %6303 = vmatprep.subr.bf16.mxu0 %v7879_v9 }
  0x8f   : > { %1350 = vmatmul.mubr.bf16.gmra.mrb[40].mxu0 %v7497_v39 }
  0x90   : > { %6304 = vmatpush3.bf16.msra.mxu0 %v7882_v10  ;;  %1357 = vmatprep.mubr.bf16.mxu0 %v7498_v40 }
  0x91   : > { %6305 = vmatprep.subr.bf16.mxu0 %v7886_v11 }
  0x94   : > { %6306 = vmatpush3.bf16.msra.mxu0 %v7890_v12 }
  0x95   : > { %6307 = vmatprep.subr.bf16.mxu0 %v7893_v13 }
  0x97   : > { %1358 = vmatmul.mubr.bf16.gmra.mrb[44].mxu0 %v7500_v41 }
  0x98   : > { %6308 = vmatpush3.bf16.msra.mxu0 %v7898_v14  ;;  %1541 = vmatprep.mubr.bf16.mxu0 %v7503_v42 }
  0x99   : > { %6309 = vmatprep.subr.bf16.mxu0 %v7901_v15 }
  0x9c   : > { %6310 = vmatpush3.bf16.msra.mxu0 %v7906_v16 }
  0x9d   : > { %6385 = vmatprep.subr.bf16.mxu0 %v7848_v1 }
  0x9f   : > { %1542 = vmatmul.mubr.bf16.vlgmr.msra.gmra.mrb[48].mxu0 %v7501_v43 }
  0xa0   : > { %1549 = vmatprep.mubr.bf16.mxu0 %v7504_v44  ;;  %6386 = vmatpush3.bf16.msra.mxu0 %v7851_v2 }
  0xa1   : > { %6387 = vmatprep.subr.bf16.mxu0 %v7855_v3 }
  0xa4   : > { %6388 = vmatpush3.bf16.msra.mxu0 %v7859_v4 }
  0xa5   : > { %6389 = vmatprep.subr.bf16.mxu0 %v7863_v5 }
  0xa7   : > { %1550 = vmatmul.mubr.bf16.gmra.mrb[52].mxu0 %v7506_v45 }
  0xa8   : > { %1557 = vmatprep.mubr.bf16.mxu0 %v7507_v46  ;;  %6390 = vmatpush3.bf16.msra.mxu0 %v7867_v6 }
  0xa9   : > { %6391 = vmatprep.subr.bf16.mxu0 %v7871_v7 }
  0xac   : > { %6392 = vmatpush3.bf16.msra.mxu0 %v7875_v8 }
  0xad   : > { %6393 = vmatprep.subr.bf16.mxu0 %v7879_v9 }
  0xaf   : > { %1558 = vmatmul.mubr.bf16.gmra.mrb[56].mxu0 %v7509_v47 }
  0xb0   : > { %1565 = vmatprep.mubr.bf16.mxu0 %v7510_v48  ;;  %6394 = vmatpush3.bf16.msra.mxu0 %v7882_v10 }
  0xb1   : > { %6395 = vmatprep.subr.bf16.mxu0 %v7886_v11 }
  0xb4   : > { %6396 = vmatpush3.bf16.msra.mxu0 %v7890_v12 }
  0xb5   : > { %6397 = vmatprep.subr.bf16.mxu0 %v7893_v13 }
  0xb7   : > { %1566 = vmatmul.mubr.bf16.gmra.mrb[60].mxu0 %v7512_v49 }
  0xb8   : > { %6398 = vmatpush3.bf16.msra.mxu0 %v7898_v14 }
  0xb9   : > { %6399 = vmatprep.subr.bf16.mxu0 %v7901_v15 }
  0xbc   : > { %6400 = vmatpush3.bf16.msra.mxu0 %v7906_v16 }
  0xbd   : > { %6430 = vmatprep.subr.bf16.mxu0 %v7848_v1 }
 0x112   : > { %v6131_v50 = vpop.f32.mrb[0].mxu0 }
 0x113   : > { %v6132_v51 = vpop.f32.mrb[1].mxu0 }
 0x114   : > { %v6133_v52 = vadd.f32 %v6132_v51, %v6131_v50  ;;  %v6134_v53 = vpop.f32.mrb[2].mxu0 }
 0x115   : > { %v6135_v54 = vpop.f32.mrb[3].mxu0 }
 0x116   : > { %v6136_v55 = vadd.f32 %v6135_v54, %v6134_v53 }
 0x118   : > { %v741_v56 = vpack.c.bf16 %v6136_v55, %v6133_v52 }
 0x11a   : > { %v6137_v57 = vpop.f32.mrb[4].mxu0  ;;  %6687 = vmatprep.mubr.msk.bf16.mxu1 %vm746_vm1, %v741_v56 }
 0x11b   : > { %v6138_v58 = vpop.f32.mrb[5].mxu0 }
 0x11c   : > { %v6139_v59 = vadd.f32 %v6138_v58, %v6137_v57  ;;  %v6140_v60 = vpop.f32.mrb[6].mxu0 }
 0x11d   : > { %v6141_v61 = vpop.f32.mrb[7].mxu0 }
 0x11e   : > { %v6142_v62 = vadd.f32 %v6141_v61, %v6140_v60 }
 0x120   : > { %v742_v63 = vpack.c.bf16 %v6142_v62, %v6139_v59 }
 0x122   : > { %6688 = vmatmul.mubr.msk.bf16.vlgmr.msra.gmra.mrb[0].mxu1 %vm746_vm1, %v742_v63  ;;  %v6143_v0 = vpop.f32.mrb[8].mxu0 }
 0x123   : > { %6161 = vmatpush3.bf16.msra.mxu1 %v7851_v2  ;;  %v6144_v17 = vpop.f32.mrb[9].mxu0 }
 0x124   : > { %6162 = vmatprep.subr.bf16.mxu1 %v7855_v3  ;;  %v6145_v1 = vadd.f32 %v6144_v17, %v6143_v0  ;;  %v6146_v18 = vpop.f32.mrb[10].mxu0 }
 0x125   : > { %v6147_v19 = vpop.f32.mrb[11].mxu0 }
 0x126   : > { %v6148_v20 = vadd.f32 %v6147_v19, %v6146_v18 }
 0x127   : > { %6163 = vmatpush3.bf16.msra.mxu1 %v7859_v4  ;;  %v7473_v4 = vld [vmem:[%s9218_s1 + $0x44] ss:$8 sps:$4 sm:$0xff]  }
 0x128   : > { %v743_v21 = vpack.c.bf16 %v6148_v20, %v6145_v1  ;;  %6164 = vmatprep.subr.bf16.mxu1 %v7863_v5  ;;  %v5709_v5 = vld [vmem:[%s9219_s2 + $0x2] sm:$0x3]  ;;  %v8156_v1 = vld [vmem:[%s9219_s2 + $0x4] sm:$0x3] }
 0x129   : > { %v969_v39 = vsel %vm759_vm0, %v5709_v5, 0 }
 0x12a   : > { %v6149_v22 = vpop.f32.mrb[12].mxu0  ;;  %6691 = vmatprep.mubr.msk.bf16.mxu1 %vm746_vm1, %v743_v21 }
 0x12b   : > { %6165 = vmatpush3.bf16.msra.mxu1 %v7867_v6  ;;  %v6150_v23 = vpop.f32.mrb[13].mxu0  ;;  %v7471_v6 = vld [vmem:[%s9218_s1 + $0x40] ss:$8 sps:$4 sm:$0xff]  }
 0x12c   : > { %6166 = vmatprep.subr.bf16.mxu1 %v7871_v7  ;;  %v6151_v2 = vadd.f32 %v6150_v23, %v6149_v22  ;;  %v6152_v24 = vpop.f32.mrb[14].mxu0  ;;  %v7477_v7 = vld [vmem:[%s9218_s1 + $0x54] ss:$8 sps:$4 sm:$0xff]  }
 0x12d   : > { %v6153_v3 = vpop.f32.mrb[15].mxu0 }
 0x12e   : > { %v6154_v25 = vadd.f32 %v6153_v3, %v6152_v24 }
 0x12f   : > { %6167 = vmatpush3.bf16.msra.mxu1 %v7875_v8  ;;  %v7479_v8 = vld [vmem:[%s9218_s1 + $0x50] ss:$8 sps:$4 sm:$0xff]  }
 0x130   : > { %v744_v26 = vpack.c.bf16 %v6154_v25, %v6151_v2  ;;  %6168 = vmatprep.subr.bf16.mxu1 %v7879_v9  ;;  %v7483_v9 = vld [vmem:[%s9218_s1 + $0x64] ss:$8 sps:$4 sm:$0xff]  }
 0x132   : > { %6692 = vmatmul.mubr.msk.bf16.gmra.mrb[4].mxu1 %vm746_vm1, %v744_v26  ;;  %v6221_v28 = vpop.f32.mrb[16].mxu0 }
 0x133   : > { %6169 = vmatpush3.bf16.msra.mxu1 %v7882_v10  ;;  %917 = vmatprep.mubr.bf16.mxu1 %v7473_v4  ;;  %v7485_v10 = vld [vmem:[%s9218_s1 + $0x60] ss:$8 sps:$4 sm:$0xff]   ;;  %v6222_v29 = vpop.f32.mrb[17].mxu0 }
 0x134   : > { %6170 = vmatprep.subr.bf16.mxu1 %v7886_v11  ;;  %v7489_v11 = vld [vmem:[%s9218_s1 + $0x74] ss:$8 sps:$4 sm:$0xff]   ;;  %v8122_v30 = vadd.f32 %v6222_v29, %v6221_v28  ;;  %v6224_v31 = vpop.f32.mrb[18].mxu0 }
 0x135   : > { %v6225_v32 = vpop.f32.mrb[19].mxu0 }
 0x136   : > { %v8124_v33 = vadd.f32 %v6225_v32, %v6224_v31 }
 0x137   : > { %6171 = vmatpush3.bf16.msra.mxu1 %v7890_v12 }
 0x138   : > { %6172 = vmatprep.subr.bf16.mxu1 %v7893_v13  ;;  %v1158_v34 = vpack.c.bf16 %v8124_v33, %v8122_v30  ;;  %v7560_v30 = vld [vmem:[%s9218_s1 + $0x230] ss:$8 sps:$4 sm:$0xff]  }
 0x13a   : > { %v6227_v35 = vpop.f32.mrb[20].mxu0 }
 0x13b   : > { %6173 = vmatpush3.bf16.msra.mxu1 %v7898_v14  ;;  %v6228_v36 = vpop.f32.mrb[21].mxu0 }
 0x13c   : > { %6174 = vmatprep.subr.bf16.mxu1 %v7901_v15  ;;  %v8128_v37 = vadd.f32 %v6228_v36, %v6227_v35  ;;  %v6230_v38 = vpop.f32.mrb[22].mxu0 }
 0x13d   : > { %v6231_v40 = vpop.f32.mrb[23].mxu0 }
 0x13e   : > { %v8131_v41 = vadd.f32 %v6231_v40, %v6230_v38 }
 0x13f   : > { %6175 = vmatpush3.bf16.msra.mxu1 %v7906_v16 }
 0x140   : > { %7388 = vmatprep.subr.msk.bf16.mxu1 %vm759_vm0, %v5709_v5  ;;  %v1159_v42 = vpack.c.bf16 %v8131_v41, %v8128_v37 }
 0x142   : > { %918 = vmatmul.mubr.bf16.vlgmr.msra.gmra.mrb[8].mxu1 %v7471_v6  ;;  %v6233_v43 = vpop.f32.mrb[24].mxu0 }
 0x143   : > { %925 = vmatprep.mubr.bf16.mxu1 %v7477_v7  ;;  %6696 = vmatpush3.bf16.msra.mxu1 %v969_v39  ;;  %v6234_v44 = vpop.f32.mrb[25].mxu0 }
 0x144   : > { %v8135_v45 = vadd.f32 %v6234_v44, %v6233_v43  ;;  %v6236_v46 = vpop.f32.mrb[26].mxu0  ;;  %7389 = vmatprep.subr.msk.bf16.mxu1 %vm759_vm0, %v8156_v1 }
 0x145   : > { %v6237_v47 = vpop.f32.mrb[27].mxu0 }
 0x146   : > { %v8137_v48 = vadd.f32 %v6237_v47, %v6236_v46 }
 0x148   : > { %v1160_v49 = vpack.c.bf16 %v8137_v48, %v8135_v45  ;;  %v5793_v48 = vld [vmem:[%s9219_s2 + $0xa] sm:$0x3] }
 0x14a   : > { %926 = vmatmul.mubr.bf16.gmra.mrb[12].mxu1 %v7479_v8  ;;  %v6239_v50 = vpop.f32.mrb[28].mxu0 }
 0x14b   : > { %933 = vmatprep.mubr.bf16.mxu1 %v7483_v9  ;;  %v6240_v51 = vpop.f32.mrb[29].mxu0 }
 0x14c   : > { %v8141_v52 = vadd.f32 %v6240_v51, %v6239_v50  ;;  %v6242_v53 = vpop.f32.mrb[30].mxu0 }
 0x14d   : > { %v6243_v54 = vpop.f32.mrb[31].mxu0 }
 0x14e   : > { %v8143_v55 = vadd.f32 %v6243_v54, %v6242_v53 }
 0x150   : > { %v1161_v56 = vpack.c.bf16 %v8143_v55, %v8141_v52  ;;  %v7525_v52 = vld [vmem:[%s9218_s1 + $0x154] ss:$8 sps:$4 sm:$0xff]   ;;  %v7529_v55 = vld [vmem:[%s9218_s1 + $0x150] ss:$8 sps:$4 sm:$0xff]  }
 0x152   : > { %934 = vmatmul.mubr.bf16.gmra.mrb[16].mxu1 %v7485_v10  ;;  %v6266_v57 = vpop.f32.mrb[32].mxu0 }
 0x153   : > { %941 = vmatprep.mubr.bf16.mxu1 %v7489_v11  ;;  %v6267_v58 = vpop.f32.mrb[33].mxu0 }
 0x154   : > { %v8147_v59 = vadd.f32 %v6267_v58, %v6266_v57  ;;  %v6269_v60 = vpop.f32.mrb[34].mxu0 }
 0x155   : > { %v6270_v61 = vpop.f32.mrb[35].mxu0 }
 0x156   : > { %v8149_v62 = vadd.f32 %v6270_v61, %v6269_v60  ;;  %v7555_v60 = vld [vmem:[%s9218_s1 + $0x224] ss:$8 sps:$4 sm:$0xff]  }
 0x158   : > { %v1366_v63 = vpack.c.bf16 %v8149_v62, %v8147_v59  ;;  %v7536_v59 = vld [vmem:[%s9218_s1 + $0x160] ss:$8 sps:$4 sm:$0xff]   ;;  %v7537_v62 = vld [vmem:[%s9218_s1 + $0x174] ss:$8 sps:$4 sm:$0xff]  }
 0x15a   : > { %942 = vmatmul.mubr.bf16.gmra.mrb[20].mxu1 %v7491_v27  ;;  %v6272_v0 = vpop.f32.mrb[36].mxu0 }
 0x15b   : > { %v6273_v17 = vpop.f32.mrb[37].mxu0 }
 0x15c   : > { %v8158_v18 = vadd.f32 %v6273_v17, %v6272_v0  ;;  %v6275_v19 = vpop.f32.mrb[38].mxu0  ;;  %v7515_v0 = vld [vmem:[%s9218_s1 + $0x184] ss:$8 sps:$4 sm:$0xff]   ;;  %v7513_v17 = vld [vmem:[%s9218_s1 + $0x180] ss:$8 sps:$4 sm:$0xff]  }
 0x15d   : > { %v6276_v20 = vpop.f32.mrb[39].mxu0  ;;  %1957 = vmatprep.mubr.bf16.mxu0 %v7515_v0  ;;  %v8278_v0 = vld [vmem:[%s7845_s27 + $0x40] sm:$0xff]  }
 0x15e   : > { %v8162_v21 = vadd.f32 %v6276_v20, %v6275_v19  ;;  %1958 = vmatmul.mubr.bf16.vlgmr.msra.gmra.mrb[64].mxu0 %v7513_v17 }
 0x160   : > { %v1367_v22 = vpack.c.bf16 %v8162_v21, %v8158_v18 }
 0x162   : > { %v6278_v23 = vpop.f32.mrb[40].mxu0 }
 0x163   : > { %v6279_v2 = vpop.f32.mrb[41].mxu0 }
 0x164   : > { %v8166_v24 = vadd.f32 %v6279_v2, %v6278_v23  ;;  %v6281_v3 = vpop.f32.mrb[42].mxu0  ;;  %v8205_v2 = vld [vmem:[%s7845_s27] sm:$0xff]  }
 0x165   : > { %v6282_v25 = vpop.f32.mrb[43].mxu0  ;;  %6431 = vmatpush3.bf16.msra.mxu0 %v8205_v2 }
 0x166   : > { %v8168_v4 = vadd.f32 %v6282_v25, %v6281_v3  ;;  %v8209_v25 = vld [vmem:[%s7845_s27 + $0x48] sm:$0xff]  }
 0x167   : > { %6432 = vmatprep.subr.bf16.mxu0 %v8209_v25 }
 0x168   : > { %v1368_v26 = vpack.c.bf16 %v8168_v4, %v8166_v24 }
 0x16a   : > { %v6284_v5 = vpop.f32.mrb[44].mxu0 }
 0x16b   : > { %v6285_v6 = vpop.f32.mrb[45].mxu0 }
 0x16c   : > { %v8172_v7 = vadd.f32 %v6285_v6, %v6284_v5  ;;  %v6287_v8 = vpop.f32.mrb[46].mxu0 }
 0x16d   : > { %v6288_v9 = vpop.f32.mrb[47].mxu0 }
 0x16e   : > { %v8174_v10 = vadd.f32 %v6288_v9, %v6287_v8  ;;  %v8217_v8 = vld [vmem:[%s7845_s27 + $0x8] sm:$0xff]   ;;  %v7516_v9 = vld [vmem:[%s9218_s1 + $0x194] ss:$8 sps:$4 sm:$0xff]  }
 0x16f   : > { %6433 = vmatpush3.bf16.msra.mxu0 %v8217_v8  ;;  %1965 = vmatprep.mubr.bf16.mxu0 %v7516_v9  ;;  %v7546_v9 = vld [vmem:[%s9218_s1 + $0x1f4] ss:$8 sps:$4 sm:$0xff]  }
 0x170   : > { %v1369_v11 = vpack.c.bf16 %v8174_v10, %v8172_v7 }
 0x172   : > { %v6311_v27 = vpop.f32.mrb[48].mxu0 }
 0x173   : > { %v6312_v28 = vpop.f32.mrb[49].mxu0 }
 0x174   : > { %v8178_v29 = vadd.f32 %v6312_v28, %v6311_v27  ;;  %v6314_v31 = vpop.f32.mrb[50].mxu0  ;;  %v7518_v27 = vld [vmem:[%s9218_s1 + $0x190] ss:$8 sps:$4 sm:$0xff]  }
 0x175   : > { %v6315_v32 = vpop.f32.mrb[51].mxu0  ;;  %v8227_v28 = vld [vmem:[%s7845_s27 + $0x50] sm:$0xff]   ;;  %1966 = vmatmul.mubr.bf16.gmra.mrb[68].mxu0 %v7518_v27 }
 0x176   : > { %v8180_v35 = vadd.f32 %v6315_v32, %v6314_v31  ;;  %6434 = vmatprep.subr.bf16.mxu0 %v8227_v28  ;;  %v8231_v31 = vld [vmem:[%s7845_s27 + $0x10] sm:$0xff]   ;;  %v8235_v32 = vld [vmem:[%s7845_s27 + $0x58] sm:$0xff]  }
 0x177   : > { %6435 = vmatpush3.bf16.msra.mxu0 %v8231_v31 }
 0x178   : > { %6436 = vmatprep.subr.bf16.mxu0 %v8235_v32 }
 0x17a   : > { %v6317_v38 = vpop.f32.mrb[52].mxu0 }
 0x17b   : > { %v6318_v39 = vpop.f32.mrb[53].mxu0 }
 0x17c   : > { %v8184_v40 = vadd.f32 %v6318_v39, %v6317_v38  ;;  %v6320_v43 = vpop.f32.mrb[54].mxu0  ;;  %v8239_v38 = vld [vmem:[%s7845_s27 + $0x18] sm:$0xff]   ;;  %v7522_v39 = vld [vmem:[%s9218_s1 + $0x1a4] ss:$8 sps:$4 sm:$0xff]  }
 0x17d   : > { %v6321_v44 = vpop.f32.mrb[55].mxu0  ;;  %6437 = vmatpush3.bf16.msra.mxu0 %v8239_v38  ;;  %1973 = vmatprep.mubr.bf16.mxu0 %v7522_v39 }
 0x17e   : > { %v8186_v46 = vadd.f32 %v6321_v44, %v6320_v43  ;;  %v7524_v43 = vld [vmem:[%s9218_s1 + $0x1a0] ss:$8 sps:$4 sm:$0xff]  }
 0x17f   : > { %v8249_v44 = vld [vmem:[%s7845_s27 + $0x60] sm:$0xff]   ;;  %1974 = vmatmul.mubr.bf16.gmra.mrb[72].mxu0 %v7524_v43 }
 0x180   : > { %6438 = vmatprep.subr.bf16.mxu0 %v8249_v44  ;;  %v9246_v37 = vpack.c.bf16 %v8186_v46, %v8184_v40 }
 0x182   : > { %v6323_v50 = vpop.f32.mrb[56].mxu0 }
 0x183   : > { %v6324_v51 = vpop.f32.mrb[57].mxu0 }
 0x184   : > { %v8190_v53 = vadd.f32 %v6324_v51, %v6323_v50  ;;  %v6326_v54 = vpop.f32.mrb[58].mxu0  ;;  %v8253_v50 = vld [vmem:[%s7845_s27 + $0x20] sm:$0xff]   ;;  %v8257_v51 = vld [vmem:[%s7845_s27 + $0x68] sm:$0xff]  }
 0x185   : > { %v6327_v57 = vpop.f32.mrb[59].mxu0  ;;  %6439 = vmatpush3.bf16.msra.mxu0 %v8253_v50 }
 0x186   : > { %v8192_v58 = vadd.f32 %v6327_v57, %v6326_v54  ;;  %6440 = vmatprep.subr.bf16.mxu0 %v8257_v51  ;;  %v7527_v54 = vld [vmem:[%s9218_s1 + $0x1b4] ss:$8 sps:$4 sm:$0xff]   ;;  %v7530_v57 = vld [vmem:[%s9218_s1 + $0x1b0] ss:$8 sps:$4 sm:$0xff]  }
 0x187   : > { %1981 = vmatprep.mubr.bf16.mxu0 %v7527_v54 }
 0x188   : > { %1982 = vmatmul.mubr.bf16.gmra.mrb[76].mxu0 %v7530_v57  ;;  %v9247_v41 = vpack.c.bf16 %v8192_v58, %v8190_v53 }
 0x189   : > { %6441 = vmatpush3.bf16.msra.mxu0 %v7890_v12  ;;  %v7535_v12 = vld [vmem:[%s9218_s1 + $0x1c4] ss:$8 sps:$4 sm:$0xff]  }
 0x18a   : > { %v6329_v61 = vpop.f32.mrb[60].mxu0  ;;  %6442 = vmatprep.subr.bf16.mxu0 %v7893_v13  ;;  %2165 = vmatprep.mubr.bf16.mxu0 %v7535_v12  ;;  %v7539_v13 = vld [vmem:[%s9218_s1 + $0x1d4] ss:$8 sps:$4 sm:$0xff]  }
 0x18b   : > { %v6330_v19 = vpop.f32.mrb[61].mxu0 }
 0x18c   : > { %v8202_v20 = vadd.f32 %v6330_v19, %v6329_v61  ;;  %v6332_v23 = vpop.f32.mrb[62].mxu0  ;;  %v7533_v61 = vld [vmem:[%s9218_s1 + $0x1c0] ss:$8 sps:$4 sm:$0xff]  }
 0x18d   : > { %v6333_v3 = vpop.f32.mrb[63].mxu0  ;;  %6443 = vmatpush3.bf16.msra.mxu0 %v7898_v14  ;;  %v7542_v14 = vld [vmem:[%s9218_s1 + $0x1d0] ss:$8 sps:$4 sm:$0xff]   ;;  %v7545_v19 = vld [vmem:[%s9218_s1 + $0x1e0] ss:$8 sps:$4 sm:$0xff]  }
 0x18e   : > { %v8212_v5 = vadd.f32 %v6333_v3, %v6332_v23  ;;  %6444 = vmatprep.subr.bf16.mxu0 %v7901_v15 }
 0x190   : > { %v9248_v45 = vpack.c.bf16 %v8212_v5, %v8202_v20 }
 0x191   : > { %6445 = vmatpush3.bf16.msra.mxu0 %v7906_v16  ;;  %v7543_v16 = vld [vmem:[%s9218_s1 + $0x1e4] ss:$8 sps:$4 sm:$0xff]  }
 0x192   : > { %6475 = vmatprep.subr.bf16.mxu0 %v8278_v0 }
 0x194   : > { %2166 = vmatmul.mubr.bf16.vlgmr.msra.gmra.mrb[80].mxu0 %v7533_v61  ;;  %v7548_v61 = vld [vmem:[%s9218_s1 + $0x1f0] ss:$8 sps:$4 sm:$0xff]  }
 0x195   : > { %6476 = vmatpush3.bf16.msra.mxu0 %v8205_v2  ;;  %2173 = vmatprep.mubr.bf16.mxu0 %v7539_v13 }
 0x196   : > { %6477 = vmatprep.subr.bf16.mxu0 %v8209_v25 }
 0x199   : > { %6478 = vmatpush3.bf16.msra.mxu0 %v8217_v8 }
 0x19a   : > { %6479 = vmatprep.subr.bf16.mxu0 %v8227_v28 }
 0x19c   : > { %2174 = vmatmul.mubr.bf16.gmra.mrb[84].mxu0 %v7542_v14  ;;  %v8311_v14 = vld [vmem:[%s7845_s27 + $0x28] sm:$0xff]  }
 0x19d   : > { %6480 = vmatpush3.bf16.msra.mxu0 %v8231_v31  ;;  %2181 = vmatprep.mubr.bf16.mxu0 %v7543_v16 }
 0x19e   : > { %6481 = vmatprep.subr.bf16.mxu0 %v8235_v32 }
 0x1a1   : > { %6482 = vmatpush3.bf16.msra.mxu0 %v8239_v38 }
 0x1a2   : > { %6483 = vmatprep.subr.bf16.mxu0 %v8249_v44 }
 0x1a4   : > { %2182 = vmatmul.mubr.bf16.gmra.mrb[88].mxu0 %v7545_v19 }
 0x1a5   : > { %6484 = vmatpush3.bf16.msra.mxu0 %v8253_v50  ;;  %2189 = vmatprep.mubr.bf16.mxu0 %v7546_v9  ;;  %v8324_v9 = vld [vmem:[%s7845_s27 + $0x30] sm:$0xff]  }
 0x1a6   : > { %6485 = vmatprep.subr.bf16.mxu0 %v8257_v51 }
 0x1a9   : > { %6486 = vmatpush3.bf16.msra.mxu0 %v8311_v14 }
 0x1ac   : > { %2190 = vmatmul.mubr.bf16.gmra.mrb[92].mxu0 %v7548_v61 }
 0x215   : > { %v6176_v15 = vpop.f32.mrb[8].mxu1 }
 0x216   : > { %v6177_v17 = vpop.f32.mrb[9].mxu1 }
 0x217   : > { %v6178_v23 = vadd.f32 %v6177_v17, %v6176_v15  ;;  %v6179_v3 = vpop.f32.mrb[10].mxu1  ;;  %v7551_v15 = vld [vmem:[%s9218_s1 + $0x204] ss:$8 sps:$4 sm:$0xff]   ;;  %v8318_v17 = vld [vmem:[%s7845_s27 + $0x70] sm:$0xff]  }
 0x218   : > { %v6180_v27 = vpop.f32.mrb[11].mxu1  ;;  %6487 = vmatprep.subr.bf16.mxu0 %v8318_v17  ;;  %2373 = vmatprep.mubr.bf16.mxu0 %v7551_v15 }
 0x219   : > { %v6181_v39 = vadd.f32 %v6180_v27, %v6179_v3  ;;  %v1177_v3 = vsel %vm759_vm0, %v8156_v1, 0  ;;  %6488 = vmatpush3.bf16.msra.mxu0 %v8324_v9  ;;  %v5751_v27 = vld [vmem:[%s9219_s2 + $0x6] sm:$0x3]  ;;  %v7549_v1 = vld [vmem:[%s9218_s1 + $0x200] ss:$8 sps:$4 sm:$0xff]  }
 0x21b   : > { %v950_v43 = vpack.c.bf16 %v6181_v39, %v6178_v23  ;;  %v8331_v39 = vld [vmem:[%s7845_s27 + $0x78] sm:$0xff]  }
 0x21c   : > { %6489 = vmatprep.subr.bf16.mxu0 %v8331_v39 }
 0x21d   : > { %v6182_v54 = vpop.f32.mrb[12].mxu1  ;;  %6697 = vmatprep.mubr.msk.bf16.mxu1 %vm746_vm1, %v950_v43 }
 0x21e   : > { %v6183_v57 = vpop.f32.mrb[13].mxu1 }
 0x21f   : > { %v6184_v12 = vadd.f32 %v6183_v57, %v6182_v54  ;;  %v6185_v13 = vpop.f32.mrb[14].mxu1 }
 0x220   : > { %v6186_v16 = vpop.f32.mrb[15].mxu1 }
 0x221   : > { %v6187_v19 = vadd.f32 %v6186_v16, %v6185_v13  ;;  %v7552_v13 = vld [vmem:[%s9218_s1 + $0x214] ss:$8 sps:$4 sm:$0xff]  }
 0x223   : > { %v951_v23 = vpack.c.bf16 %v6187_v19, %v6184_v12  ;;  %v8340_v12 = vld [vmem:[%s7845_s27 + $0x38] sm:$0xff]   ;;  %s7646_s27 = sshll.u32 %s7708_s25, 4  ;;  %s7647_s27 = int_to_ptr.vmem [resolvable:$false] %s7646_s27 }
 0x224   : > { %6490 = vmatpush3.bf16.msra.mxu0 %v8340_v12  ;;  %s7648_s30 = scalar_lea.vmem %s7647_s27, 32  ;;  %p7649_p0 = scmp.lt.s32.totalorder %s9177_s20, %s7647_s27 }
 0x225   : > { %v6188_v43 = vpop.f32.mrb[16].mxu1  ;;  %6698 = vmatmul.mubr.msk.bf16.vlgmr.msra.gmra.mrb[0].mxu1 %vm746_vm1, %v951_v23  ;;  %p7650_p1 = scmp.lt.s32.totalorder %s7648_s30, %s7642_s29 }
 0x226   : > { %v6189_v54 = vpop.f32.mrb[17].mxu1  ;;  %6706 = vmatpush3.bf16.msra.mxu1 %v1177_v3 }
 0x227   : > { %v6190_v57 = vadd.f32 %v6189_v54, %v6188_v43  ;;  %v6191_v61 = vpop.f32.mrb[18].mxu1  ;;  %7390 = vmatprep.subr.msk.bf16.mxu1 %vm759_vm0, %v5751_v27  ;;  %2374 = vmatmul.mubr.bf16.vlgmr.msra.gmra.mrb[96].mxu0 %v7549_v1  ;;  %v7554_v43 = vld [vmem:[%s9218_s1 + $0x210] ss:$8 sps:$4 sm:$0xff]   ;;  %p7651_p2 = por %p7650_p1, %p7649_p0 }
 0x228   : > { %v6192_v15 = vpop.f32.mrb[19].mxu1  ;;  %2381 = vmatprep.mubr.bf16.mxu0 %v7552_v13 }
 0x229   : > { %v6193_v16 = vadd.f32 %v6192_v15, %v6191_v61  ;;  %v7558_v61 = vld [vmem:[%s9218_s1 + $0x234] ss:$8 sps:$4 sm:$0xff]   ;;  %p7652_p3 = pnand %p7651_p2, %p7645_p13 }
 0x22b   : > { %v952_v19 = vpack.c.bf16 %v6193_v16, %v6190_v57  ;;  %v7557_v57 = vld [vmem:[%s9218_s1 + $0x220] ss:$8 sps:$4 sm:$0xff]  }
 0x22d   : > { %v6194_v23 = vpop.f32.mrb[20].mxu1  ;;  %6701 = vmatprep.mubr.msk.bf16.mxu1 %vm746_vm1, %v952_v19 }
 0x22e   : > { %v6195_v3 = vpop.f32.mrb[21].mxu1 }
 0x22f   : > { %v6196_v54 = vadd.f32 %v6195_v3, %v6194_v23  ;;  %v6197_v6 = vpop.f32.mrb[22].mxu1  ;;  %2382 = vmatmul.mubr.bf16.gmra.mrb[100].mxu0 %v7554_v43 }
 0x230   : > { %v6198_v47 = vpop.f32.mrb[23].mxu1  ;;  %2389 = vmatprep.mubr.bf16.mxu0 %v7555_v60 }
 0x231   : > { %v6199_v36 = vadd.f32 %v6198_v47, %v6197_v6  ;;  %v1385_v47 = vsel %vm759_vm0, %v5751_v27, 0  ;;  %v6401_v18 = vpop.f32.mrb[64].mxu0 }
 0x232   : > { %v6402_v21 = vpop.f32.mrb[65].mxu0 }
 0x233   : > { %v953_v1 = vpack.c.bf16 %v6199_v36, %v6196_v54  ;;  %v5772_v36 = vld [vmem:[%s9219_s2 + $0x8] sm:$0x3]  ;;  %v6404_v24 = vpop.f32.mrb[66].mxu0 }
 0x234   : > { %v1593_v33 = vsel %vm759_vm0, %v5772_v36, 0  ;;  %v6405_v4 = vpop.f32.mrb[67].mxu0 }
 0x235   : > { %6702 = vmatmul.mubr.msk.bf16.gmra.mrb[4].mxu1 %vm746_vm1, %v953_v1  ;;  %v5814_v1 = vld [vmem:[%s9219_s2 + $0xc] sm:$0x3] }
 0x236   : > { %6707 = vmatprep.mubr.msk.bf16.mxu1 %vm746_vm1, %v1158_v34  ;;  %v9245_v34 = vpack.c.bf16 %v8180_v35, %v8178_v29 }
 0x237   : > { %2390 = vmatmul.mubr.bf16.gmra.mrb[104].mxu0 %v7557_v57 }
 0x238   : > { %2397 = vmatprep.mubr.bf16.mxu0 %v7558_v61 }
 0x23d   : > { %6708 = vmatmul.mubr.msk.bf16.vlgmr.msra.gmra.mrb[0].mxu1 %vm746_vm1, %v1159_v42  ;;  %v7521_v42 = vld [vmem:[%s9218_s1 + $0x144] ss:$8 sps:$4 sm:$0xff]  }
 0x23e   : > { %6711 = vmatprep.mubr.msk.bf16.mxu1 %vm746_vm1, %v1160_v49  ;;  %6716 = vmatpush3.bf16.msra.mxu1 %v1385_v47  ;;  %v7519_v49 = vld [vmem:[%s9218_s1 + $0x140] ss:$8 sps:$4 sm:$0xff]  }
 0x23f   : > { %7391 = vmatprep.subr.msk.bf16.mxu1 %vm759_vm0, %v5772_v36  ;;  %2398 = vmatmul.mubr.bf16.gmra.mrb[108].mxu0 %v7560_v30 }
 0x245   : > { %6712 = vmatmul.mubr.msk.bf16.gmra.mrb[4].mxu1 %vm746_vm1, %v1161_v56  ;;  %v7531_v56 = vld [vmem:[%s9218_s1 + $0x164] ss:$8 sps:$4 sm:$0xff]  }
 0x246   : > { %6717 = vmatprep.mubr.msk.bf16.mxu1 %vm746_vm1, %v1366_v63  ;;  %v7541_v63 = vld [vmem:[%s9218_s1 + $0x170] ss:$8 sps:$4 sm:$0xff]  }
 0x248   : > { %v6407_v10 = vpop.f32.mrb[68].mxu0 }
 0x24d   : > { %6718 = vmatmul.mubr.msk.bf16.vlgmr.msra.gmra.mrb[0].mxu1 %vm746_vm1, %v1367_v22  ;;  %v8461_v22 = vadd.f32 %v6402_v21, %v6401_v18 }
 0x24e   : > { %6721 = vmatprep.mubr.msk.bf16.mxu1 %vm746_vm1, %v1368_v26  ;;  %6726 = vmatpush3.bf16.msra.mxu1 %v1593_v33  ;;  %v8463_v26 = vadd.f32 %v6405_v4, %v6404_v24 }
 0x24f   : > { %6340 = vmatprep.subr.bf16.mxu1 %v8278_v0 }
 0x250   : > { %v1990_v7 = vpack.c.bf16 %v8463_v26, %v8461_v22  ;;  %v7706_v26 = vmov 0.0  }
 0x251   : > { %6795 = vmatprep.subr.bf16.mxu0 %v7706_v26  ;;  %6803 = vmatprep.mubr.msk.bf16.mxu0 %vm7707_vm2, %v7706_v26 }
 0x255   : > { %6722 = vmatmul.mubr.msk.bf16.gmra.mrb[4].mxu1 %vm746_vm1, %v1369_v11  ;;  %v6408_v11 = vpop.f32.mrb[69].mxu0 }
 0x256   : > { %6727 = vmatprep.mubr.msk.bf16.mxu1 %vm746_vm1, %v9245_v34  ;;  %v8467_v29 = vadd.f32 %v6408_v11, %v6407_v10  ;;  %v6410_v35 = vpop.f32.mrb[70].mxu0 }
 0x257   : > { %v6411_v40 = vpop.f32.mrb[71].mxu0 }
 0x258   : > { %v8469_v46 = vadd.f32 %v6411_v40, %v6410_v35  ;;  %v6413_v58 = vpop.f32.mrb[72].mxu0 }
 0x259   : > { %v6414_v60 = vpop.f32.mrb[73].mxu0 }
 0x25a   : > { %v1991_v53 = vpack.c.bf16 %v8469_v46, %v8467_v29  ;;  %v6416_v20 = vpop.f32.mrb[74].mxu0  ;;  %v8474_v5 = vadd.f32 %v6414_v60, %v6413_v58 }
 0x25d   : > { %6728 = vmatmul.mubr.msk.bf16.vlgmr.msra.gmra.mrb[0].mxu1 %vm746_vm1, %v9246_v37 }
 0x25e   : > { %6341 = vmatpush3.bf16.msra.mxu1 %v8205_v2  ;;  %6731 = vmatprep.mubr.msk.bf16.mxu1 %vm746_vm1, %v9247_v41  ;;  %v1801_v2 = vsel %vm759_vm0, %v5793_v48, 0 }
 0x25f   : > { %6342 = vmatprep.subr.bf16.mxu1 %v8209_v25  ;;  %v6417_v25 = vpop.f32.mrb[75].mxu0 }
 0x260   : > { %v8476_v6 = vadd.f32 %v6417_v25, %v6416_v20 }
 0x262   : > { %6343 = vmatpush3.bf16.msra.mxu1 %v8217_v8  ;;  %v1992_v8 = vpack.c.bf16 %v8476_v6, %v8474_v5 }
 0x263   : > { %6344 = vmatprep.subr.bf16.mxu1 %v8227_v28  ;;  %v6419_v28 = vpop.f32.mrb[76].mxu0 }
 0x265   : > { %6732 = vmatmul.mubr.msk.bf16.gmra.mrb[4].mxu1 %vm746_vm1, %v9248_v45 }
 0x266   : > { %6345 = vmatpush3.bf16.msra.mxu1 %v8231_v31  ;;  %1749 = vmatprep.mubr.bf16.mxu1 %v7521_v42  ;;  %v6420_v31 = vpop.f32.mrb[77].mxu0 }
 0x267   : > { %6346 = vmatprep.subr.bf16.mxu1 %v8235_v32  ;;  %v6422_v32 = vpop.f32.mrb[78].mxu0 }
 0x26a   : > { %6347 = vmatpush3.bf16.msra.mxu1 %v8239_v38  ;;  %v6423_v38 = vpop.f32.mrb[79].mxu0 }
 0x26b   : > { %6348 = vmatprep.subr.bf16.mxu1 %v8249_v44  ;;  %v8480_v44 = vadd.f32 %v6420_v31, %v6419_v28  ;;  %v6446_v0 = vpop.f32.mrb[80].mxu0 }
 0x26e   : > { %6349 = vmatpush3.bf16.msra.mxu1 %v8253_v50  ;;  %v8482_v50 = vadd.f32 %v6423_v38, %v6422_v32 }
 0x26f   : > { %6350 = vmatprep.subr.bf16.mxu1 %v8257_v51 }
 0x270   : > { %v1993_v51 = vpack.c.bf16 %v8482_v50, %v8480_v44 }
 0x272   : > { %6351 = vmatpush3.bf16.msra.mxu1 %v8311_v14  ;;  %v6447_v14 = vpop.f32.mrb[81].mxu0 }
 0x273   : > { %6352 = vmatprep.subr.bf16.mxu1 %v8318_v17  ;;  %v6449_v17 = vpop.f32.mrb[82].mxu0  ;;  %v8486_v27 = vadd.f32 %v6447_v14, %v6446_v0 }
 0x276   : > { %6353 = vmatpush3.bf16.msra.mxu1 %v8324_v9  ;;  %v6450_v9 = vpop.f32.mrb[83].mxu0 }
 0x277   : > { %6354 = vmatprep.subr.bf16.mxu1 %v8331_v39  ;;  %v8488_v39 = vadd.f32 %v6450_v9, %v6449_v17  ;;  %v6452_v13 = vpop.f32.mrb[84].mxu0 }
 0x278   : > { %v6453_v15 = vpop.f32.mrb[85].mxu0 }
 0x279   : > { %v6455_v16 = vpop.f32.mrb[86].mxu0  ;;  %v8492_v23 = vadd.f32 %v6453_v15, %v6452_v13 }
 0x27a   : > { %6355 = vmatpush3.bf16.msra.mxu1 %v8340_v12  ;;  %v2198_v12 = vpack.c.bf16 %v8488_v39, %v8486_v27  ;;  %v6456_v19 = vpop.f32.mrb[87].mxu0 }
 0x27b   : > { %7392 = vmatprep.subr.msk.bf16.mxu1 %vm759_vm0, %v5793_v48  ;;  %v8494_v3 = vadd.f32 %v6456_v19, %v6455_v16  ;;  %v6458_v54 = vpop.f32.mrb[88].mxu0 }
 0x27c   : > { %v6459_v57 = vpop.f32.mrb[89].mxu0 }
 0x27d   : > { %1750 = vmatmul.mubr.bf16.vlgmr.msra.gmra.mrb[24].mxu1 %v7519_v49  ;;  %v2199_v43 = vpack.c.bf16 %v8494_v3, %v8492_v23  ;;  %v6461_v61 = vpop.f32.mrb[90].mxu0  ;;  %v8502_v36 = vadd.f32 %v6459_v57, %v6458_v54 }
 0x27e   : > { %1757 = vmatprep.mubr.bf16.mxu1 %v7525_v52  ;;  %6736 = vmatpush3.bf16.msra.mxu1 %v1801_v2  ;;  %v6462_v47 = vpop.f32.mrb[91].mxu0 }
 0x27f   : > { %7393 = vmatprep.subr.msk.bf16.mxu1 %vm759_vm0, %v5814_v1  ;;  %v8504_v30 = vadd.f32 %v6462_v47, %v6461_v61  ;;  %v6464_v34 = vpop.f32.mrb[92].mxu0 }
 0x280   : > { %v6465_v37 = vpop.f32.mrb[93].mxu0 }
 0x281   : > { %v2200_v33 = vpack.c.bf16 %v8504_v30, %v8502_v36  ;;  %v6467_v41 = vpop.f32.mrb[94].mxu0  ;;  %v8508_v45 = vadd.f32 %v6465_v37, %v6464_v34 }
 0x282   : > { %v6468_v42 = vpop.f32.mrb[95].mxu0 }
 0x283   : > { %v8510_v48 = vadd.f32 %v6468_v42, %v6467_v41 }
 0x285   : > { %1758 = vmatmul.mubr.bf16.gmra.mrb[28].mxu1 %v7529_v55  ;;  %v2201_v49 = vpack.c.bf16 %v8510_v48, %v8508_v45 }
 0x286   : > { %1765 = vmatprep.mubr.bf16.mxu1 %v7531_v56 }
 0x28d   : > { %1766 = vmatmul.mubr.bf16.gmra.mrb[32].mxu1 %v7536_v59 }
 0x28e   : > { %1773 = vmatprep.mubr.bf16.mxu1 %v7537_v62 }
 0x295   : > { %1774 = vmatmul.mubr.bf16.gmra.mrb[36].mxu1 %v7541_v63 }
 0x2fa   : > { %v6491_v52 = vpop.f32.mrb[96].mxu0 }
 0x2fb   : > { %v6492_v55 = vpop.f32.mrb[97].mxu0 }
 0x2fc   : > { %v6494_v56 = vpop.f32.mrb[98].mxu0  ;;  %v8514_v62 = vadd.f32 %v6492_v55, %v6491_v52 }
 0x2fd   : > { %v6495_v59 = vpop.f32.mrb[99].mxu0 }
 0x2fe   : > { %v8516_v63 = vadd.f32 %v6495_v59, %v6494_v56  ;;  %v2009_v59 = vsel %vm759_vm0, %v5814_v1, 0 }
 0x300   : > { %v2406_v18 = vpack.c.bf16 %v8516_v63, %v8514_v62 }
 0x302   : > { %v6497_v21 = vpop.f32.mrb[100].mxu0 }
 0x303   : > { %v6498_v24 = vpop.f32.mrb[101].mxu0 }
 0x304   : > { %v6500_v4 = vpop.f32.mrb[102].mxu0  ;;  %v8520_v11 = vadd.f32 %v6498_v24, %v6497_v21  ;;  %v5835_v21 = vld [vmem:[%s9219_s2 + $0xe] sm:$0x3] }
 0x305   : > { %v6501_v10 = vpop.f32.mrb[103].mxu0 }
 0x306   : > { %v8522_v35 = vadd.f32 %v6501_v10, %v6500_v4 }
 0x308   : > { %v2407_v40 = vpack.c.bf16 %v8522_v35, %v8520_v11 }
 0x30a   : > { %v6503_v58 = vpop.f32.mrb[104].mxu0 }
 0x30b   : > { %v6504_v60 = vpop.f32.mrb[105].mxu0 }
 0x30c   : > { %v6506_v20 = vpop.f32.mrb[106].mxu0  ;;  %v8526_v2 = vadd.f32 %v6504_v60, %v6503_v58 }
 0x30d   : > { %v6507_v25 = vpop.f32.mrb[107].mxu0 }
 0x30e   : > { %v6508_v28 = vadd.f32 %v6507_v25, %v6506_v20 }
 0x310   : > { %v2408_v31 = vpack.c.bf16 %v6508_v28, %v8526_v2 }
 0x312   : > { %v6509_v32 = vpop.f32.mrb[108].mxu0 }
 0x313   : > { %v6510_v38 = vpop.f32.mrb[109].mxu0 }
 0x314   : > { %v6512_v0 = vpop.f32.mrb[110].mxu0  ;;  %v6511_v14 = vadd.f32 %v6510_v38, %v6509_v32 }
 0x315   : > { %v6513_v17 = vpop.f32.mrb[111].mxu0 }
 0x316   : > { %v6514_v9 = vadd.f32 %v6513_v17, %v6512_v0  ;;  %v2217_v17 = vsel %vm759_vm0, %v5835_v21, 0 }
 0x318   : > { %v2409_v13 = vpack.c.bf16 %v6514_v9, %v6511_v14  ;;  %v5856_v9 = vld [vmem:[%s9219_s2 + $0x10] sm:$0x3] }
 0x319   : > { %v2425_v22 = vsel %vm759_vm0, %v5856_v9, 0 }
 0x350   : > { %v6356_v15 = vpop.f32.mrb[24].mxu1 }
 0x351   : > { %v6357_v16 = vpop.f32.mrb[25].mxu1 }
 0x352   : > { %v6358_v19 = vadd.f32 %v6357_v16, %v6356_v15  ;;  %v6359_v54 = vpop.f32.mrb[26].mxu1 }
 0x353   : > { %v6360_v57 = vpop.f32.mrb[27].mxu1 }
 0x354   : > { %v6361_v61 = vadd.f32 %v6360_v57, %v6359_v54 }
 0x356   : > { %v1782_v47 = vpack.c.bf16 %v6361_v61, %v6358_v19 }
 0x358   : > { %v6362_v34 = vpop.f32.mrb[28].mxu1  ;;  %6737 = vmatprep.mubr.msk.bf16.mxu1 %vm746_vm1, %v1782_v47 }
 0x359   : > { %v6363_v37 = vpop.f32.mrb[29].mxu1 }
 0x35a   : > { %v6364_v41 = vadd.f32 %v6363_v37, %v6362_v34  ;;  %v6365_v42 = vpop.f32.mrb[30].mxu1  ;;  %v7561_v34 = vld [vmem:[%s9221_s4] sm:$0xff]   ;;  %v7562_v37 = vld [vmem:[%s9221_s4 + $0x8] sm:$0xff]  }
 0x35b   : > { %v6366_v52 = vpop.f32.mrb[31].mxu1 }
 0x35c   : > { %v6367_v55 = vadd.f32 %v6366_v52, %v6365_v42  ;;  %v7563_v42 = vld [vmem:[%s9221_s4 + $0x10] sm:$0xff]   ;;  %v7564_v52 = vld [vmem:[%s9221_s4 + $0x20] sm:$0xff]  }
 0x35e   : > { %v1783_v56 = vpack.c.bf16 %v6367_v55, %v6364_v41  ;;  %v7567_v41 = vld [vmem:[%s9222_s5] sm:$0xff]   ;;  %v7565_v55 = vld [vmem:[%s9221_s4 + $0x28] sm:$0xff]  }
 0x360   : > { %v6368_v24 = vpop.f32.mrb[32].mxu1  ;;  %6738 = vmatmul.mubr.msk.bf16.vlgmr.msra.gmra.mrb[0].mxu1 %vm746_vm1, %v1783_v56  ;;  %v7566_v56 = vld [vmem:[%s9221_s4 + $0x30] sm:$0xff]  }
 0x361   : > { %v6369_v4 = vpop.f32.mrb[33].mxu1  ;;  %6746 = vmatpush3.bf16.msra.mxu1 %v2009_v59  ;;  %v7568_v59 = vld [vmem:[%s9222_s5 + $0x8] sm:$0xff]  }
 0x362   : > { %v6370_v10 = vadd.f32 %v6369_v4, %v6368_v24  ;;  %v6371_v58 = vpop.f32.mrb[34].mxu1  ;;  %7394 = vmatprep.subr.msk.bf16.mxu1 %vm759_vm0, %v5835_v21 }
 0x363   : > { %v6372_v60 = vpop.f32.mrb[35].mxu1 }
 0x364   : > { %v6373_v20 = vadd.f32 %v6372_v60, %v6371_v58  ;;  %v7569_v60 = vld [vmem:[%s9222_s5 + $0x10] sm:$0xff]  }
 0x366   : > { %v1784_v2 = vpack.c.bf16 %v6373_v20, %v6370_v10 }
 0x368   : > { %v6374_v25 = vpop.f32.mrb[36].mxu1  ;;  %6741 = vmatprep.mubr.msk.bf16.mxu1 %vm746_vm1, %v1784_v2 }
 0x369   : > { %v6375_v1 = vpop.f32.mrb[37].mxu1 }
 0x36a   : > { %v6376_v28 = vadd.f32 %v6375_v1, %v6374_v25  ;;  %v6377_v32 = vpop.f32.mrb[38].mxu1 }
 0x36b   : > { %v6378_v38 = vpop.f32.mrb[39].mxu1 }
 0x36c   : > { %v6379_v0 = vadd.f32 %v6378_v38, %v6377_v32  ;;  %v7570_v32 = vld [vmem:[%s9222_s5 + $0x18] sm:$0xff]   ;;  %v7571_v38 = vld [vmem:[%s9222_s5 + $0x20] sm:$0xff]  }
 0x36e   : > { %v1785_v14 = vpack.c.bf16 %v6379_v0, %v6376_v28 }
 0x370   : > { %6742 = vmatmul.mubr.msk.bf16.gmra.mrb[4].mxu1 %vm746_vm1, %v1785_v14 }
 0x371   : > { %6747 = vmatprep.mubr.msk.bf16.mxu1 %vm746_vm1, %v1990_v7  ;;  %v5664_v7 = vld [vmem:[%s9220_s3] ss:$0 sm:$0xff] }
 0x378   : > { %6748 = vmatmul.mubr.msk.bf16.vlgmr.msra.gmra.mrb[0].mxu1 %vm746_vm1, %v1991_v53 }
 0x379   : > { %6751 = vmatprep.mubr.msk.bf16.mxu1 %vm746_vm1, %v1992_v8  ;;  %6756 = vmatpush3.bf16.msra.mxu1 %v2217_v17  ;;  %v7572_v17 = vld [vmem:[%s9222_s5 + $0x28] sm:$0xff]  }
 0x37a   : > { %7395 = vmatprep.subr.msk.bf16.mxu1 %vm759_vm0, %v5856_v9 }
 0x380   : > { %6752 = vmatmul.mubr.msk.bf16.gmra.mrb[4].mxu1 %vm746_vm1, %v1993_v51 }
 0x381   : > { %6757 = vmatprep.mubr.msk.bf16.mxu1 %vm746_vm1, %v2198_v12 }
 0x388   : > { %6758 = vmatmul.mubr.msk.bf16.vlgmr.msra.gmra.mrb[0].mxu1 %vm746_vm1, %v2199_v43 }
 0x389   : > { %6761 = vmatprep.mubr.msk.bf16.mxu1 %vm746_vm1, %v2200_v33  ;;  %6766 = vmatpush3.bf16.msra.mxu1 %v2425_v22 }
 0x38a   : > { %6775 = vmatprep.subr.bf16.mxu1 %v7706_v26 }
 0x390   : > { %6762 = vmatmul.mubr.msk.bf16.gmra.mrb[4].mxu1 %vm746_vm1, %v2201_v49 }
 0x391   : > { %6767 = vmatprep.mubr.msk.bf16.mxu1 %vm746_vm1, %v2406_v18 }
 0x398   : > { %6768 = vmatmul.mubr.msk.bf16.vlgmr.msra.gmra.mrb[0].mxu1 %vm746_vm1, %v2407_v40 }
 0x399   : > { %6771 = vmatprep.mubr.msk.bf16.mxu1 %vm746_vm1, %v2408_v31 }
 0x3a0   : > { %6772 = vmatmul.mubr.msk.bf16.gmra.mrb[4].mxu1 %vm746_vm1, %v2409_v13 }
 0x3a1   : > { %6783 = vmatprep.mubr.msk.bf16.mxu1 %vm7707_vm2, %v7706_v26 }
 0x46b   : > { %v6769_v29 = vpop.f32.mrb[0].mxu1 }
 0x46c   : > { %v7215_v46 = vadd.f32 %v6769_v29, %v5664_v7  ;;  %v2461_v53 = vpop.f32.mrb[1].mxu1  ;;  %v7573_v29 = vld [vmem:[%s9221_s4 + $0x18] sm:$0xff]  }
 0x46d   : > { %v7216_v5 = vadd.f32 %v5664_v7, %v2461_v53  ;;  %v6770_v6 = vpop.f32.mrb[2].mxu1  ;;  %v7575_v53 = vld [vmem:[%s9222_s5 + $0x38] sm:$0xff]  }
 0x46e   : > { %v2510_v8 = vmul.f32 0.01, %v7215_v46  ;;  %v7217_v44 = vadd.f32 %v6770_v6, %v5664_v7  ;;  %v2464_v50 = vpop.f32.mrb[3].mxu1  ;;  %vm2502_vm3 = vcmp.ge.f32.partialorder %v7215_v46, 0.0 }
 0x46f   : > { %v2508_v51 = vmul.f32 0.01, %v7216_v5  ;;  %v7218_v27 = vadd.f32 %v5664_v7, %v2464_v50  ;;  %vm2500_vm4 = vcmp.ge.f32.partialorder %v7216_v5, 0.0 }
 0x470   : > { %vm2503_vm5 = vcmp.ge.f32.partialorder %v7217_v44, 0.0  ;;  %v2511_v39 = vmul.f32 0.01, %v7217_v44  ;;  %v2518_v23 = vsel %vm2502_vm3, %v7215_v46, %v2510_v8  ;;  %v7574_v46 = vld [vmem:[%s9222_s5 + $0x30] sm:$0xff]  }
 0x471   : > { %vm2501_vm6 = vcmp.ge.f32.partialorder %v7218_v27, 0.0  ;;  %v2509_v12 = vmul.f32 0.01, %v7218_v27  ;;  %v2516_v43 = vsel %vm2500_vm4, %v7216_v5, %v2508_v51 }
 0x472   : > { %v2519_v3 = vsel %vm2503_vm5, %v7217_v44, %v2511_v39 }
 0x473   : > { %v8595_v36 = vpack.c.bf16 %v2519_v3, %v2518_v23  ;;  %v2517_v30 = vsel %vm2501_vm6, %v7218_v27, %v2509_v12  ;;  %v6773_v33 = vpop.f32.mrb[4].mxu1 }
 0x474   : > { %v8597_v45 = vpack.c.bf16 %v2517_v30, %v2516_v43  ;;  %v7219_v48 = vadd.f32 %v6773_v33, %v5664_v7  ;;  %v2477_v49 = vpop.f32.mrb[5].mxu1 }
 0x475   : > { %v7220_v62 = vadd.f32 %v5664_v7, %v2477_v49  ;;  %v6774_v63 = vpop.f32.mrb[6].mxu1  ;;  %v7583_v49 = vld [vmem:[%s9221_s4 + $0x40] sm:$0xff]  }
 0x476   : > { %v2514_v18 = vmul.f32 0.01, %v7219_v48  ;;  %v7221_v11 = vadd.f32 %v6774_v63, %v5664_v7  ;;  %v2480_v35 = vpop.f32.mrb[7].mxu1  ;;  %6776 = vmatpush3.bf16.msra.mxu1 %v8597_v45  ;;  %6796 = vmatpush3.bf16.msra.mxu0 %v8597_v45  ;;  %vm2506_vm7 = vcmp.ge.f32.partialorder %v7219_v48, 0.0 }
 0x477   : > { %v2512_v40 = vmul.f32 0.01, %v7220_v62  ;;  %v7222_v31 = vadd.f32 %v5664_v7, %v2480_v35  ;;  %6777 = vmatprep.subr.bf16.mxu1 %v7706_v26  ;;  %6797 = vmatprep.subr.bf16.mxu0 %v7706_v26  ;;  %vm2504_vm8 = vcmp.ge.f32.partialorder %v7220_v62, 0.0 }
 0x478   : > { %vm2507_vm9 = vcmp.ge.f32.partialorder %v7221_v11, 0.0  ;;  %v2515_v13 = vmul.f32 0.01, %v7221_v11  ;;  %v2522_v16 = vsel %vm2506_vm7, %v7219_v48, %v2514_v18 }
 0x479   : > { %vm2505_vm10 = vcmp.ge.f32.partialorder %v7222_v31, 0.0  ;;  %v2513_v15 = vmul.f32 0.01, %v7222_v31  ;;  %v2520_v54 = vsel %vm2504_vm8, %v7220_v62, %v2512_v40 }
 0x47a   : > { %v2523_v19 = vsel %vm2507_vm9, %v7221_v11, %v2515_v13  ;;  %6778 = vmatpush3.bf16.msra.mxu1 %v8595_v36  ;;  %6798 = vmatpush3.bf16.msra.mxu0 %v8595_v36  ;;  %v7576_v11 = vld [vmem:[%s9222_s5 + $0x40] sm:$0xff]   ;;  %v7578_v13 = vld [vmem:[%s9222_s5 + $0x50] sm:$0xff]  }
 0x47b   : > { %v8605_v57 = vpack.c.bf16 %v2523_v19, %v2522_v16  ;;  %v2521_v61 = vsel %vm2505_vm10, %v7222_v31, %v2513_v15  ;;  %6779 = vmatprep.subr.bf16.mxu1 %v7706_v26  ;;  %6799 = vmatprep.subr.bf16.mxu0 %v7706_v26  ;;  %v7577_v31 = vld [vmem:[%s9222_s5 + $0x48] sm:$0xff]   ;;  %v7579_v15 = vld [vmem:[%s9222_s5 + $0x58] sm:$0xff]   ;;  %v7580_v16 = vld [vmem:[%s9222_s5 + $0x60] sm:$0xff]  }
 0x47c   : > { %v8609_v47 = vpack.c.bf16 %v2521_v61, %v2520_v54  ;;  %v7581_v19 = vld [vmem:[%s9222_s5 + $0x68] sm:$0xff]   ;;  %v7582_v54 = vld [vmem:[%s9221_s4 + $0x38] sm:$0xff]  }
 0x47e   : > { %6780 = vmatpush3.bf16.msra.mxu1 %v8609_v47  ;;  %6800 = vmatpush3.bf16.msra.mxu0 %v8609_v47 }
 0x47f   : > { %6781 = vmatprep.subr.bf16.mxu1 %v7706_v26  ;;  %6801 = vmatprep.subr.bf16.mxu0 %v7706_v26 }
 0x482   : > { %6782 = vmatpush3.bf16.msra.mxu1 %v8605_v57  ;;  %6802 = vmatpush3.bf16.msra.mxu0 %v8605_v57 }
 0x483   : > { %6815 = vmatprep.subr.bf16.mxu0 %v7706_v26  ;;  %6787 = vmatprep.subr.bf16.mxu1 %v7706_v26 }
 0x485   : > { %6784 = vmatmul.mubr.msk.bf16.vlgmr.msra.gmra.mrb[40].mxu1 %vm2542_vm11, %v7561_v34  ;;  %6804 = vmatmul.mubr.msk.bf16.vlgmr.msra.gmra.mrb[112].mxu0 %vm2542_vm11, %v7562_v37 }
 0x486   : > { %6816 = vmatpush3.bf16.msra.mxu0 %v8597_v45  ;;  %6823 = vmatprep.mubr.msk.bf16.mxu0 %vm7707_vm2, %v7706_v26 }
 0x487   : > { %6817 = vmatprep.subr.bf16.mxu0 %v7706_v26  ;;  %6788 = vmatpush3.bf16.msra.mxu1 %v7567_v41 }
 0x488   : > { %6789 = vmatprep.subr.bf16.mxu1 %v7706_v26  ;;  %6791 = vmatprep.mubr.msk.bf16.mxu1 %vm7707_vm2, %v7706_v26 }
 0x48a   : > { %6818 = vmatpush3.bf16.msra.mxu0 %v8595_v36 }
 0x48b   : > { %6819 = vmatprep.subr.bf16.mxu0 %v7706_v26  ;;  %6790 = vmatpush3.bf16.msra.mxu1 %v7568_v59 }
 0x48c   : > { %6807 = vmatprep.subr.bf16.mxu1 %v7706_v26 }
 0x48e   : > { %6820 = vmatpush3.bf16.msra.mxu0 %v8609_v47 }
 0x48f   : > { %6821 = vmatprep.subr.bf16.mxu0 %v7706_v26 }
 0x492   : > { %6822 = vmatpush3.bf16.msra.mxu0 %v8605_v57 }
 0x493   : > { %6855 = vmatprep.subr.bf16.mxu0 %v7706_v26 }
 0x495   : > { %6824 = vmatmul.mubr.msk.bf16.vlgmr.msra.gmra.mrb[116].mxu0 %vm2542_vm11, %v7563_v42 }
 0x496   : > { %6856 = vmatpush3.bf16.msra.mxu0 %v8597_v45  ;;  %6863 = vmatprep.mubr.msk.bf16.mxu0 %vm7707_vm2, %v7706_v26 }
 0x497   : > { %6857 = vmatprep.subr.bf16.mxu0 %v7706_v26 }
 0x49a   : > { %6858 = vmatpush3.bf16.msra.mxu0 %v8595_v36 }
 0x49b   : > { %6859 = vmatprep.subr.bf16.mxu0 %v7706_v26 }
 0x49e   : > { %6860 = vmatpush3.bf16.msra.mxu0 %v8609_v47 }
 0x49f   : > { %6861 = vmatprep.subr.bf16.mxu0 %v7706_v26 }
 0x4a2   : > { %6862 = vmatpush3.bf16.msra.mxu0 %v8605_v57 }
 0x4a3   : > { %6875 = vmatprep.subr.bf16.mxu0 %v7706_v26 }
 0x4a5   : > { %6864 = vmatmul.mubr.msk.bf16.vlgmr.msra.gmra.mrb[120].mxu0 %vm2542_vm11, %v7564_v52 }
 0x4a6   : > { %6876 = vmatpush3.bf16.msra.mxu0 %v8597_v45  ;;  %6883 = vmatprep.mubr.msk.bf16.mxu0 %vm7707_vm2, %v7706_v26 }
 0x4a7   : > { %6877 = vmatprep.subr.bf16.mxu0 %v7706_v26 }
 0x4aa   : > { %6878 = vmatpush3.bf16.msra.mxu0 %v8595_v36 }
 0x4ab   : > { %6879 = vmatprep.subr.bf16.mxu0 %v7706_v26 }
 0x4ae   : > { %6880 = vmatpush3.bf16.msra.mxu0 %v8609_v47 }
 0x4af   : > { %6881 = vmatprep.subr.bf16.mxu0 %v7706_v26 }
 0x4b2   : > { %6882 = vmatpush3.bf16.msra.mxu0 %v8605_v57 }
 0x4b3   : > { %6895 = vmatprep.subr.bf16.mxu0 %v7706_v26 }
 0x4b5   : > { %6884 = vmatmul.mubr.msk.bf16.vlgmr.msra.gmra.mrb[124].mxu0 %vm2542_vm11, %v7565_v55  ;;  %v7586_v55 = vld [vmem:[%s9222_s5 + $0x80] sm:$0xff]  }
 0x4b6   : > { %6896 = vmatpush3.bf16.msra.mxu0 %v8597_v45  ;;  %6903 = vmatprep.mubr.msk.bf16.mxu0 %vm7707_vm2, %v7706_v26 }
 0x4b7   : > { %6897 = vmatprep.subr.bf16.mxu0 %v7706_v26 }
 0x4ba   : > { %6898 = vmatpush3.bf16.msra.mxu0 %v8595_v36 }
 0x4bb   : > { %6899 = vmatprep.subr.bf16.mxu0 %v7706_v26 }
 0x4be   : > { %6900 = vmatpush3.bf16.msra.mxu0 %v8609_v47 }
 0x4bf   : > { %6901 = vmatprep.subr.bf16.mxu0 %v7706_v26 }
 0x4c2   : > { %6902 = vmatpush3.bf16.msra.mxu0 %v8605_v57 }
 0x4c3   : > { %6935 = vmatprep.subr.bf16.mxu0 %v7706_v26 }
 0x4c5   : > { %6904 = vmatmul.mubr.msk.bf16.vlgmr.msra.gmra.mrb[128].mxu0 %vm2542_vm11, %v7566_v56 }
 0x4c6   : > { %6936 = vmatpush3.bf16.msra.mxu0 %v8597_v45  ;;  %6943 = vmatprep.mubr.msk.bf16.mxu0 %vm7707_vm2, %v7706_v26 }
 0x4c7   : > { %6937 = vmatprep.subr.bf16.mxu0 %v7706_v26 }
 0x4ca   : > { %6938 = vmatpush3.bf16.msra.mxu0 %v8595_v36 }
 0x4cb   : > { %6939 = vmatprep.subr.bf16.mxu0 %v7706_v26 }
 0x4ce   : > { %6940 = vmatpush3.bf16.msra.mxu0 %v8609_v47 }
 0x4cf   : > { %6941 = vmatprep.subr.bf16.mxu0 %v7706_v26 }
 0x4d2   : > { %6942 = vmatpush3.bf16.msra.mxu0 %v8605_v57 }
 0x4d3   : > { %6955 = vmatprep.subr.bf16.mxu0 %v7706_v26 }
 0x4d5   : > { %6944 = vmatmul.mubr.msk.bf16.vlgmr.msra.gmra.mrb[132].mxu0 %vm2542_vm11, %v7583_v49 }
 0x4d6   : > { %6957 = vmatprep.mubr.msk.bf16.mxu0 %vm7707_vm2, %v7706_v26 }
 0x558   : > { %v2580_v21 = vpop.f32.mrb[40].mxu1  ;;  %v2696_v24 = vpop.f32.mrb[112].mxu0 }
 0x559   : > { %v6785_v4 = vpop.f32.mrb[41].mxu1  ;;  %v6805_v10 = vpop.f32.mrb[113].mxu0 }
 0x55a   : > { %v2583_v58 = vpop.f32.mrb[42].mxu1  ;;  %v2699_v20 = vpop.f32.mrb[114].mxu0 }
 0x55b   : > { %v2587_v2 = vpack.c.bf16 %v2583_v58, %v2580_v21  ;;  %v6786_v25 = vpop.f32.mrb[43].mxu1  ;;  %v2703_v1 = vpack.c.bf16 %v2699_v20, %v2696_v24  ;;  %v6806_v28 = vpop.f32.mrb[115].mxu0  ;;  %v7587_v21 = vld [vmem:[%s9222_s5 + $0x88] sm:$0xff]   ;;  %v5861_v24 = vld [vmem:[%s9223_s6] ss:$0 sm:$0xff] }
 0x55d   : > { %6792 = vmatmul.mubr.msk.bf16.vlgmr.msra.gmra.mrb[44].mxu1 %vm2604_vm12, %v2587_v2 }
 0x55e   : > { %6808 = vmatpush3.bf16.msra.mxu1 %v7569_v60  ;;  %6811 = vmatprep.mubr.msk.bf16.mxu1 %vm7707_vm2, %v7706_v26 }
 0x55f   : > { %6809 = vmatprep.subr.bf16.mxu1 %v7706_v26 }
 0x562   : > { %6810 = vmatpush3.bf16.msra.mxu1 %v7570_v32 }
 0x563   : > { %6827 = vmatprep.subr.bf16.mxu1 %v7706_v26 }
 0x568   : > { %v2812_v0 = vpop.f32.mrb[116].mxu0 }
 0x569   : > { %6812 = vmatmul.mubr.msk.bf16.vlgmr.msra.gmra.mrb[44].mxu1 %vm2604_vm12, %v2703_v1  ;;  %v6825_v14 = vpop.f32.mrb[117].mxu0 }
 0x56a   : > { %6828 = vmatpush3.bf16.msra.mxu1 %v7571_v38  ;;  %v2815_v9 = vpop.f32.mrb[118].mxu0  ;;  %6831 = vmatprep.mubr.msk.bf16.mxu1 %vm7707_vm2, %v7706_v26  ;;  %v5960_v14 = vld [vmem:[%s9224_s7 + $0x2] sm:$0x3] }
 0x56b   : > { %6829 = vmatprep.subr.bf16.mxu1 %v7706_v26  ;;  %v2819_v22 = vpack.c.bf16 %v2815_v9, %v2812_v0  ;;  %v6826_v7 = vpop.f32.mrb[119].mxu0  ;;  %v3593_v0 = vld [vmem:[%s9224_s7] sm:$0x3]  ;;  %v5969_v9 = vld [vmem:[%s9224_s7 + $0x4] sm:$0x3] }
 0x56c   : > { %v5987_v7 = vld [vmem:[%s9224_s7 + $0x8] sm:$0x3] }
 0x56e   : > { %6830 = vmatpush3.bf16.msra.mxu1 %v7572_v17  ;;  %v7588_v17 = vld [vmem:[%s9225_s8] sm:$0xff]  }
 0x56f   : > { %6835 = vmatprep.subr.bf16.mxu1 %v7706_v26 }
 0x575   : > { %6832 = vmatmul.mubr.msk.bf16.vlgmr.msra.gmra.mrb[44].mxu1 %vm2604_vm12, %v2819_v22  ;;  %v5978_v22 = vld [vmem:[%s9224_s7 + $0x6] sm:$0x3] }
 0x576   : > { %6836 = vmatpush3.bf16.msra.mxu1 %v8597_v45  ;;  %6843 = vmatprep.mubr.msk.bf16.mxu1 %vm7707_vm2, %v7706_v26 }
 0x577   : > { %6837 = vmatprep.subr.bf16.mxu1 %v7706_v26 }
 0x578   : > { %v3044_v5 = vpop.f32.mrb[120].mxu0 }
 0x579   : > { %v6865_v6 = vpop.f32.mrb[121].mxu0 }
 0x57a   : > { %6838 = vmatpush3.bf16.msra.mxu1 %v8595_v36  ;;  %v3047_v8 = vpop.f32.mrb[122].mxu0  ;;  %v7589_v6 = vld [vmem:[%s9225_s8 + $0x8] sm:$0xff]  }
 0x57b   : > { %6839 = vmatprep.subr.bf16.mxu1 %v7706_v26  ;;  %v3051_v44 = vpack.c.bf16 %v3047_v8, %v3044_v5  ;;  %v6866_v50 = vpop.f32.mrb[123].mxu0  ;;  %v6023_v5 = vld [vmem:[%s9224_s7 + $0x10] sm:$0x3] }
 0x57e   : > { %6840 = vmatpush3.bf16.msra.mxu1 %v8609_v47 }
 0x57f   : > { %6841 = vmatprep.subr.bf16.mxu1 %v7706_v26 }
 0x582   : > { %6842 = vmatpush3.bf16.msra.mxu1 %v8605_v57 }
 0x583   : > { %6847 = vmatprep.subr.bf16.mxu1 %v7706_v26 }
 0x585   : > { %6844 = vmatmul.mubr.msk.bf16.vlgmr.msra.gmra.mrb[48].mxu1 %vm2542_vm11, %v7573_v29  ;;  %v5996_v29 = vld [vmem:[%s9224_s7 + $0xa] sm:$0x3] }
 0x586   : > { %6848 = vmatpush3.bf16.msra.mxu1 %v7574_v46  ;;  %6851 = vmatprep.mubr.msk.bf16.mxu1 %vm7707_vm2, %v7706_v26  ;;  %v6005_v46 = vld [vmem:[%s9224_s7 + $0xc] sm:$0x3] }
 0x587   : > { %6849 = vmatprep.subr.bf16.mxu1 %v7706_v26 }
 0x588   : > { %v3160_v51 = vpop.f32.mrb[124].mxu0 }
 0x589   : > { %v6885_v27 = vpop.f32.mrb[125].mxu0 }
 0x58a   : > { %6850 = vmatpush3.bf16.msra.mxu1 %v7575_v53  ;;  %v3163_v39 = vpop.f32.mrb[126].mxu0  ;;  %v6014_v53 = vld [vmem:[%s9224_s7 + $0xe] sm:$0x3] }
 0x58b   : > { %6867 = vmatprep.subr.bf16.mxu1 %v7706_v26  ;;  %v3167_v12 = vpack.c.bf16 %v3163_v39, %v3160_v51  ;;  %v6886_v23 = vpop.f32.mrb[127].mxu0 }
 0x598   : > { %v3276_v3 = vpop.f32.mrb[128].mxu0 }
 0x599   : > { %v6905_v43 = vpop.f32.mrb[129].mxu0 }
 0x59a   : > { %v3279_v30 = vpop.f32.mrb[130].mxu0 }
 0x59b   : > { %v3283_v33 = vpack.c.bf16 %v3279_v30, %v3276_v3  ;;  %v6906_v48 = vpop.f32.mrb[131].mxu0  ;;  %v7591_v30 = vld [vmem:[%s9225_s8 + $0x18] sm:$0xff]  }
 0x658   : > { %v2928_v62 = vpop.f32.mrb[48].mxu1 }
 0x659   : > { %v6845_v63 = vpop.f32.mrb[49].mxu1 }
 0x65a   : > { %v2931_v18 = vpop.f32.mrb[50].mxu1 }
 0x65b   : > { %v2935_v35 = vpack.c.bf16 %v2931_v18, %v2928_v62  ;;  %v6846_v40 = vpop.f32.mrb[51].mxu1  ;;  %v7592_v18 = vld [vmem:[%s9225_s8 + $0x20] sm:$0xff]  }
 0x65d   : > { %6852 = vmatmul.mubr.msk.bf16.vlgmr.msra.gmra.mrb[44].mxu1 %vm2604_vm12, %v2935_v35 }
 0x65e   : > { %6868 = vmatpush3.bf16.msra.mxu1 %v7576_v11  ;;  %6871 = vmatprep.mubr.msk.bf16.mxu1 %vm7707_vm2, %v7706_v26  ;;  %v7593_v11 = vld [vmem:[%s9225_s8 + $0x28] sm:$0xff]  }
 0x65f   : > { %6869 = vmatprep.subr.bf16.mxu1 %v7706_v26 }
 0x662   : > { %6870 = vmatpush3.bf16.msra.mxu1 %v7577_v31 }
 0x663   : > { %6887 = vmatprep.subr.bf16.mxu1 %v7706_v26 }
 0x669   : > { %6872 = vmatmul.mubr.msk.bf16.vlgmr.msra.gmra.mrb[44].mxu1 %vm2604_vm12, %v3051_v44  ;;  %v7590_v44 = vld [vmem:[%s9225_s8 + $0x10] sm:$0xff]  }
 0x66a   : > { %6888 = vmatpush3.bf16.msra.mxu1 %v7578_v13  ;;  %6891 = vmatprep.mubr.msk.bf16.mxu1 %vm7707_vm2, %v7706_v26 }
 0x66b   : > { %6889 = vmatprep.subr.bf16.mxu1 %v7706_v26 }
 0x66e   : > { %6890 = vmatpush3.bf16.msra.mxu1 %v7579_v15 }
 0x66f   : > { %6907 = vmatprep.subr.bf16.mxu1 %v7706_v26 }
 0x675   : > { %6892 = vmatmul.mubr.msk.bf16.vlgmr.msra.gmra.mrb[44].mxu1 %vm2604_vm12, %v3167_v12 }
 0x676   : > { %6908 = vmatpush3.bf16.msra.mxu1 %v7580_v16  ;;  %6911 = vmatprep.mubr.msk.bf16.mxu1 %vm7707_vm2, %v7706_v26  ;;  %v7594_v16 = vld [vmem:[%s9225_s8 + $0x30] sm:$0xff]  }
 0x677   : > { %6909 = vmatprep.subr.bf16.mxu1 %v7706_v26 }
 0x67a   : > { %6910 = vmatpush3.bf16.msra.mxu1 %v7581_v19 }
 0x67b   : > { %6915 = vmatprep.subr.bf16.mxu1 %v7706_v26 }
 0x681   : > { %6912 = vmatmul.mubr.msk.bf16.vlgmr.msra.gmra.mrb[44].mxu1 %vm2604_vm12, %v3283_v33 }
 0x682   : > { %6916 = vmatpush3.bf16.msra.mxu1 %v8597_v45  ;;  %6923 = vmatprep.mubr.msk.bf16.mxu1 %vm7707_vm2, %v7706_v26  ;;  %v7584_v45 = vld [vmem:[%s9222_s5 + $0x70] sm:$0xff]  }
 0x683   : > { %6917 = vmatprep.subr.bf16.mxu1 %v7706_v26 }
 0x686   : > { %6918 = vmatpush3.bf16.msra.mxu1 %v8595_v36  ;;  %v7585_v36 = vld [vmem:[%s9222_s5 + $0x78] sm:$0xff]  }
 0x687   : > { %6919 = vmatprep.subr.bf16.mxu1 %v7706_v26 }
 0x68a   : > { %6920 = vmatpush3.bf16.msra.mxu1 %v8609_v47 }
 0x68b   : > { %6921 = vmatprep.subr.bf16.mxu1 %v7706_v26 }
 0x68e   : > { %6922 = vmatpush3.bf16.msra.mxu1 %v8605_v57  ;;  %v3508_v57 = vpop.f32.mrb[132].mxu0 }
 0x68f   : > { %6927 = vmatprep.subr.bf16.mxu1 %v7706_v26  ;;  %v6945_v61 = vpop.f32.mrb[133].mxu0 }
 0x690   : > { %v3511_v47 = vpop.f32.mrb[134].mxu0 }
 0x691   : > { %6924 = vmatmul.mubr.msk.bf16.vlgmr.msra.gmra.mrb[52].mxu1 %vm2542_vm11, %v7582_v54  ;;  %v3515_v34 = vpack.c.bf16 %v3511_v47, %v3508_v57  ;;  %v6946_v37 = vpop.f32.mrb[135].mxu0  ;;  %v7595_v57 = vld [vmem:[%s9225_s8 + $0x38] sm:$0xff]  }
 0x692   : > { %6928 = vmatpush3.bf16.msra.mxu1 %v7584_v45  ;;  %6931 = vmatprep.mubr.msk.bf16.mxu1 %vm7707_vm2, %v7706_v26 }
 0x693   : > { %6929 = vmatprep.subr.bf16.mxu1 %v7706_v26 }
 0x696   : > { %6930 = vmatpush3.bf16.msra.mxu1 %v7585_v36 }
 0x697   : > { %6947 = vmatprep.subr.bf16.mxu1 %v7706_v26 }
 0x764   : > { %v3392_v41 = vpop.f32.mrb[52].mxu1 }
 0x765   : > { %v6925_v42 = vpop.f32.mrb[53].mxu1 }
 0x766   : > { %v3395_v52 = vpop.f32.mrb[54].mxu1  ;;  %v7596_v42 = vld [vmem:[%s9225_s8 + $0x40] sm:$0xff]  }
 0x767   : > { %v3399_v56 = vpack.c.bf16 %v3395_v52, %v3392_v41  ;;  %v6926_v59 = vpop.f32.mrb[55].mxu1  ;;  %v7597_v52 = vld [vmem:[%s9225_s8 + $0x48] sm:$0xff]  }
 0x769   : > { %6932 = vmatmul.mubr.msk.bf16.vlgmr.msra.gmra.mrb[44].mxu1 %vm2604_vm12, %v3399_v56 }
 0x76a   : > { %6948 = vmatpush3.bf16.msra.mxu1 %v7586_v55  ;;  %6951 = vmatprep.mubr.msk.bf16.mxu1 %vm7707_vm2, %v7706_v26 }
 0x76b   : > { %6949 = vmatprep.subr.bf16.mxu1 %v7706_v26 }
 0x76e   : > { %6950 = vmatpush3.bf16.msra.mxu1 %v7587_v21 }
 0x76f   : > { %6969 = vmatprep.subr.bf16.mxu1 %v7706_v26 }
 0x775   : > { %6952 = vmatmul.mubr.msk.bf16.vlgmr.msra.gmra.mrb[44].mxu1 %vm2604_vm12, %v3515_v34 }
 0x776   : > { %6971 = vmatprep.mubr.msk.bf16.mxu1 %vm7707_vm2, %v7706_v26 }
 0x848   : > { %v3570_v4 = vpop.f32.mrb[44].mxu1 }
 0x849   : > { %v7223_v10 = vadd.f32 %v5861_v24, %v3570_v4  ;;  %v6953_v58 = vpop.f32.mrb[45].mxu1  ;;  %v7598_v4 = vld [vmem:[%s9225_s8 + $0x50] sm:$0xff]  }
 0x84a   : > { %v3573_v60 = vpop.f32.mrb[46].mxu1 }
 0x84b   : > { %v3581_v20 = vmul.f32 0.01, %v7223_v10  ;;  %v7224_v2 = vadd.f32 %v5861_v24, %v3573_v60  ;;  %v6954_v25 = vpop.f32.mrb[47].mxu1  ;;  %vm3579_vm13 = vcmp.ge.f32.partialorder %v7223_v10, 0.0 }
 0x84d   : > { %vm3580_vm14 = vcmp.ge.f32.partialorder %v7224_v2, 0.0  ;;  %v3582_v1 = vmul.f32 0.01, %v7224_v2  ;;  %v3583_v28 = vsel %vm3579_vm13, %v7223_v10, %v3581_v20 }
 0x84f   : > { %v3584_v32 = vsel %vm3580_vm14, %v7224_v2, %v3582_v1  ;;  %v7599_v2 = vld [vmem:[%s9225_s8 + $0x58] sm:$0xff]  }
 0x850   : > { %v3585_v38 = vpack.c.bf16 %v3584_v32, %v3583_v28 }
 0x852   : > { %6956 = vmatpush3.bf16.msra.mxu0 %v3585_v38  ;;  %6970 = vmatpush3.bf16.msra.mxu1 %v3585_v38 }
 0x853   : > { %6983 = vmatprep.subr.bf16.mxu1 %v7706_v26  ;;  %6961 = vmatprep.subr.bf16.mxu0 %v7706_v26 }
 0x855   : > { %6958 = vmatmul.mubr.msk.bf16.vlgmr.msra.gmra.mrb[136].mxu0 %vm3594_vm15, %v3593_v0  ;;  %6972 = vmatmul.mubr.msk.bf16.vlgmr.msra.gmra.mrb[56].mxu1 %vm3594_vm15, %v5960_v14  ;;  %v7600_v0 = vld [vmem:[%s9225_s8 + $0x60] sm:$0xff]   ;;  %v7601_v14 = vld [vmem:[%s9225_s8 + $0x68] sm:$0xff]  }
 0x856   : > { %6984 = vmatpush3.bf16.msra.mxu1 %v3585_v38  ;;  %6985 = vmatprep.mubr.msk.bf16.mxu1 %vm7707_vm2, %v7706_v26 }
 0x857   : > { %6997 = vmatprep.subr.bf16.mxu1 %v7706_v26  ;;  %6962 = vmatpush3.bf16.msra.mxu0 %v7588_v17 }
 0x858   : > { %6963 = vmatprep.subr.bf16.mxu0 %v7706_v26  ;;  %6965 = vmatprep.mubr.msk.bf16.mxu0 %vm7707_vm2, %v7706_v26 }
 0x85b   : > { %6964 = vmatpush3.bf16.msra.mxu0 %v7589_v6  ;;  %v5955_v6 = vld [vmem:[%s9226_s9] ss:$0 sm:$0xff] }
 0x85c   : > { %6975 = vmatprep.subr.bf16.mxu0 %v7706_v26 }
 0x85d   : > { %6986 = vmatmul.mubr.msk.bf16.vlgmr.msra.gmra.mrb[60].mxu1 %vm3594_vm15, %v5969_v9  ;;  %v7602_v9 = vld [vmem:[%s9225_s8 + $0x70] sm:$0xff]  }
 0x85e   : > { %6998 = vmatpush3.bf16.msra.mxu1 %v3585_v38  ;;  %6999 = vmatprep.mubr.msk.bf16.mxu1 %vm7707_vm2, %v7706_v26 }
 0x85f   : > { %7011 = vmatprep.subr.bf16.mxu1 %v7706_v26 }
 0x865   : > { %7000 = vmatmul.mubr.msk.bf16.vlgmr.msra.gmra.mrb[64].mxu1 %vm3594_vm15, %v5978_v22  ;;  %v7603_v22 = vld [vmem:[%s9225_s8 + $0x78] sm:$0xff]  }
 0x866   : > { %7012 = vmatpush3.bf16.msra.mxu1 %v3585_v38  ;;  %7013 = vmatprep.mubr.msk.bf16.mxu1 %vm7707_vm2, %v7706_v26 }
 0x867   : > { %7025 = vmatprep.subr.bf16.mxu1 %v7706_v26 }
 0x86d   : > { %7014 = vmatmul.mubr.msk.bf16.vlgmr.msra.gmra.mrb[68].mxu1 %vm3594_vm15, %v5987_v7 }
 0x86e   : > { %7026 = vmatpush3.bf16.msra.mxu1 %v3585_v38  ;;  %7027 = vmatprep.mubr.msk.bf16.mxu1 %vm7707_vm2, %v7706_v26 }
 0x86f   : > { %7039 = vmatprep.subr.bf16.mxu1 %v7706_v26 }
 0x875   : > { %7028 = vmatmul.mubr.msk.bf16.vlgmr.msra.gmra.mrb[72].mxu1 %vm3594_vm15, %v5996_v29  ;;  %v7604_v29 = vld [vmem:[%s9225_s8 + $0x80] sm:$0xff]  }
 0x876   : > { %7040 = vmatpush3.bf16.msra.mxu1 %v3585_v38  ;;  %7041 = vmatprep.mubr.msk.bf16.mxu1 %vm7707_vm2, %v7706_v26 }
 0x877   : > { %7053 = vmatprep.subr.bf16.mxu1 %v7706_v26 }
 0x87d   : > { %7042 = vmatmul.mubr.msk.bf16.vlgmr.msra.gmra.mrb[76].mxu1 %vm3594_vm15, %v6005_v46  ;;  %v7605_v46 = vld [vmem:[%s9225_s8 + $0x88] sm:$0xff]  }
 0x87e   : > { %7054 = vmatpush3.bf16.msra.mxu1 %v3585_v38  ;;  %7055 = vmatprep.mubr.msk.bf16.mxu1 %vm7707_vm2, %v7706_v26 }
 0x87f   : > { %7067 = vmatprep.subr.bf16.mxu1 %v7706_v26 }
 0x885   : > { %7056 = vmatmul.mubr.msk.bf16.vlgmr.msra.gmra.mrb[80].mxu1 %vm3594_vm15, %v6014_v53 }
 0x886   : > { %7068 = vmatpush3.bf16.msra.mxu1 %v3585_v38  ;;  %7069 = vmatprep.mubr.msk.bf16.mxu1 %vm7707_vm2, %v7706_v26 }
 0x887   : > { %7081 = vmatprep.subr.bf16.mxu1 %v7706_v26 }
 0x88d   : > { %7070 = vmatmul.mubr.msk.bf16.vlgmr.msra.gmra.mrb[84].mxu1 %vm3594_vm15, %v6023_v5  ;;  %v7606_v5 = vld [vmem:[%s9228_s11] sm:$0xff]  }
 0x88e   : > { %7083 = vmatprep.mubr.msk.bf16.mxu1 %vm7707_vm2, %v7706_v26 }
 0x928   : > { %v3632_v8 = vpop.f32.mrb[136].mxu0  ;;  %v3738_v50 = vpop.f32.mrb[56].mxu1 }
 0x929   : > { %v3638_v51 = vpack.c.bf16 %v3632_v8, %v3632_v8  ;;  %v6959_v27 = vpop.f32.mrb[137].mxu0  ;;  %v6973_v39 = vpop.f32.mrb[57].mxu1  ;;  %v3744_v62 = vpack.c.bf16 %v3738_v50, %v3738_v50 }
 0x92a   : > { %v3635_v12 = vpop.f32.mrb[138].mxu0  ;;  %v3741_v23 = vpop.f32.mrb[58].mxu1 }
 0x92b   : > { %v6960_v3 = vpop.f32.mrb[139].mxu0  ;;  %6966 = vmatmul.mubr.msk.bf16.vlgmr.msra.gmra.mrb[140].mxu0 %vm2604_vm12, %v3638_v51  ;;  %v6974_v43 = vpop.f32.mrb[59].mxu1 }
 0x92c   : > { %6976 = vmatpush3.bf16.msra.mxu0 %v7590_v44  ;;  %6979 = vmatprep.mubr.msk.bf16.mxu0 %vm7707_vm2, %v7706_v26  ;;  %v4560_v43 = vld [vmem:[%s9227_s10] sm:$0x1] }
 0x92d   : > { %6977 = vmatprep.subr.bf16.mxu0 %v7706_v26 }
 0x930   : > { %6978 = vmatpush3.bf16.msra.mxu0 %v7591_v30  ;;  %v3845_v33 = vpop.f32.mrb[60].mxu1  ;;  %v6036_v30 = vld [vmem:[%s9227_s10 + $0x1] sm:$0x1] }
 0x931   : > { %6989 = vmatprep.subr.bf16.mxu0 %v7706_v26  ;;  %v6987_v48 = vpop.f32.mrb[61].mxu1  ;;  %v3851_v15 = vpack.c.bf16 %v3845_v33, %v3845_v33  ;;  %v6045_v33 = vld [vmem:[%s9227_s10 + $0x2] sm:$0x1] }
 0x932   : > { %v3848_v49 = vpop.f32.mrb[62].mxu1  ;;  %v6054_v48 = vld [vmem:[%s9227_s10 + $0x3] sm:$0x1] }
 0x933   : > { %v6988_v63 = vpop.f32.mrb[63].mxu1  ;;  %v6063_v49 = vld [vmem:[%s9227_s10 + $0x4] sm:$0x1] }
 0x934   : > { %v6081_v63 = vld [vmem:[%s9227_s10 + $0x6] sm:$0x1] }
 0x937   : > { %6980 = vmatmul.mubr.msk.bf16.vlgmr.msra.gmra.mrb[140].mxu0 %vm2604_vm12, %v3744_v62  ;;  %v6072_v62 = vld [vmem:[%s9227_s10 + $0x5] sm:$0x1] }
 0x938   : > { %6990 = vmatpush3.bf16.msra.mxu0 %v7592_v18  ;;  %6993 = vmatprep.mubr.msk.bf16.mxu0 %vm7707_vm2, %v7706_v26  ;;  %v3952_v35 = vpop.f32.mrb[64].mxu1  ;;  %v6090_v18 = vld [vmem:[%s9227_s10 + $0x7] sm:$0x1] }
 0x939   : > { %6991 = vmatprep.subr.bf16.mxu0 %v7706_v26  ;;  %v7001_v40 = vpop.f32.mrb[65].mxu1  ;;  %v3958_v37 = vpack.c.bf16 %v3952_v35, %v3952_v35  ;;  %v7607_v35 = vld [vmem:[%s9228_s11 + $0x8] sm:$0xff]  }
 0x93a   : > { %v3955_v31 = vpop.f32.mrb[66].mxu1 }
 0x93b   : > { %v7002_v13 = vpop.f32.mrb[67].mxu1  ;;  %v7608_v31 = vld [vmem:[%s9228_s11 + $0x10] sm:$0xff]  }
 0x93c   : > { %6992 = vmatpush3.bf16.msra.mxu0 %v7593_v11  ;;  %v6099_v11 = vld [vmem:[%s9227_s10 + $0x8] sm:$0x1] }
 0x93d   : > { %7003 = vmatprep.subr.bf16.mxu0 %v7706_v26 }
 0x940   : > { %v4059_v19 = vpop.f32.mrb[68].mxu1 }
 0x941   : > { %v7015_v54 = vpop.f32.mrb[69].mxu1  ;;  %v4065_v24 = vpack.c.bf16 %v4059_v19, %v4059_v19 }
 0x942   : > { %v4062_v45 = vpop.f32.mrb[70].mxu1  ;;  %v7609_v54 = vld [vmem:[%s9228_s11 + $0x18] sm:$0xff]  }
 0x943   : > { %6994 = vmatmul.mubr.msk.bf16.vlgmr.msra.gmra.mrb[140].mxu0 %vm2604_vm12, %v3851_v15  ;;  %v7016_v36 = vpop.f32.mrb[71].mxu1 }
 0x944   : > { %7004 = vmatpush3.bf16.msra.mxu0 %v7594_v16  ;;  %7007 = vmatprep.mubr.msk.bf16.mxu0 %vm7707_vm2, %v7706_v26 }
 0x945   : > { %7005 = vmatprep.subr.bf16.mxu0 %v7706_v26 }
 0x948   : > { %7006 = vmatpush3.bf16.msra.mxu0 %v7595_v57  ;;  %v4166_v61 = vpop.f32.mrb[72].mxu1 }
 0x949   : > { %7017 = vmatprep.subr.bf16.mxu0 %v7706_v26  ;;  %v7029_v47 = vpop.f32.mrb[73].mxu1  ;;  %v4172_v32 = vpack.c.bf16 %v4166_v61, %v4166_v61 }
 0x94a   : > { %v4169_v34 = vpop.f32.mrb[74].mxu1 }
 0x94b   : > { %v7030_v41 = vpop.f32.mrb[75].mxu1  ;;  %v7610_v34 = vld [vmem:[%s9228_s11 + $0x20] sm:$0xff]  }
 0x94c   : > { %v7611_v41 = vld [vmem:[%s9228_s11 + $0x28] sm:$0xff]  }
 0x94f   : > { %7008 = vmatmul.mubr.msk.bf16.vlgmr.msra.gmra.mrb[140].mxu0 %vm2604_vm12, %v3958_v37 }
 0x950   : > { %7018 = vmatpush3.bf16.msra.mxu0 %v7596_v42  ;;  %7021 = vmatprep.mubr.msk.bf16.mxu0 %vm7707_vm2, %v7706_v26  ;;  %v4273_v55 = vpop.f32.mrb[76].mxu1 }
 0x951   : > { %7019 = vmatprep.subr.bf16.mxu0 %v7706_v26  ;;  %v7043_v56 = vpop.f32.mrb[77].mxu1  ;;  %v4279_v17 = vpack.c.bf16 %v4273_v55, %v4273_v55 }
 0x952   : > { %v4276_v59 = vpop.f32.mrb[78].mxu1 }
 0x953   : > { %v7044_v21 = vpop.f32.mrb[79].mxu1  ;;  %v7612_v59 = vld [vmem:[%s9228_s11 + $0x30] sm:$0xff]  }
 0x954   : > { %7020 = vmatpush3.bf16.msra.mxu0 %v7597_v52 }
 0x955   : > { %7031 = vmatprep.subr.bf16.mxu0 %v7706_v26 }
 0x958   : > { %v4380_v10 = vpop.f32.mrb[80].mxu1 }
 0x959   : > { %v7057_v58 = vpop.f32.mrb[81].mxu1  ;;  %v4386_v7 = vpack.c.bf16 %v4380_v10, %v4380_v10 }
 0x95a   : > { %v4383_v60 = vpop.f32.mrb[82].mxu1  ;;  %v7613_v58 = vld [vmem:[%s9228_s11 + $0x38] sm:$0xff]  }
 0x95b   : > { %7022 = vmatmul.mubr.msk.bf16.vlgmr.msra.gmra.mrb[140].mxu0 %vm2604_vm12, %v4065_v24  ;;  %v7058_v20 = vpop.f32.mrb[83].mxu1 }
 0x95c   : > { %7032 = vmatpush3.bf16.msra.mxu0 %v7598_v4  ;;  %7035 = vmatprep.mubr.msk.bf16.mxu0 %vm7707_vm2, %v7706_v26 }
 0x95d   : > { %7033 = vmatprep.subr.bf16.mxu0 %v7706_v26 }
 0x960   : > { %7034 = vmatpush3.bf16.msra.mxu0 %v7599_v2  ;;  %v4487_v25 = vpop.f32.mrb[84].mxu1 }
 0x961   : > { %7045 = vmatprep.subr.bf16.mxu0 %v7706_v26  ;;  %v7071_v1 = vpop.f32.mrb[85].mxu1  ;;  %v4493_v53 = vpack.c.bf16 %v4487_v25, %v4487_v25 }
 0x962   : > { %v4490_v28 = vpop.f32.mrb[86].mxu1 }
 0x963   : > { %v7072_v38 = vpop.f32.mrb[87].mxu1  ;;  %v7614_v28 = vld [vmem:[%s9228_s11 + $0x40] sm:$0xff]  }
 0x967   : > { %7036 = vmatmul.mubr.msk.bf16.vlgmr.msra.gmra.mrb[140].mxu0 %vm2604_vm12, %v4172_v32  ;;  %v7615_v32 = vld [vmem:[%s9228_s11 + $0x48] sm:$0xff]  }
 0x968   : > { %7046 = vmatpush3.bf16.msra.mxu0 %v7600_v0  ;;  %7049 = vmatprep.mubr.msk.bf16.mxu0 %vm7707_vm2, %v7706_v26 }
 0x969   : > { %7047 = vmatprep.subr.bf16.mxu0 %v7706_v26 }
 0x96c   : > { %7048 = vmatpush3.bf16.msra.mxu0 %v7601_v14 }
 0x96d   : > { %7059 = vmatprep.subr.bf16.mxu0 %v7706_v26 }
 0x973   : > { %7050 = vmatmul.mubr.msk.bf16.vlgmr.msra.gmra.mrb[140].mxu0 %vm2604_vm12, %v4279_v17 }
 0x974   : > { %7060 = vmatpush3.bf16.msra.mxu0 %v7602_v9  ;;  %7063 = vmatprep.mubr.msk.bf16.mxu0 %vm7707_vm2, %v7706_v26 }
 0x975   : > { %7061 = vmatprep.subr.bf16.mxu0 %v7706_v26 }
 0x978   : > { %7062 = vmatpush3.bf16.msra.mxu0 %v7603_v22  ;;  %v7616_v22 = vld [vmem:[%s9228_s11 + $0x50] sm:$0xff]  }
 0x979   : > { %7073 = vmatprep.subr.bf16.mxu0 %v7706_v26 }
 0x97f   : > { %7064 = vmatmul.mubr.msk.bf16.vlgmr.msra.gmra.mrb[140].mxu0 %vm2604_vm12, %v4386_v7 }
 0x980   : > { %7074 = vmatpush3.bf16.msra.mxu0 %v7604_v29  ;;  %7077 = vmatprep.mubr.msk.bf16.mxu0 %vm7707_vm2, %v7706_v26 }
 0x981   : > { %7075 = vmatprep.subr.bf16.mxu0 %v7706_v26 }
 0x984   : > { %7076 = vmatpush3.bf16.msra.mxu0 %v7605_v46 }
 0x985   : > { %7087 = vmatprep.subr.bf16.mxu0 %v7706_v26 }
 0x98b   : > { %7078 = vmatmul.mubr.msk.bf16.vlgmr.msra.gmra.mrb[140].mxu0 %vm2604_vm12, %v4493_v53 }
 0x98c   : > { %7091 = vmatprep.mubr.msk.bf16.mxu0 %vm7707_vm2, %v7706_v26  ;;  %7088 = vmatpush3.bf16.msra.mxu0 %v7606_v5  ;;  %v7617_v5 = vld [vmem:[%s9228_s11 + $0x58] sm:$0xff]  }
 0x98d   : > { %7089 = vmatprep.subr.bf16.mxu0 %v7706_v26 }
 0x990   : > { %7090 = vmatpush3.bf16.msra.mxu0 %v7607_v35  ;;  %v7625_v35 = vld [vmem:[%s9230_s13 + $0x8] sm:$0xff]  }
 0x991   : > { %7101 = vmatprep.subr.bf16.mxu0 %v7706_v26 }
 0xa5e   : > { %v4548_v8 = vpop.f32.mrb[140].mxu0 }
 0xa5f   : > { %v7225_v44 = vadd.f32 %v5955_v6, %v4548_v8  ;;  %v7079_v50 = vpop.f32.mrb[141].mxu0 }
 0xa60   : > { %v4551_v51 = vpop.f32.mrb[142].mxu0 }
 0xa61   : > { %vm4555_vm3 = vcmp.ge.f32.partialorder %v7225_v44, 0.0  ;;  %v4556_v27 = vmul.f32 0.01, %v7225_v44  ;;  %v7080_v39 = vpop.f32.mrb[143].mxu0 }
 0xa62   : > { %v7619_v39 = vld [vmem:[%s9228_s11 + $0x68] sm:$0xff]  }
 0xa63   : > { %v4557_v12 = vsel %vm4555_vm3, %v7225_v44, %v4556_v27  ;;  %v7618_v27 = vld [vmem:[%s9228_s11 + $0x60] sm:$0xff]  }
 0xa64   : > { %v4558_v23 = vpack.c.bf16 %v4557_v12, %v4557_v12 }
 0xa66   : > { %v4565_v3 = vsel %vm759_vm0, %v4558_v23, 0 }
 0xa67   : > { %7082 = vmatpush3.bf16.msra.mxu1 %v4565_v3 }
 0xa68   : > { %7095 = vmatprep.subr.bf16.mxu1 %v7706_v26 }
 0xa6a   : > { %7084 = vmatmul.mubr.msk.bf16.vlgmr.msra.gmra.mrb[88].mxu1 %vm746_vm1, %v4560_v43 }
 0xa6b   : > { %7096 = vmatpush3.bf16.msra.mxu1 %v4565_v3  ;;  %7097 = vmatprep.mubr.msk.bf16.mxu1 %vm7707_vm2, %v7706_v26 }
 0xa6c   : > { %7109 = vmatprep.subr.bf16.mxu1 %v7706_v26 }
 0xa72   : > { %7098 = vmatmul.mubr.msk.bf16.vlgmr.msra.gmra.mrb[92].mxu1 %vm746_vm1, %v6036_v30 }
 0xa73   : > { %7110 = vmatpush3.bf16.msra.mxu1 %v4565_v3  ;;  %7111 = vmatprep.mubr.msk.bf16.mxu1 %vm7707_vm2, %v7706_v26 }
 0xa74   : > { %7123 = vmatprep.subr.bf16.mxu1 %v7706_v26 }
 0xa7a   : > { %7112 = vmatmul.mubr.msk.bf16.vlgmr.msra.gmra.mrb[96].mxu1 %vm746_vm1, %v6045_v33  ;;  %v7620_v33 = vld [vmem:[%s9228_s11 + $0x70] sm:$0xff]  }
 0xa7b   : > { %7124 = vmatpush3.bf16.msra.mxu1 %v4565_v3  ;;  %7125 = vmatprep.mubr.msk.bf16.mxu1 %vm7707_vm2, %v7706_v26 }
 0xa7c   : > { %7137 = vmatprep.subr.bf16.mxu1 %v7706_v26 }
 0xa82   : > { %7126 = vmatmul.mubr.msk.bf16.vlgmr.msra.gmra.mrb[100].mxu1 %vm746_vm1, %v6054_v48  ;;  %v7621_v48 = vld [vmem:[%s9228_s11 + $0x78] sm:$0xff]  }
 0xa83   : > { %7138 = vmatpush3.bf16.msra.mxu1 %v4565_v3  ;;  %7139 = vmatprep.mubr.msk.bf16.mxu1 %vm7707_vm2, %v7706_v26 }
 0xa84   : > { %7151 = vmatprep.subr.bf16.mxu1 %v7706_v26 }
 0xa8a   : > { %7140 = vmatmul.mubr.msk.bf16.vlgmr.msra.gmra.mrb[104].mxu1 %vm746_vm1, %v6063_v49 }
 0xa8b   : > { %7152 = vmatpush3.bf16.msra.mxu1 %v4565_v3  ;;  %7153 = vmatprep.mubr.msk.bf16.mxu1 %vm7707_vm2, %v7706_v26 }
 0xa8c   : > { %7165 = vmatprep.subr.bf16.mxu1 %v7706_v26 }
 0xa92   : > { %7154 = vmatmul.mubr.msk.bf16.vlgmr.msra.gmra.mrb[108].mxu1 %vm746_vm1, %v6072_v62  ;;  %v7622_v62 = vld [vmem:[%s9228_s11 + $0x80] sm:$0xff]  }
 0xa93   : > { %7166 = vmatpush3.bf16.msra.mxu1 %v4565_v3  ;;  %7167 = vmatprep.mubr.msk.bf16.mxu1 %vm7707_vm2, %v7706_v26 }
 0xa94   : > { %7179 = vmatprep.subr.bf16.mxu1 %v7706_v26 }
 0xa9a   : > { %7168 = vmatmul.mubr.msk.bf16.vlgmr.msra.gmra.mrb[112].mxu1 %vm746_vm1, %v6081_v63  ;;  %v7623_v63 = vld [vmem:[%s9228_s11 + $0x88] sm:$0xff]  }
 0xa9b   : > { %7180 = vmatpush3.bf16.msra.mxu1 %v4565_v3  ;;  %7181 = vmatprep.mubr.msk.bf16.mxu1 %vm7707_vm2, %v7706_v26 }
 0xa9c   : > { %7193 = vmatprep.subr.bf16.mxu1 %v7706_v26 }
 0xaa2   : > { %7182 = vmatmul.mubr.msk.bf16.vlgmr.msra.gmra.mrb[116].mxu1 %vm746_vm1, %v6090_v18 }
 0xaa3   : > { %7194 = vmatpush3.bf16.msra.mxu1 %v4565_v3  ;;  %7195 = vmatprep.mubr.msk.bf16.mxu1 %vm7707_vm2, %v7706_v26 }
 0xaa4   : > { %7207 = vmatprep.subr.bf16.mxu1 %v7706_v26 }
 0xaaa   : > { %7196 = vmatmul.mubr.msk.bf16.vlgmr.msra.gmra.mrb[120].mxu1 %vm746_vm1, %v6099_v11  ;;  %v7624_v11 = vld [vmem:[%s9230_s13] sm:$0xff]   ;;  %vm5588_vm1 = vcmask 253952  }
 0xaab   : > { %7211 = vmatprep.mubr.msk.bf16.mxu1 %vm7707_vm2, %v7706_v26  ;;  %7208 = vmatpush3.bf16.msra.mxu1 %v7624_v11 }
 0xaac   : > { %7209 = vmatprep.subr.bf16.mxu1 %v7706_v26 }
 0xaaf   : > { %7210 = vmatpush3.bf16.msra.mxu1 %v7625_v35 }
 0xb3d   : > { %v4601_v40 = vpop.f32.mrb[88].mxu1 }
 0xb3e   : > { %v4607_v13 = vpack.c.bf16 %v4601_v40, %v4601_v40  ;;  %v7085_v15 = vpop.f32.mrb[89].mxu1  ;;  %v4559_v40 = vld [vmem:[%s9229_s12] sm:$0x1] }
 0xb3f   : > { %v4604_v16 = vpop.f32.mrb[90].mxu1 }
 0xb40   : > { %7092 = vmatmul.mubr.msk.bf16.vlgmr.msra.gmra.mrb[144].mxu0 %vm2604_vm12, %v4607_v13  ;;  %v7086_v19 = vpop.f32.mrb[91].mxu1 }
 0xb41   : > { %7102 = vmatpush3.bf16.msra.mxu0 %v7608_v31  ;;  %7105 = vmatprep.mubr.msk.bf16.mxu0 %vm7707_vm2, %v7706_v26 }
 0xb42   : > { %7103 = vmatprep.subr.bf16.mxu0 %v7706_v26 }
 0xb45   : > { %v4707_v45 = vpop.f32.mrb[92].mxu1  ;;  %7104 = vmatpush3.bf16.msra.mxu0 %v7609_v54 }
 0xb46   : > { %v7099_v36 = vpop.f32.mrb[93].mxu1  ;;  %7115 = vmatprep.subr.bf16.mxu0 %v7706_v26  ;;  %v4713_v61 = vpack.c.bf16 %v4707_v45, %v4707_v45 }
 0xb47   : > { %v4710_v57 = vpop.f32.mrb[94].mxu1 }
 0xb48   : > { %v7100_v47 = vpop.f32.mrb[95].mxu1 }
 0xb4c   : > { %7106 = vmatmul.mubr.msk.bf16.vlgmr.msra.gmra.mrb[144].mxu0 %vm2604_vm12, %v4713_v61 }
 0xb4d   : > { %7116 = vmatpush3.bf16.msra.mxu0 %v7610_v34  ;;  %v4814_v37 = vpop.f32.mrb[96].mxu1  ;;  %7119 = vmatprep.mubr.msk.bf16.mxu0 %vm7707_vm2, %v7706_v26 }
 0xb4e   : > { %7117 = vmatprep.subr.bf16.mxu0 %v7706_v26  ;;  %v7113_v42 = vpop.f32.mrb[97].mxu1  ;;  %v4820_v56 = vpack.c.bf16 %v4814_v37, %v4814_v37 }
 0xb4f   : > { %v4817_v52 = vpop.f32.mrb[98].mxu1 }
 0xb50   : > { %v7114_v55 = vpop.f32.mrb[99].mxu1 }
 0xb51   : > { %7118 = vmatpush3.bf16.msra.mxu0 %v7611_v41 }
 0xb52   : > { %7129 = vmatprep.subr.bf16.mxu0 %v7706_v26 }
 0xb55   : > { %v4921_v21 = vpop.f32.mrb[100].mxu1 }
 0xb56   : > { %v7127_v24 = vpop.f32.mrb[101].mxu1  ;;  %v4927_v25 = vpack.c.bf16 %v4921_v21, %v4921_v21 }
 0xb57   : > { %v4924_v4 = vpop.f32.mrb[102].mxu1 }
 0xb58   : > { %7120 = vmatmul.mubr.msk.bf16.vlgmr.msra.gmra.mrb[144].mxu0 %vm2604_vm12, %v4820_v56  ;;  %v7128_v10 = vpop.f32.mrb[103].mxu1 }
 0xb59   : > { %7130 = vmatpush3.bf16.msra.mxu0 %v7612_v59  ;;  %7133 = vmatprep.mubr.msk.bf16.mxu0 %vm7707_vm2, %v7706_v26 }
 0xb5a   : > { %7131 = vmatprep.subr.bf16.mxu0 %v7706_v26 }
 0xb5d   : > { %7132 = vmatpush3.bf16.msra.mxu0 %v7613_v58  ;;  %v5028_v60 = vpop.f32.mrb[104].mxu1 }
 0xb5e   : > { %7143 = vmatprep.subr.bf16.mxu0 %v7706_v26  ;;  %v7141_v20 = vpop.f32.mrb[105].mxu1  ;;  %v5034_v9 = vpack.c.bf16 %v5028_v60, %v5028_v60 }
 0xb5f   : > { %v5031_v2 = vpop.f32.mrb[106].mxu1 }
 0xb60   : > { %v7142_v1 = vpop.f32.mrb[107].mxu1 }
 0xb64   : > { %7134 = vmatmul.mubr.msk.bf16.vlgmr.msra.gmra.mrb[144].mxu0 %vm2604_vm12, %v4927_v25 }
 0xb65   : > { %7144 = vmatpush3.bf16.msra.mxu0 %v7614_v28  ;;  %7147 = vmatprep.mubr.msk.bf16.mxu0 %vm7707_vm2, %v7706_v26  ;;  %v5135_v38 = vpop.f32.mrb[108].mxu1 }
 0xb66   : > { %7145 = vmatprep.subr.bf16.mxu0 %v7706_v26  ;;  %v7155_v0 = vpop.f32.mrb[109].mxu1  ;;  %v5141_v50 = vpack.c.bf16 %v5135_v38, %v5135_v38 }
 0xb67   : > { %v5138_v14 = vpop.f32.mrb[110].mxu1 }
 0xb68   : > { %v7156_v17 = vpop.f32.mrb[111].mxu1 }
 0xb69   : > { %7146 = vmatpush3.bf16.msra.mxu0 %v7615_v32 }
 0xb6a   : > { %7157 = vmatprep.subr.bf16.mxu0 %v7706_v26 }
 0xb6d   : > { %v5242_v7 = vpop.f32.mrb[112].mxu1 }
 0xb6e   : > { %v7169_v29 = vpop.f32.mrb[113].mxu1  ;;  %v5248_v30 = vpack.c.bf16 %v5242_v7, %v5242_v7 }
 0xb6f   : > { %v5245_v46 = vpop.f32.mrb[114].mxu1 }
 0xb70   : > { %7148 = vmatmul.mubr.msk.bf16.vlgmr.msra.gmra.mrb[144].mxu0 %vm2604_vm12, %v5034_v9  ;;  %v7170_v53 = vpop.f32.mrb[115].mxu1 }
 0xb71   : > { %7158 = vmatpush3.bf16.msra.mxu0 %v7616_v22  ;;  %7161 = vmatprep.mubr.msk.bf16.mxu0 %vm7707_vm2, %v7706_v26 }
 0xb72   : > { %7159 = vmatprep.subr.bf16.mxu0 %v7706_v26 }
 0xb75   : > { %7160 = vmatpush3.bf16.msra.mxu0 %v7617_v5  ;;  %v5349_v6 = vpop.f32.mrb[116].mxu1 }
 0xb76   : > { %7171 = vmatprep.subr.bf16.mxu0 %v7706_v26  ;;  %v7183_v8 = vpop.f32.mrb[117].mxu1  ;;  %v5355_v49 = vpack.c.bf16 %v5349_v6, %v5349_v6 }
 0xb77   : > { %v5352_v44 = vpop.f32.mrb[118].mxu1 }
 0xb78   : > { %v7184_v51 = vpop.f32.mrb[119].mxu1 }
 0xb7c   : > { %7162 = vmatmul.mubr.msk.bf16.vlgmr.msra.gmra.mrb[144].mxu0 %vm2604_vm12, %v5141_v50 }
 0xb7d   : > { %7172 = vmatpush3.bf16.msra.mxu0 %v7618_v27  ;;  %7175 = vmatprep.mubr.msk.bf16.mxu0 %vm7707_vm2, %v7706_v26  ;;  %v5456_v12 = vpop.f32.mrb[120].mxu1 }
 0xb7e   : > { %7173 = vmatprep.subr.bf16.mxu0 %v7706_v26  ;;  %v7197_v23 = vpop.f32.mrb[121].mxu1  ;;  %v5462_v18 = vpack.c.bf16 %v5456_v12, %v5456_v12 }
 0xb7f   : > { %v5459_v3 = vpop.f32.mrb[122].mxu1 }
 0xb80   : > { %v7198_v43 = vpop.f32.mrb[123].mxu1 }
 0xb81   : > { %7174 = vmatpush3.bf16.msra.mxu0 %v7619_v39 }
 0xb82   : > { %7185 = vmatprep.subr.bf16.mxu0 %v7706_v26 }
 0xb88   : > { %7176 = vmatmul.mubr.msk.bf16.vlgmr.msra.gmra.mrb[144].mxu0 %vm2604_vm12, %v5248_v30 }
 0xb89   : > { %7186 = vmatpush3.bf16.msra.mxu0 %v7620_v33  ;;  %7189 = vmatprep.mubr.msk.bf16.mxu0 %vm7707_vm2, %v7706_v26 }
 0xb8a   : > { %7187 = vmatprep.subr.bf16.mxu0 %v7706_v26 }
 0xb8d   : > { %7188 = vmatpush3.bf16.msra.mxu0 %v7621_v48 }
 0xb8e   : > { %7199 = vmatprep.subr.bf16.mxu0 %v7706_v26 }
 0xb94   : > { %7190 = vmatmul.mubr.msk.bf16.vlgmr.msra.gmra.mrb[144].mxu0 %vm2604_vm12, %v5355_v49 }
 0xb95   : > { %7200 = vmatpush3.bf16.msra.mxu0 %v7622_v62  ;;  %7203 = vmatprep.mubr.msk.bf16.mxu0 %vm7707_vm2, %v7706_v26 }
 0xb96   : > { %7201 = vmatprep.subr.bf16.mxu0 %v7706_v26  ;;  %v5532_v26 = vld [vmem:[%s9231_s14] sm:$0x1] }
 0xb99   : > { %7202 = vmatpush3.bf16.msra.mxu0 %v7623_v63 }
 0xba0   : > { %7204 = vmatmul.mubr.msk.bf16.vlgmr.msra.gmra.mrb[144].mxu0 %vm2604_vm12, %v5462_v18 }
 0xc73   : > { %v5517_v31 = vpop.f32.mrb[144].mxu0 }
 0xc74   : > { %v7226_v13 = vadd.f32 %v5517_v31, %v4559_v40  ;;  %v7205_v15 = vpop.f32.mrb[145].mxu0 }
 0xc75   : > { %v5520_v16 = vpop.f32.mrb[146].mxu0 }
 0xc76   : > { %vm5524_vm0 = vcmp.ge.f32.partialorder %v7226_v13, 0.0  ;;  %v5525_v19 = vmul.f32 0.01, %v7226_v13  ;;  %v7206_v54 = vpop.f32.mrb[147].mxu0 }
 0xc78   : > { %v5526_v45 = vsel %vm5524_vm0, %v7226_v13, %v5525_v19 }
 0xc79   : > { %v5527_v36 = vpack.c.bf16 %v5526_v45, %v5526_v45 }
 0xc7b   : > { %7212 = vmatmul.mubr.msk.bf16.vlgmr.msra.gmra.mrb[124].mxu1 %vm2604_vm12, %v5527_v36 }
 0xd4e   : > { %v5582_v57 = vpop.f32.mrb[124].mxu1 }
 0xd4f   : > { %v5583_v61 = vadd.f32 %v5582_v57, %v5532_v26  ;;  %v7213_v47 = vpop.f32.mrb[125].mxu1 }
 0xd50   : > { %v5585_v34 = vpop.f32.mrb[126].mxu1 }
 0xd51   : > { %v7214_v37 = vpop.f32.mrb[127].mxu1  ;;  %5589 = vst.msk [vmem:[%s486_s0] sm:$0x1] %vm5588_vm1, %v5583_v61 }
 0xd52   : > { %7655 = shalt.err (!%p7652_p3)
}
 0xd53   : > { %s7656_s26 = scalar_lea.hbm %s9175_s24, 16  ;;  %s7660_s17 = scalar_lea.hbm %s9232_s15, 32 }
 0xd54   : > { %p7657_p4 = scmp.ne.s32.totalorder %s9175_s24, %s7656_s26  ;;  %p7661_p9 = scmp.lt.u32.totalorder %s9175_s24, %s9232_s15 }
 0xd55   : > { %p7662_p10 = scmp.lt.u32.totalorder %s7660_s17, %s7656_s26  ;;  %p7664_p12 = scmp.lt.u32.totalorder %s7656_s26, %s9175_s24 }
 0xd56   : > { %p7658_p7 = pnand %p7657_p4, %p7827_p5 }
 0xd57   : > { %p7663_p11 = por %p7662_p10, %p7661_p9 }
 0xd58   : > { %p7659_p8 = pneg %p7658_p7 }
 0xd59   : > { %p7665_p13 = por %p7664_p12, %p7663_p11 }
 0xd5b   : > { %p7666_p0 = pnand %p7665_p13, %p7659_p8 }
 0xd5d   : > { %7669 = shalt.err (!%p7666_p0)
}
 0xd5e   : > { %7396 = dma.vmem_to_hbm [thread:$0]  (%p7827_p5), %s9177_s20, 16, %s9175_s24, %s5591_s22  }
 0xd5f PF: > { %p7402_p1 = scmp.ge.s32.totalorder %s7704_s21, 2  ;;  %s5615_s27 = sand.u32 1, %s7692_s18  }
 0xd60   : > { %s5616_s30 = scalar_lea.sflag [#allocation3], %s5615_s27 }
 0xd61   : > { %p7399_p2 = pnand %p7402_p1, %p7831_p6 }
 0xd63   : > { %7687 = dma.done.wait (!%p7399_p2), %s5616_s30, 16  }
 0xd64   : > { %7689 = vsyncadd (!%p7399_p2), %s5616_s30, 4294967280  ;;  %s9250_s21 = sld [smem:[#allocation6_spill]]  ;;  %s9251_s26 = sld [smem:[#allocation5_spill]] }
 0xd65   : > { %s9252_s20 = sld [smem:[#allocation7_spill]]  ;;  %s9253_s18 = smov %s7696_s19 }
 0xd6a   : > { %p25_p3 = scmp.ge.s32.totalorder %s9250_s21, 4   ;;  %s9254_s19 = smov %s9251_s26 }
 0xd6c   :  { %27 = sbr.rel (!%p25_p3) target bundleno = 5 (0x5), region = 179 }
 0xd73   :  { %5620 = vsyncpa [#allocation3], 1 }
 0xd74   :  { %5622 = vsyncpa [#allocation3 + $0x1], 1 }

</bundles_post_ra>
